<compile_context>
chip_gen: v6e
topology: v6e:2x2x1
jax: 0.10.0
libtpu: 0.0.40
codegen_flags: <defaults>
</compile_context>

<pallas_src>
import functools

import jax
import jax.numpy as jnp
import numpy as np
from jax import lax
from jax.experimental import pallas as pl
from jax.experimental.pallas import tpu as pltpu

THRESHOLD = 1.0 - 0.1  # matches `self.threshold = 1 - 0.1`


def _round_up(x, m):
    return (x + m - 1) // m * m


def _act_kernel(state_ref, time_ref, pos_ref, wp_ref, bp_ref, wfn_ref, bfn_ref,
                out_state_ref, out_rem_ref, out_nupd_ref,
                state_sc, prev_sc, hp_sc, rem_sc, nup_sc,
                *, max_hop, total_tokens, tile, early_exit):
    """One token tile of the ACT loop.  Per-token carries live in VMEM scratch."""
    i = pl.program_id(0)

    # ---- init per-tile carries (scratch persists across grid steps) --------
    # Padded (out-of-range) tokens start "already halted" (hp = 2 > 1) so they
    # never keep the early-exit condition alive nor add hops.
    gidx = lax.broadcasted_iota(jnp.int32, (tile, 1), 0) + i * tile
    hp_sc[...] = jnp.where(gidx < total_tokens,
                           jnp.float32(0.0), jnp.float32(2.0))
    rem_sc[...] = jnp.zeros_like(rem_sc)
    nup_sc[...] = jnp.zeros_like(nup_sc)
    prev_sc[...] = jnp.zeros_like(prev_sc)
    state_sc[...] = state_ref[...].astype(jnp.float32)

    # ---- small loop-invariant operands, hoisted out of the hop loop --------
    wp = wp_ref[...]                    # (1, H) f32, halting Linear weight
    bp = bp_ref[0, 0]                   # scalar (SMEM), halting Linear bias
    bfn = bfn_ref[...]                  # (1, H) f32, transition Linear bias
    thr = jnp.float32(THRESHOLD)
    max_hop_f = jnp.float32(max_hop)

    def step_body(step, commit):
        hp = hp_sc[...]
        rem = rem_sc[...]
        nup = nup_sc[...]
        prev = prev_sc[...]

        # state = state + time_enc[:, :S, :] + pos_enc[:, step, :]
        s = state_sc[...] + time_ref[...] + pos_ref[pl.ds(step, 1), :]

        # Halting probability: exact f32 on the VPU (NOT bf16 / MXU-f32) so the
        # threshold comparisons match the reference (reviewer correctness note).
        logits = jnp.sum(s * wp, axis=1, keepdims=True) + bp       # (tile, 1)
        p = jax.nn.sigmoid(logits)

        still = (hp < 1.0).astype(jnp.float32)
        cand = hp + p * still
        new_halted = (cand > thr).astype(jnp.float32) * still
        still = (cand <= thr).astype(jnp.float32) * still
        hp_n = hp + p * still
        rem_n = rem + new_halted * (1.0 - hp_n)
        hp_n = hp_n + new_halted * rem_n
        nup_n = nup + still + new_halted
        uw = p * still + new_halted * rem_n                        # (tile, 1)

        # TODO(synk): `fn` is a user-supplied transition module in PyTorch;
        # modeled here as a deterministic Linear(H, H) (bf16 operands, f32 acc).
        s_fn = jnp.dot(s.astype(jnp.bfloat16), wfn_ref[...],
                       preferred_element_type=jnp.float32) + bfn    # (tile, H)

        prev_n = prev + uw * (s_fn - prev)                          # FMA form

        commit(state_sc, s_fn)
        commit(prev_sc, prev_n)
        commit(hp_sc, hp_n)
        commit(rem_sc, rem_n)
        commit(nup_sc, nup_n)

    def hop(step):
        # ACT while-loop condition evaluated over this token tile.
        alive = jnp.any((hp_sc[...] < thr) & (nup_sc[...] < max_hop_f))
        if early_exit:
            @pl.when(alive)
            def _():
                def commit(ref, new):
                    ref[...] = new
                step_body(step, commit)
        else:
            # Select-based gating: identical numerics, no iteration skipping.
            def commit(ref, new):
                ref[...] = jnp.where(alive, new, ref[...])
            step_body(step, commit)

    if max_hop <= 8:
        # Small static trip count: fully unroll for LLO scheduler visibility.
        for step in range(max_hop):
            hop(step)
    else:
        lax.fori_loop(0, max_hop, lambda s_, c: (hop(s_), c)[1], 0)

    # ---- outputs -------------------------------------------------------------
    out_state_ref[...] = prev_sc[...]
    out_rem_ref[...] = rem_sc[...]
    out_nupd_ref[...] = nup_sc[...]


def act_basic_forward(state, time_enc, pos_enc, wp, bp, wfn, bfn, *,
                      max_hop, tile_tokens=256):
    """Non-decoding ACT_basic.forward -> (previous_state, (remainders, n_updates)).

    tile_tokens: token-tile size (matmul M dim). Default 256 = multiple of the
    v6e/v7x 256x256 and v5e 128x128 MXU tiles; consider 128 on v7x (64 MiB VMEM
    per TC) for very large hidden sizes.
    """
    B, S, H = state.shape
    N = B * S
    tile = _round_up(min(int(tile_tokens), N), 8)
    n_pad = _round_up(N, tile)
    n_tiles = n_pad // tile

    # glue: flatten tokens, broadcast the per-position time encoding per token,
    # pre-cast the transition weight to bf16 once.
    state_tok = state.reshape(N, H).astype(jnp.float32)
    time_tok = jnp.broadcast_to(time_enc[:, :S, :], (B, S, H))
    time_tok = time_tok.reshape(N, H).astype(jnp.float32)
    if n_pad != N:
        pad = ((0, n_pad - N), (0, 0))
        state_tok = jnp.pad(state_tok, pad)
        time_tok = jnp.pad(time_tok, pad)
    pos2d = pos_enc.reshape(max_hop, H).astype(jnp.float32)
    wp2d = wp.reshape(1, H).astype(jnp.float32)
    bp2d = jnp.asarray(bp, jnp.float32).reshape(1, 1)
    wfn_bf = wfn.astype(jnp.bfloat16)
    bfn2d = bfn.reshape(1, H).astype(jnp.float32)

    tok_map = lambda i: (i, 0)
    const_map = lambda i: (0, 0)

    grid_spec = pltpu.PrefetchScalarGridSpec(
        num_scalar_prefetch=0,
        grid=(n_tiles,),
        in_specs=[
            pl.BlockSpec((tile, H), tok_map),                     # state (streamed)
            pl.BlockSpec((tile, H), tok_map),                     # time enc (streamed)
            pl.BlockSpec((max_hop, H), const_map),                # pos enc (resident)
            pl.BlockSpec((1, H), const_map),                      # halting W (resident)
            pl.BlockSpec(memory_space=pltpu.MemorySpace.SMEM),    # halting bias (SMEM)
            pl.BlockSpec((H, H), const_map),                      # transition W (bf16)
            pl.BlockSpec((1, H), const_map),                      # transition b
        ],
        out_specs=(
            pl.BlockSpec((tile, H), tok_map),                     # previous_state
            pl.BlockSpec((tile, 1), tok_map),                     # remainders
            pl.BlockSpec((tile, 1), tok_map),                     # n_updates
        ),
        scratch_shapes=[
            pltpu.VMEM((tile, H), jnp.float32),                   # state carry
            pltpu.VMEM((tile, H), jnp.float32),                   # previous_state carry
            pltpu.VMEM((tile, 1), jnp.float32),                   # halting probability
            pltpu.VMEM((tile, 1), jnp.float32),                   # remainders
            pltpu.VMEM((tile, 1), jnp.float32),                   # n_updates
        ],
    )
    out_shape = (jax.ShapeDtypeStruct((n_pad, H), jnp.float32),
                 jax.ShapeDtypeStruct((n_pad, 1), jnp.float32),
                 jax.ShapeDtypeStruct((n_pad, 1), jnp.float32))
    compiler_params = pltpu.CompilerParams(
        dimension_semantics=("parallel",),      # megacore sharding on v7x
        vmem_limit_bytes=48 * 1024 * 1024)      # explicit cap; fits v7x 64 MiB/TC

    def run(early_exit):
        kern = functools.partial(_act_kernel, max_hop=int(max_hop),
                                 total_tokens=N, tile=tile,
                                 early_exit=early_exit)
        outs = pl.pallas_call(kern, out_shape=out_shape, grid_spec=grid_spec,
                              compiler_params=compiler_params)(
            state_tok, time_tok, pos2d, wp2d, bp2d, wfn_bf, bfn2d)
        return jax.block_until_ready(outs)

    try:
        prev_flat, rem_flat, nup_flat = run(early_exit=True)
    except Exception:  # Mosaic build without vector-derived scf.if predicates
        prev_flat, rem_flat, nup_flat = run(early_exit=False)

    previous_state = prev_flat[:N].reshape(B, S, H)
    remainders = rem_flat[:N, 0].reshape(B, S)
    n_updates = nup_flat[:N, 0].reshape(B, S)
    return previous_state, (remainders, n_updates)


def _bf16_round(x):
    """Round-to-nearest-even f32 -> bf16 -> f32 (pure numpy)."""
    u = np.ascontiguousarray(np.asarray(x, np.float32)).view(np.uint32)
    u = u.astype(np.uint64)
    u = (u + 0x7FFF + ((u >> 16) & 1)) & 0xFFFF0000
    return u.astype(np.uint32).view(np.float32)


def _reference(state, time_enc, pos_enc, wp, bp, wfn, bfn, max_hop):
    """Numpy transcription of the PyTorch forward (non-decoding path).

    `fn` is modeled exactly as in the kernel: Linear(H, H) with bf16-rounded
    inputs/weights and f32 accumulation.  All ACT halting math is f32.
    """
    state = np.asarray(state, np.float32)
    time_enc = np.asarray(time_enc, np.float32)
    pos_enc = np.asarray(pos_enc, np.float32)
    wp, bp, wfn, bfn = (np.asarray(a, np.float32) for a in (wp, bp, wfn, bfn))
    wfn_q = _bf16_round(wfn)
    thr = np.float32(THRESHOLD)

    B, S, H = state.shape
    hp = np.zeros((B, S), np.float32)
    rem = np.zeros((B, S), np.float32)
    nup = np.zeros((B, S), np.float32)
    prev = np.zeros((B, S, H), np.float32)
    step = 0
    while np.any((hp < thr) & (nup < max_hop)):
        s = state + time_enc[:, :S, :]
        s = s + pos_enc[:, step:step + 1, :]
        logits = (s * wp.reshape(1, 1, H)).sum(-1) + bp.reshape(())
        p = 1.0 / (1.0 + np.exp(-logits))
        still = (hp < 1.0).astype(np.float32)
        new_halted = ((hp + p * still) > thr).astype(np.float32) * still
        still = ((hp + p * still) <= thr).astype(np.float32) * still
        hp = hp + p * still
        rem = rem + new_halted * (1.0 - hp)
        hp = hp + new_halted * rem
        nup = nup + still + new_halted
        uw = p * still + new_halted * rem
        s_fn = _bf16_round(s) @ wfn_q + bfn.reshape(1, 1, H)
        prev = s_fn * uw[..., None] + prev * (1.0 - uw[..., None])
        state = s_fn
        step += 1
    return prev, rem, nup


if __name__ == "__main__":
    B, S, H = 2, 8, 32
    max_hop = 4

    key = jax.random.PRNGKey(0)
    ks = jax.random.split(key, 6)
    state = jax.random.normal(ks[0], (B, S, H), jnp.float32) * 0.5
    time_enc = jax.random.normal(ks[1], (1, S, H), jnp.float32) * 0.1
    pos_enc = jax.random.normal(ks[2], (1, max_hop, H), jnp.float32) * 0.1
    # nn.Linear(hidden_size, 1): weight (1, H); bias filled with 1.0
    wp = jax.random.normal(ks[3], (1, H), jnp.float32) * (1.0 / np.sqrt(H))
    bp = jnp.ones((1, 1), jnp.float32)
    # transition fn modeled as Linear(H, H)
    wfn = jax.random.normal(ks[4], (H, H), jnp.float32) * (1.0 / np.sqrt(H))
    bfn = jax.random.normal(ks[5], (1, H), jnp.float32) * 0.1

    previous_state, (remainders, n_updates) = act_basic_forward(
        state, time_enc, pos_enc, wp, bp, wfn, bfn, max_hop=max_hop)
    jax.block_until_ready((previous_state, remainders, n_updates))

    ref_prev, ref_rem, ref_nup = _reference(
        state, time_enc, pos_enc, wp, bp, wfn, bfn, max_hop)
    np.testing.assert_allclose(np.asarray(n_updates), ref_nup, atol=1e-5)
    np.testing.assert_allclose(np.asarray(remainders), ref_rem,
                               rtol=1e-4, atol=1e-4)
    np.testing.assert_allclose(np.asarray(previous_state), ref_prev,
                               rtol=1e-3, atol=1e-3)

    print("KERNEL_OK")
</pallas_src>

<mosaic_0001>
module attributes {stable_mosaic.version = 11 : i64} {
  func.func @_act_kernel(%arg0: i32, %arg1: memref<16x32xf32, #tpu.memory_space<vmem>>, %arg2: memref<16x32xf32, #tpu.memory_space<vmem>>, %arg3: memref<4x32xf32, #tpu.memory_space<vmem>>, %arg4: memref<1x32xf32, #tpu.memory_space<vmem>>, %arg5: memref<1x1xf32, #tpu.memory_space<smem>>, %arg6: memref<32x32xbf16, #tpu.memory_space<vmem>>, %arg7: memref<1x32xf32, #tpu.memory_space<vmem>>, %arg8: memref<16x32xf32, #tpu.memory_space<vmem>>, %arg9: memref<16x1xf32, #tpu.memory_space<vmem>>, %arg10: memref<16x1xf32, #tpu.memory_space<vmem>>, %arg11: memref<16x32xf32, #tpu.memory_space<vmem>>, %arg12: memref<16x32xf32, #tpu.memory_space<vmem>>, %arg13: memref<16x1xf32, #tpu.memory_space<vmem>>, %arg14: memref<16x1xf32, #tpu.memory_space<vmem>>, %arg15: memref<16x1xf32, #tpu.memory_space<vmem>>) attributes {dimension_semantics = [#tpu.dimension_semantics<parallel>], iteration_bounds = array<i64: 1>, scalar_prefetch = 0 : i64, scratch_operands = 5 : i64, tpu.core_type = #tpu.core_type<tc>, window_params = [{transform_indices = @transform_0, window_bounds = array<i64: 16, 32>}, {transform_indices = @transform_1, window_bounds = array<i64: 16, 32>}, {pipeline_mode = #tpu.pipeline_mode<synchronous>, transform_indices = @transform_2, window_bounds = array<i64: 4, 32>}, {pipeline_mode = #tpu.pipeline_mode<synchronous>, transform_indices = @transform_3, window_bounds = array<i64: 1, 32>}, {transform_indices = @transform_4, window_bounds = array<i64: 1, 1>}, {pipeline_mode = #tpu.pipeline_mode<synchronous>, transform_indices = @transform_5, window_bounds = array<i64: 32, 32>}, {pipeline_mode = #tpu.pipeline_mode<synchronous>, transform_indices = @transform_6, window_bounds = array<i64: 1, 32>}, {transform_indices = @transform_7, window_bounds = array<i64: 16, 32>}, {transform_indices = @transform_8, window_bounds = array<i64: 16, 1>}, {transform_indices = @transform_9, window_bounds = array<i64: 16, 1>}]} {
    %0 = tpu.iota {dimensions = array<i32: 0>} : vector<16x1xi32>
    %c16_i32 = arith.constant 16 : i32
    %1 = arith.muli %arg0, %c16_i32 : i32
    %2 = vector.broadcast %1 : i32 to vector<16x1xi32>
    %3 = arith.addi %0, %2 : vector<16x1xi32>
    %c16_i32_0 = arith.constant 16 : i32
    %4 = vector.broadcast %c16_i32_0 : i32 to vector<16x1xi32>
    %5 = arith.cmpi slt, %3, %4 : vector<16x1xi32>
    %cst = arith.constant 0.000000e+00 : f32
    %cst_1 = arith.constant 2.000000e+00 : f32
    %6 = vector.broadcast %cst : f32 to vector<16x1xf32>
    %7 = vector.broadcast %cst_1 : f32 to vector<16x1xf32>
    %8 = arith.select %5, %6, %7 : vector<16x1xi1>, vector<16x1xf32>
    %c0 = arith.constant 0 : index
    %c0_2 = arith.constant 0 : index
    %9 = vector.load %arg13[%c0, %c0_2] : memref<16x1xf32, #tpu.memory_space<vmem>>, vector<16x1xf32>
    tpu.vector_store %arg13[%c0, %c0_2], %8 {strides = array<i32>} : memref<16x1xf32, #tpu.memory_space<vmem>>, vector<16x1xf32>,
    %cst_3 = arith.constant 0.000000e+00 : f32
    %10 = vector.broadcast %cst_3 : f32 to vector<16x1xf32>
    %c0_4 = arith.constant 0 : index
    %c0_5 = arith.constant 0 : index
    %11 = vector.load %arg14[%c0_4, %c0_5] : memref<16x1xf32, #tpu.memory_space<vmem>>, vector<16x1xf32>
    tpu.vector_store %arg14[%c0_4, %c0_5], %10 {strides = array<i32>} : memref<16x1xf32, #tpu.memory_space<vmem>>, vector<16x1xf32>,
    %cst_6 = arith.constant 0.000000e+00 : f32
    %12 = vector.broadcast %cst_6 : f32 to vector<16x1xf32>
    %c0_7 = arith.constant 0 : index
    %c0_8 = arith.constant 0 : index
    %13 = vector.load %arg15[%c0_7, %c0_8] : memref<16x1xf32, #tpu.memory_space<vmem>>, vector<16x1xf32>
    tpu.vector_store %arg15[%c0_7, %c0_8], %12 {strides = array<i32>} : memref<16x1xf32, #tpu.memory_space<vmem>>, vector<16x1xf32>,
    %cst_9 = arith.constant 0.000000e+00 : f32
    %14 = vector.broadcast %cst_9 : f32 to vector<16x32xf32>
    %c0_10 = arith.constant 0 : index
    %c0_11 = arith.constant 0 : index
    %15 = vector.load %arg12[%c0_10, %c0_11] : memref<16x32xf32, #tpu.memory_space<vmem>>, vector<16x32xf32>
    tpu.vector_store %arg12[%c0_10, %c0_11], %14 {strides = array<i32>} : memref<16x32xf32, #tpu.memory_space<vmem>>, vector<16x32xf32>,
    %c0_12 = arith.constant 0 : index
    %c0_13 = arith.constant 0 : index
    %16 = vector.load %arg1[%c0_12, %c0_13] : memref<16x32xf32, #tpu.memory_space<vmem>>, vector<16x32xf32>
    %c0_14 = arith.constant 0 : index
    %c0_15 = arith.constant 0 : index
    %17 = vector.load %arg11[%c0_14, %c0_15] : memref<16x32xf32, #tpu.memory_space<vmem>>, vector<16x32xf32>
    tpu.vector_store %arg11[%c0_14, %c0_15], %16 {strides = array<i32>} : memref<16x32xf32, #tpu.memory_space<vmem>>, vector<16x32xf32>,
    %c0_16 = arith.constant 0 : index
    %c0_17 = arith.constant 0 : index
    %18 = vector.load %arg4[%c0_16, %c0_17] : memref<1x32xf32, #tpu.memory_space<vmem>>, vector<1x32xf32>
    %c0_18 = arith.constant 0 : index
    %c0_19 = arith.constant 0 : index
    %19 = memref.load %arg5[%c0_18, %c0_19] : memref<1x1xf32, #tpu.memory_space<smem>>
    %c0_20 = arith.constant 0 : index
    %c0_21 = arith.constant 0 : index
    %20 = vector.load %arg7[%c0_20, %c0_21] : memref<1x32xf32, #tpu.memory_space<vmem>>, vector<1x32xf32>
    %c0_22 = arith.constant 0 : index
    %c0_23 = arith.constant 0 : index
    %21 = vector.load %arg13[%c0_22, %c0_23] : memref<16x1xf32, #tpu.memory_space<vmem>>, vector<16x1xf32>
    %cst_24 = arith.constant 0.899999976 : f32
    %22 = vector.broadcast %cst_24 : f32 to vector<16x1xf32>
    %23 = arith.cmpf olt, %21, %22 : vector<16x1xf32>
    %c0_25 = arith.constant 0 : index
    %c0_26 = arith.constant 0 : index
    %24 = vector.load %arg15[%c0_25, %c0_26] : memref<16x1xf32, #tpu.memory_space<vmem>>, vector<16x1xf32>
    %cst_27 = arith.constant 4.000000e+00 : f32
    %25 = vector.broadcast %cst_27 : f32 to vector<16x1xf32>
    %26 = arith.cmpf olt, %24, %25 : vector<16x1xf32>
    %27 = arith.andi %23, %26 : vector<16x1xi1>
    %cst_28 = arith.constant 1.000000e+00 : f32
    %cst_29 = arith.constant 0.000000e+00 : f32
    %28 = vector.broadcast %cst_28 : f32 to vector<16x1xf32>
    %29 = vector.broadcast %cst_29 : f32 to vector<16x1xf32>
    %30 = arith.select %27, %28, %29 : vector<16x1xi1>, vector<16x1xf32>
    %31 = vector.shape_cast %30 : vector<16x1xf32> to vector<1x16x1xf32>
    %cst_30 = arith.constant dense<0xFF800000> : vector<1xf32>
    %32 = vector.multi_reduction <maximumf>, %31, %cst_30 [1, 2] : vector<1x16x1xf32> to vector<1xf32>
    %33 = vector.shape_cast %32 : vector<1xf32> to vector<1x1x1xf32>
    %34 = vector.extract %33[0, 0, 0] : f32 from vector<1x1x1xf32>
    %cst_31 = arith.constant 0.000000e+00 : f32
    %35 = arith.cmpf ogt, %34, %cst_31 : f32
    %36 = arith.extui %35 : i1 to i32
    %cst_32 = arith.constant 0.899999976 : f32
    %c0_i32 = arith.constant 0 : i32
    %37 = arith.cmpi ne, %36, %c0_i32 : i32
    scf.if %37 {
      %c0_81 = arith.constant 0 : index
      %c0_82 = arith.constant 0 : index
      %95 = vector.load %arg13[%c0_81, %c0_82] : memref<16x1xf32, #tpu.memory_space<vmem>>, vector<16x1xf32>
      %c0_83 = arith.constant 0 : index
      %c0_84 = arith.constant 0 : index
      %96 = vector.load %arg14[%c0_83, %c0_84] : memref<16x1xf32, #tpu.memory_space<vmem>>, vector<16x1xf32>
      %c0_85 = arith.constant 0 : index
      %c0_86 = arith.constant 0 : index
      %97 = vector.load %arg15[%c0_85, %c0_86] : memref<16x1xf32, #tpu.memory_space<vmem>>, vector<16x1xf32>
      %c0_87 = arith.constant 0 : index
      %c0_88 = arith.constant 0 : index
      %98 = vector.load %arg12[%c0_87, %c0_88] : memref<16x32xf32, #tpu.memory_space<vmem>>, vector<16x32xf32>
      %c0_89 = arith.constant 0 : index
      %c0_90 = arith.constant 0 : index
      %99 = vector.load %arg11[%c0_89, %c0_90] : memref<16x32xf32, #tpu.memory_space<vmem>>, vector<16x32xf32>
      %c0_91 = arith.constant 0 : index
      %c0_92 = arith.constant 0 : index
      %100 = vector.load %arg2[%c0_91, %c0_92] : memref<16x32xf32, #tpu.memory_space<vmem>>, vector<16x32xf32>
      %101 = arith.addf %99, %100 : vector<16x32xf32>
      %c0_93 = arith.constant 0 : index
      %c0_94 = arith.constant 0 : index
      %102 = vector.load %arg3[%c0_93, %c0_94] : memref<4x32xf32, #tpu.memory_space<vmem>>, vector<1x32xf32>
      %103 = vector.broadcast %102 : vector<1x32xf32> to vector<16x32xf32>
      %104 = arith.addf %101, %103 : vector<16x32xf32>
      %105 = vector.broadcast %18 : vector<1x32xf32> to vector<16x32xf32>
      %106 = arith.mulf %104, %105 : vector<16x32xf32>
      %cst_95 = arith.constant dense<0.000000e+00> : vector<16xf32>
      %107 = vector.multi_reduction <add>, %106, %cst_95 [1] : vector<16x32xf32> to vector<16xf32>
      %108 = vector.shape_cast %107 : vector<16xf32> to vector<16x1xf32>
      %109 = vector.broadcast %19 : f32 to vector<16x1xf32>
      %110 = arith.addf %108, %109 : vector<16x1xf32>
      %111 = arith.negf %110 : vector<16x1xf32>
      %112 = math.exp %111 : vector<16x1xf32>
      %cst_96 = arith.constant 1.000000e+00 : f32
      %113 = vector.broadcast %cst_96 : f32 to vector<16x1xf32>
      %114 = arith.addf %113, %112 : vector<16x1xf32>
      %115 = arith.divf %113, %114 : vector<16x1xf32>
      %cst_97 = arith.constant 1.000000e+00 : f32
      %116 = vector.broadcast %cst_97 : f32 to vector<16x1xf32>
      %117 = arith.cmpf olt, %95, %116 : vector<16x1xf32>
      %118 = arith.extui %117 : vector<16x1xi1> to vector<16x1xi32>
      %119 = arith.sitofp %118 : vector<16x1xi32> to vector<16x1xf32>
      %120 = arith.mulf %115, %119 : vector<16x1xf32>
      %121 = arith.addf %95, %120 : vector<16x1xf32>
      %122 = vector.broadcast %cst_32 : f32 to vector<16x1xf32>
      %123 = arith.cmpf ogt, %121, %122 : vector<16x1xf32>
      %124 = arith.extui %123 : vector<16x1xi1> to vector<16x1xi32>
      %125 = arith.sitofp %124 : vector<16x1xi32> to vector<16x1xf32>
      %126 = arith.mulf %125, %119 : vector<16x1xf32>
      %127 = vector.broadcast %cst_32 : f32 to vector<16x1xf32>
      %128 = arith.cmpf ole, %121, %127 : vector<16x1xf32>
      %129 = arith.extui %128 : vector<16x1xi1> to vector<16x1xi32>
      %130 = arith.sitofp %129 : vector<16x1xi32> to vector<16x1xf32>
      %131 = arith.mulf %130, %119 : vector<16x1xf32>
      %132 = arith.mulf %115, %131 : vector<16x1xf32>
      %133 = arith.addf %95, %132 : vector<16x1xf32>
      %cst_98 = arith.constant 1.000000e+00 : f32
      %134 = vector.broadcast %cst_98 : f32 to vector<16x1xf32>
      %135 = arith.subf %134, %133 : vector<16x1xf32>
      %136 = arith.mulf %126, %135 : vector<16x1xf32>
      %137 = arith.addf %96, %136 : vector<16x1xf32>
      %138 = arith.mulf %126, %137 : vector<16x1xf32>
      %139 = arith.addf %133, %138 : vector<16x1xf32>
      %140 = arith.addf %97, %131 : vector<16x1xf32>
      %141 = arith.addf %140, %126 : vector<16x1xf32>
      %142 = arith.mulf %115, %131 : vector<16x1xf32>
      %143 = arith.mulf %126, %137 : vector<16x1xf32>
      %144 = arith.addf %142, %143 : vector<16x1xf32>
      %145 = arith.truncf %104 : vector<16x32xf32> to vector<16x32xbf16>
      %c0_99 = arith.constant 0 : index
      %c0_100 = arith.constant 0 : index
      %146 = vector.load %arg6[%c0_99, %c0_100] : memref<32x32xbf16, #tpu.memory_space<vmem>>, vector<32x32xbf16>
      %cst_101 = arith.constant dense<0.000000e+00> : vector<16x32xf32>
      %147 = tpu.matmul %145, %146, %cst_101 {dimension_numbers = #tpu.dot_dimension_numbers<[1], [0], [0], [1], [0, 0, 1, 1], [], []>} : vector<16x32xbf16>, vector<32x32xbf16>, vector<16x32xf32> -> vector<16x32xf32>
      %148 = vector.broadcast %20 : vector<1x32xf32> to vector<16x32xf32>
      %149 = arith.addf %147, %148 : vector<16x32xf32>
      %150 = arith.subf %149, %98 : vector<16x32xf32>
      %151 = vector.broadcast %144 : vector<16x1xf32> to vector<16x32xf32>
      %152 = arith.mulf %151, %150 : vector<16x32xf32>
      %153 = arith.addf %98, %152 : vector<16x32xf32>
      %c0_102 = arith.constant 0 : index
      %c0_103 = arith.constant 0 : index
      %154 = vector.load %arg11[%c0_102, %c0_103] : memref<16x32xf32, #tpu.memory_space<vmem>>, vector<16x32xf32>
      tpu.vector_store %arg11[%c0_102, %c0_103], %149 {strides = array<i32>} : memref<16x32xf32, #tpu.memory_space<vmem>>, vector<16x32xf32>,
      %c0_104 = arith.constant 0 : index
      %c0_105 = arith.constant 0 : index
      %155 = vector.load %arg12[%c0_104, %c0_105] : memref<16x32xf32, #tpu.memory_space<vmem>>, vector<16x32xf32>
      tpu.vector_store %arg12[%c0_104, %c0_105], %153 {strides = array<i32>} : memref<16x32xf32, #tpu.memory_space<vmem>>, vector<16x32xf32>,
      %c0_106 = arith.constant 0 : index
      %c0_107 = arith.constant 0 : index
      %156 = vector.load %arg13[%c0_106, %c0_107] : memref<16x1xf32, #tpu.memory_space<vmem>>, vector<16x1xf32>
      tpu.vector_store %arg13[%c0_106, %c0_107], %139 {strides = array<i32>} : memref<16x1xf32, #tpu.memory_space<vmem>>, vector<16x1xf32>,
      %c0_108 = arith.constant 0 : index
      %c0_109 = arith.constant 0 : index
      %157 = vector.load %arg14[%c0_108, %c0_109] : memref<16x1xf32, #tpu.memory_space<vmem>>, vector<16x1xf32>
      tpu.vector_store %arg14[%c0_108, %c0_109], %137 {strides = array<i32>} : memref<16x1xf32, #tpu.memory_space<vmem>>, vector<16x1xf32>,
      %c0_110 = arith.constant 0 : index
      %c0_111 = arith.constant 0 : index
      %158 = vector.load %arg15[%c0_110, %c0_111] : memref<16x1xf32, #tpu.memory_space<vmem>>, vector<16x1xf32>
      tpu.vector_store %arg15[%c0_110, %c0_111], %141 {strides = array<i32>} : memref<16x1xf32, #tpu.memory_space<vmem>>, vector<16x1xf32>,
    } else {
    }
    %c0_33 = arith.constant 0 : index
    %c0_34 = arith.constant 0 : index
    %38 = vector.load %arg13[%c0_33, %c0_34] : memref<16x1xf32, #tpu.memory_space<vmem>>, vector<16x1xf32>
    %cst_35 = arith.constant 0.899999976 : f32
    %39 = vector.broadcast %cst_35 : f32 to vector<16x1xf32>
    %40 = arith.cmpf olt, %38, %39 : vector<16x1xf32>
    %c0_36 = arith.constant 0 : index
    %c0_37 = arith.constant 0 : index
    %41 = vector.load %arg15[%c0_36, %c0_37] : memref<16x1xf32, #tpu.memory_space<vmem>>, vector<16x1xf32>
    %cst_38 = arith.constant 4.000000e+00 : f32
    %42 = vector.broadcast %cst_38 : f32 to vector<16x1xf32>
    %43 = arith.cmpf olt, %41, %42 : vector<16x1xf32>
    %44 = arith.andi %40, %43 : vector<16x1xi1>
    %cst_39 = arith.constant 1.000000e+00 : f32
    %cst_40 = arith.constant 0.000000e+00 : f32
    %45 = vector.broadcast %cst_39 : f32 to vector<16x1xf32>
    %46 = vector.broadcast %cst_40 : f32 to vector<16x1xf32>
    %47 = arith.select %44, %45, %46 : vector<16x1xi1>, vector<16x1xf32>
    %48 = vector.shape_cast %47 : vector<16x1xf32> to vector<1x16x1xf32>
    %cst_41 = arith.constant dense<0xFF800000> : vector<1xf32>
    %49 = vector.multi_reduction <maximumf>, %48, %cst_41 [1, 2] : vector<1x16x1xf32> to vector<1xf32>
    %50 = vector.shape_cast %49 : vector<1xf32> to vector<1x1x1xf32>
    %51 = vector.extract %50[0, 0, 0] : f32 from vector<1x1x1xf32>
    %cst_42 = arith.constant 0.000000e+00 : f32
    %52 = arith.cmpf ogt, %51, %cst_42 : f32
    %53 = arith.extui %52 : i1 to i32
    %cst_43 = arith.constant 0.899999976 : f32
    %c0_i32_44 = arith.constant 0 : i32
    %54 = arith.cmpi ne, %53, %c0_i32_44 : i32
    scf.if %54 {
      %c0_81 = arith.constant 0 : index
      %c0_82 = arith.constant 0 : index
      %95 = vector.load %arg13[%c0_81, %c0_82] : memref<16x1xf32, #tpu.memory_space<vmem>>, vector<16x1xf32>
      %c0_83 = arith.constant 0 : index
      %c0_84 = arith.constant 0 : index
      %96 = vector.load %arg14[%c0_83, %c0_84] : memref<16x1xf32, #tpu.memory_space<vmem>>, vector<16x1xf32>
      %c0_85 = arith.constant 0 : index
      %c0_86 = arith.constant 0 : index
      %97 = vector.load %arg15[%c0_85, %c0_86] : memref<16x1xf32, #tpu.memory_space<vmem>>, vector<16x1xf32>
      %c0_87 = arith.constant 0 : index
      %c0_88 = arith.constant 0 : index
      %98 = vector.load %arg12[%c0_87, %c0_88] : memref<16x32xf32, #tpu.memory_space<vmem>>, vector<16x32xf32>
      %c0_89 = arith.constant 0 : index
      %c0_90 = arith.constant 0 : index
      %99 = vector.load %arg11[%c0_89, %c0_90] : memref<16x32xf32, #tpu.memory_space<vmem>>, vector<16x32xf32>
      %c0_91 = arith.constant 0 : index
      %c0_92 = arith.constant 0 : index
      %100 = vector.load %arg2[%c0_91, %c0_92] : memref<16x32xf32, #tpu.memory_space<vmem>>, vector<16x32xf32>
      %101 = arith.addf %99, %100 : vector<16x32xf32>
      %c1 = arith.constant 1 : index
      %c0_93 = arith.constant 0 : index
      %102 = vector.load %arg3[%c1, %c0_93] : memref<4x32xf32, #tpu.memory_space<vmem>>, vector<1x32xf32>
      %103 = vector.broadcast %102 : vector<1x32xf32> to vector<16x32xf32>
      %104 = arith.addf %101, %103 : vector<16x32xf32>
      %105 = vector.broadcast %18 : vector<1x32xf32> to vector<16x32xf32>
      %106 = arith.mulf %104, %105 : vector<16x32xf32>
      %cst_94 = arith.constant dense<0.000000e+00> : vector<16xf32>
      %107 = vector.multi_reduction <add>, %106, %cst_94 [1] : vector<16x32xf32> to vector<16xf32>
      %108 = vector.shape_cast %107 : vector<16xf32> to vector<16x1xf32>
      %109 = vector.broadcast %19 : f32 to vector<16x1xf32>
      %110 = arith.addf %108, %109 : vector<16x1xf32>
      %111 = arith.negf %110 : vector<16x1xf32>
      %112 = math.exp %111 : vector<16x1xf32>
      %cst_95 = arith.constant 1.000000e+00 : f32
      %113 = vector.broadcast %cst_95 : f32 to vector<16x1xf32>
      %114 = arith.addf %113, %112 : vector<16x1xf32>
      %115 = arith.divf %113, %114 : vector<16x1xf32>
      %cst_96 = arith.constant 1.000000e+00 : f32
      %116 = vector.broadcast %cst_96 : f32 to vector<16x1xf32>
      %117 = arith.cmpf olt, %95, %116 : vector<16x1xf32>
      %118 = arith.extui %117 : vector<16x1xi1> to vector<16x1xi32>
      %119 = arith.sitofp %118 : vector<16x1xi32> to vector<16x1xf32>
      %120 = arith.mulf %115, %119 : vector<16x1xf32>
      %121 = arith.addf %95, %120 : vector<16x1xf32>
      %122 = vector.broadcast %cst_43 : f32 to vector<16x1xf32>
      %123 = arith.cmpf ogt, %121, %122 : vector<16x1xf32>
      %124 = arith.extui %123 : vector<16x1xi1> to vector<16x1xi32>
      %125 = arith.sitofp %124 : vector<16x1xi32> to vector<16x1xf32>
      %126 = arith.mulf %125, %119 : vector<16x1xf32>
      %127 = vector.broadcast %cst_43 : f32 to vector<16x1xf32>
      %128 = arith.cmpf ole, %121, %127 : vector<16x1xf32>
      %129 = arith.extui %128 : vector<16x1xi1> to vector<16x1xi32>
      %130 = arith.sitofp %129 : vector<16x1xi32> to vector<16x1xf32>
      %131 = arith.mulf %130, %119 : vector<16x1xf32>
      %132 = arith.mulf %115, %131 : vector<16x1xf32>
      %133 = arith.addf %95, %132 : vector<16x1xf32>
      %cst_97 = arith.constant 1.000000e+00 : f32
      %134 = vector.broadcast %cst_97 : f32 to vector<16x1xf32>
      %135 = arith.subf %134, %133 : vector<16x1xf32>
      %136 = arith.mulf %126, %135 : vector<16x1xf32>
      %137 = arith.addf %96, %136 : vector<16x1xf32>
      %138 = arith.mulf %126, %137 : vector<16x1xf32>
      %139 = arith.addf %133, %138 : vector<16x1xf32>
      %140 = arith.addf %97, %131 : vector<16x1xf32>
      %141 = arith.addf %140, %126 : vector<16x1xf32>
      %142 = arith.mulf %115, %131 : vector<16x1xf32>
      %143 = arith.mulf %126, %137 : vector<16x1xf32>
      %144 = arith.addf %142, %143 : vector<16x1xf32>
      %145 = arith.truncf %104 : vector<16x32xf32> to vector<16x32xbf16>
      %c0_98 = arith.constant 0 : index
      %c0_99 = arith.constant 0 : index
      %146 = vector.load %arg6[%c0_98, %c0_99] : memref<32x32xbf16, #tpu.memory_space<vmem>>, vector<32x32xbf16>
      %cst_100 = arith.constant dense<0.000000e+00> : vector<16x32xf32>
      %147 = tpu.matmul %145, %146, %cst_100 {dimension_numbers = #tpu.dot_dimension_numbers<[1], [0], [0], [1], [0, 0, 1, 1], [], []>} : vector<16x32xbf16>, vector<32x32xbf16>, vector<16x32xf32> -> vector<16x32xf32>
      %148 = vector.broadcast %20 : vector<1x32xf32> to vector<16x32xf32>
      %149 = arith.addf %147, %148 : vector<16x32xf32>
      %150 = arith.subf %149, %98 : vector<16x32xf32>
      %151 = vector.broadcast %144 : vector<16x1xf32> to vector<16x32xf32>
      %152 = arith.mulf %151, %150 : vector<16x32xf32>
      %153 = arith.addf %98, %152 : vector<16x32xf32>
      %c0_101 = arith.constant 0 : index
      %c0_102 = arith.constant 0 : index
      %154 = vector.load %arg11[%c0_101, %c0_102] : memref<16x32xf32, #tpu.memory_space<vmem>>, vector<16x32xf32>
      tpu.vector_store %arg11[%c0_101, %c0_102], %149 {strides = array<i32>} : memref<16x32xf32, #tpu.memory_space<vmem>>, vector<16x32xf32>,
      %c0_103 = arith.constant 0 : index
      %c0_104 = arith.constant 0 : index
      %155 = vector.load %arg12[%c0_103, %c0_104] : memref<16x32xf32, #tpu.memory_space<vmem>>, vector<16x32xf32>
      tpu.vector_store %arg12[%c0_103, %c0_104], %153 {strides = array<i32>} : memref<16x32xf32, #tpu.memory_space<vmem>>, vector<16x32xf32>,
      %c0_105 = arith.constant 0 : index
      %c0_106 = arith.constant 0 : index
      %156 = vector.load %arg13[%c0_105, %c0_106] : memref<16x1xf32, #tpu.memory_space<vmem>>, vector<16x1xf32>
      tpu.vector_store %arg13[%c0_105, %c0_106], %139 {strides = array<i32>} : memref<16x1xf32, #tpu.memory_space<vmem>>, vector<16x1xf32>,
      %c0_107 = arith.constant 0 : index
      %c0_108 = arith.constant 0 : index
      %157 = vector.load %arg14[%c0_107, %c0_108] : memref<16x1xf32, #tpu.memory_space<vmem>>, vector<16x1xf32>
      tpu.vector_store %arg14[%c0_107, %c0_108], %137 {strides = array<i32>} : memref<16x1xf32, #tpu.memory_space<vmem>>, vector<16x1xf32>,
      %c0_109 = arith.constant 0 : index
      %c0_110 = arith.constant 0 : index
      %158 = vector.load %arg15[%c0_109, %c0_110] : memref<16x1xf32, #tpu.memory_space<vmem>>, vector<16x1xf32>
      tpu.vector_store %arg15[%c0_109, %c0_110], %141 {strides = array<i32>} : memref<16x1xf32, #tpu.memory_space<vmem>>, vector<16x1xf32>,
    } else {
    }
    %c0_45 = arith.constant 0 : index
    %c0_46 = arith.constant 0 : index
    %55 = vector.load %arg13[%c0_45, %c0_46] : memref<16x1xf32, #tpu.memory_space<vmem>>, vector<16x1xf32>
    %cst_47 = arith.constant 0.899999976 : f32
    %56 = vector.broadcast %cst_47 : f32 to vector<16x1xf32>
    %57 = arith.cmpf olt, %55, %56 : vector<16x1xf32>
    %c0_48 = arith.constant 0 : index
    %c0_49 = arith.constant 0 : index
    %58 = vector.load %arg15[%c0_48, %c0_49] : memref<16x1xf32, #tpu.memory_space<vmem>>, vector<16x1xf32>
    %cst_50 = arith.constant 4.000000e+00 : f32
    %59 = vector.broadcast %cst_50 : f32 to vector<16x1xf32>
    %60 = arith.cmpf olt, %58, %59 : vector<16x1xf32>
    %61 = arith.andi %57, %60 : vector<16x1xi1>
    %cst_51 = arith.constant 1.000000e+00 : f32
    %cst_52 = arith.constant 0.000000e+00 : f32
    %62 = vector.broadcast %cst_51 : f32 to vector<16x1xf32>
    %63 = vector.broadcast %cst_52 : f32 to vector<16x1xf32>
    %64 = arith.select %61, %62, %63 : vector<16x1xi1>, vector<16x1xf32>
    %65 = vector.shape_cast %64 : vector<16x1xf32> to vector<1x16x1xf32>
    %cst_53 = arith.constant dense<0xFF800000> : vector<1xf32>
    %66 = vector.multi_reduction <maximumf>, %65, %cst_53 [1, 2] : vector<1x16x1xf32> to vector<1xf32>
    %67 = vector.shape_cast %66 : vector<1xf32> to vector<1x1x1xf32>
    %68 = vector.extract %67[0, 0, 0] : f32 from vector<1x1x1xf32>
    %cst_54 = arith.constant 0.000000e+00 : f32
    %69 = arith.cmpf ogt, %68, %cst_54 : f32
    %70 = arith.extui %69 : i1 to i32
    %cst_55 = arith.constant 0.899999976 : f32
    %c0_i32_56 = arith.constant 0 : i32
    %71 = arith.cmpi ne, %70, %c0_i32_56 : i32
    scf.if %71 {
      %c0_81 = arith.constant 0 : index
      %c0_82 = arith.constant 0 : index
      %95 = vector.load %arg13[%c0_81, %c0_82] : memref<16x1xf32, #tpu.memory_space<vmem>>, vector<16x1xf32>
      %c0_83 = arith.constant 0 : index
      %c0_84 = arith.constant 0 : index
      %96 = vector.load %arg14[%c0_83, %c0_84] : memref<16x1xf32, #tpu.memory_space<vmem>>, vector<16x1xf32>
      %c0_85 = arith.constant 0 : index
      %c0_86 = arith.constant 0 : index
      %97 = vector.load %arg15[%c0_85, %c0_86] : memref<16x1xf32, #tpu.memory_space<vmem>>, vector<16x1xf32>
      %c0_87 = arith.constant 0 : index
      %c0_88 = arith.constant 0 : index
      %98 = vector.load %arg12[%c0_87, %c0_88] : memref<16x32xf32, #tpu.memory_space<vmem>>, vector<16x32xf32>
      %c0_89 = arith.constant 0 : index
      %c0_90 = arith.constant 0 : index
      %99 = vector.load %arg11[%c0_89, %c0_90] : memref<16x32xf32, #tpu.memory_space<vmem>>, vector<16x32xf32>
      %c0_91 = arith.constant 0 : index
      %c0_92 = arith.constant 0 : index
      %100 = vector.load %arg2[%c0_91, %c0_92] : memref<16x32xf32, #tpu.memory_space<vmem>>, vector<16x32xf32>
      %101 = arith.addf %99, %100 : vector<16x32xf32>
      %c2 = arith.constant 2 : index
      %c0_93 = arith.constant 0 : index
      %102 = vector.load %arg3[%c2, %c0_93] : memref<4x32xf32, #tpu.memory_space<vmem>>, vector<1x32xf32>
      %103 = vector.broadcast %102 : vector<1x32xf32> to vector<16x32xf32>
      %104 = arith.addf %101, %103 : vector<16x32xf32>
      %105 = vector.broadcast %18 : vector<1x32xf32> to vector<16x32xf32>
      %106 = arith.mulf %104, %105 : vector<16x32xf32>
      %cst_94 = arith.constant dense<0.000000e+00> : vector<16xf32>
      %107 = vector.multi_reduction <add>, %106, %cst_94 [1] : vector<16x32xf32> to vector<16xf32>
      %108 = vector.shape_cast %107 : vector<16xf32> to vector<16x1xf32>
      %109 = vector.broadcast %19 : f32 to vector<16x1xf32>
      %110 = arith.addf %108, %109 : vector<16x1xf32>
      %111 = arith.negf %110 : vector<16x1xf32>
      %112 = math.exp %111 : vector<16x1xf32>
      %cst_95 = arith.constant 1.000000e+00 : f32
      %113 = vector.broadcast %cst_95 : f32 to vector<16x1xf32>
      %114 = arith.addf %113, %112 : vector<16x1xf32>
      %115 = arith.divf %113, %114 : vector<16x1xf32>
      %cst_96 = arith.constant 1.000000e+00 : f32
      %116 = vector.broadcast %cst_96 : f32 to vector<16x1xf32>
      %117 = arith.cmpf olt, %95, %116 : vector<16x1xf32>
      %118 = arith.extui %117 : vector<16x1xi1> to vector<16x1xi32>
      %119 = arith.sitofp %118 : vector<16x1xi32> to vector<16x1xf32>
      %120 = arith.mulf %115, %119 : vector<16x1xf32>
      %121 = arith.addf %95, %120 : vector<16x1xf32>
      %122 = vector.broadcast %cst_55 : f32 to vector<16x1xf32>
      %123 = arith.cmpf ogt, %121, %122 : vector<16x1xf32>
      %124 = arith.extui %123 : vector<16x1xi1> to vector<16x1xi32>
      %125 = arith.sitofp %124 : vector<16x1xi32> to vector<16x1xf32>
      %126 = arith.mulf %125, %119 : vector<16x1xf32>
      %127 = vector.broadcast %cst_55 : f32 to vector<16x1xf32>
      %128 = arith.cmpf ole, %121, %127 : vector<16x1xf32>
      %129 = arith.extui %128 : vector<16x1xi1> to vector<16x1xi32>
      %130 = arith.sitofp %129 : vector<16x1xi32> to vector<16x1xf32>
      %131 = arith.mulf %130, %119 : vector<16x1xf32>
      %132 = arith.mulf %115, %131 : vector<16x1xf32>
      %133 = arith.addf %95, %132 : vector<16x1xf32>
      %cst_97 = arith.constant 1.000000e+00 : f32
      %134 = vector.broadcast %cst_97 : f32 to vector<16x1xf32>
      %135 = arith.subf %134, %133 : vector<16x1xf32>
      %136 = arith.mulf %126, %135 : vector<16x1xf32>
      %137 = arith.addf %96, %136 : vector<16x1xf32>
      %138 = arith.mulf %126, %137 : vector<16x1xf32>
      %139 = arith.addf %133, %138 : vector<16x1xf32>
      %140 = arith.addf %97, %131 : vector<16x1xf32>
      %141 = arith.addf %140, %126 : vector<16x1xf32>
      %142 = arith.mulf %115, %131 : vector<16x1xf32>
      %143 = arith.mulf %126, %137 : vector<16x1xf32>
      %144 = arith.addf %142, %143 : vector<16x1xf32>
      %145 = arith.truncf %104 : vector<16x32xf32> to vector<16x32xbf16>
      %c0_98 = arith.constant 0 : index
      %c0_99 = arith.constant 0 : index
      %146 = vector.load %arg6[%c0_98, %c0_99] : memref<32x32xbf16, #tpu.memory_space<vmem>>, vector<32x32xbf16>
      %cst_100 = arith.constant dense<0.000000e+00> : vector<16x32xf32>
      %147 = tpu.matmul %145, %146, %cst_100 {dimension_numbers = #tpu.dot_dimension_numbers<[1], [0], [0], [1], [0, 0, 1, 1], [], []>} : vector<16x32xbf16>, vector<32x32xbf16>, vector<16x32xf32> -> vector<16x32xf32>
      %148 = vector.broadcast %20 : vector<1x32xf32> to vector<16x32xf32>
      %149 = arith.addf %147, %148 : vector<16x32xf32>
      %150 = arith.subf %149, %98 : vector<16x32xf32>
      %151 = vector.broadcast %144 : vector<16x1xf32> to vector<16x32xf32>
      %152 = arith.mulf %151, %150 : vector<16x32xf32>
      %153 = arith.addf %98, %152 : vector<16x32xf32>
      %c0_101 = arith.constant 0 : index
      %c0_102 = arith.constant 0 : index
      %154 = vector.load %arg11[%c0_101, %c0_102] : memref<16x32xf32, #tpu.memory_space<vmem>>, vector<16x32xf32>
      tpu.vector_store %arg11[%c0_101, %c0_102], %149 {strides = array<i32>} : memref<16x32xf32, #tpu.memory_space<vmem>>, vector<16x32xf32>,
      %c0_103 = arith.constant 0 : index
      %c0_104 = arith.constant 0 : index
      %155 = vector.load %arg12[%c0_103, %c0_104] : memref<16x32xf32, #tpu.memory_space<vmem>>, vector<16x32xf32>
      tpu.vector_store %arg12[%c0_103, %c0_104], %153 {strides = array<i32>} : memref<16x32xf32, #tpu.memory_space<vmem>>, vector<16x32xf32>,
      %c0_105 = arith.constant 0 : index
      %c0_106 = arith.constant 0 : index
      %156 = vector.load %arg13[%c0_105, %c0_106] : memref<16x1xf32, #tpu.memory_space<vmem>>, vector<16x1xf32>
      tpu.vector_store %arg13[%c0_105, %c0_106], %139 {strides = array<i32>} : memref<16x1xf32, #tpu.memory_space<vmem>>, vector<16x1xf32>,
      %c0_107 = arith.constant 0 : index
      %c0_108 = arith.constant 0 : index
      %157 = vector.load %arg14[%c0_107, %c0_108] : memref<16x1xf32, #tpu.memory_space<vmem>>, vector<16x1xf32>
      tpu.vector_store %arg14[%c0_107, %c0_108], %137 {strides = array<i32>} : memref<16x1xf32, #tpu.memory_space<vmem>>, vector<16x1xf32>,
      %c0_109 = arith.constant 0 : index
      %c0_110 = arith.constant 0 : index
      %158 = vector.load %arg15[%c0_109, %c0_110] : memref<16x1xf32, #tpu.memory_space<vmem>>, vector<16x1xf32>
      tpu.vector_store %arg15[%c0_109, %c0_110], %141 {strides = array<i32>} : memref<16x1xf32, #tpu.memory_space<vmem>>, vector<16x1xf32>,
    } else {
    }
    %c0_57 = arith.constant 0 : index
    %c0_58 = arith.constant 0 : index
    %72 = vector.load %arg13[%c0_57, %c0_58] : memref<16x1xf32, #tpu.memory_space<vmem>>, vector<16x1xf32>
    %cst_59 = arith.constant 0.899999976 : f32
    %73 = vector.broadcast %cst_59 : f32 to vector<16x1xf32>
    %74 = arith.cmpf olt, %72, %73 : vector<16x1xf32>
    %c0_60 = arith.constant 0 : index
    %c0_61 = arith.constant 0 : index
    %75 = vector.load %arg15[%c0_60, %c0_61] : memref<16x1xf32, #tpu.memory_space<vmem>>, vector<16x1xf32>
    %cst_62 = arith.constant 4.000000e+00 : f32
    %76 = vector.broadcast %cst_62 : f32 to vector<16x1xf32>
    %77 = arith.cmpf olt, %75, %76 : vector<16x1xf32>
    %78 = arith.andi %74, %77 : vector<16x1xi1>
    %cst_63 = arith.constant 1.000000e+00 : f32
    %cst_64 = arith.constant 0.000000e+00 : f32
    %79 = vector.broadcast %cst_63 : f32 to vector<16x1xf32>
    %80 = vector.broadcast %cst_64 : f32 to vector<16x1xf32>
    %81 = arith.select %78, %79, %80 : vector<16x1xi1>, vector<16x1xf32>
    %82 = vector.shape_cast %81 : vector<16x1xf32> to vector<1x16x1xf32>
    %cst_65 = arith.constant dense<0xFF800000> : vector<1xf32>
    %83 = vector.multi_reduction <maximumf>, %82, %cst_65 [1, 2] : vector<1x16x1xf32> to vector<1xf32>
    %84 = vector.shape_cast %83 : vector<1xf32> to vector<1x1x1xf32>
    %85 = vector.extract %84[0, 0, 0] : f32 from vector<1x1x1xf32>
    %cst_66 = arith.constant 0.000000e+00 : f32
    %86 = arith.cmpf ogt, %85, %cst_66 : f32
    %87 = arith.extui %86 : i1 to i32
    %cst_67 = arith.constant 0.899999976 : f32
    %c0_i32_68 = arith.constant 0 : i32
    %88 = arith.cmpi ne, %87, %c0_i32_68 : i32
    scf.if %88 {
      %c0_81 = arith.constant 0 : index
      %c0_82 = arith.constant 0 : index
      %95 = vector.load %arg13[%c0_81, %c0_82] : memref<16x1xf32, #tpu.memory_space<vmem>>, vector<16x1xf32>
      %c0_83 = arith.constant 0 : index
      %c0_84 = arith.constant 0 : index
      %96 = vector.load %arg14[%c0_83, %c0_84] : memref<16x1xf32, #tpu.memory_space<vmem>>, vector<16x1xf32>
      %c0_85 = arith.constant 0 : index
      %c0_86 = arith.constant 0 : index
      %97 = vector.load %arg15[%c0_85, %c0_86] : memref<16x1xf32, #tpu.memory_space<vmem>>, vector<16x1xf32>
      %c0_87 = arith.constant 0 : index
      %c0_88 = arith.constant 0 : index
      %98 = vector.load %arg12[%c0_87, %c0_88] : memref<16x32xf32, #tpu.memory_space<vmem>>, vector<16x32xf32>
      %c0_89 = arith.constant 0 : index
      %c0_90 = arith.constant 0 : index
      %99 = vector.load %arg11[%c0_89, %c0_90] : memref<16x32xf32, #tpu.memory_space<vmem>>, vector<16x32xf32>
      %c0_91 = arith.constant 0 : index
      %c0_92 = arith.constant 0 : index
      %100 = vector.load %arg2[%c0_91, %c0_92] : memref<16x32xf32, #tpu.memory_space<vmem>>, vector<16x32xf32>
      %101 = arith.addf %99, %100 : vector<16x32xf32>
      %c3 = arith.constant 3 : index
      %c0_93 = arith.constant 0 : index
      %102 = vector.load %arg3[%c3, %c0_93] : memref<4x32xf32, #tpu.memory_space<vmem>>, vector<1x32xf32>
      %103 = vector.broadcast %102 : vector<1x32xf32> to vector<16x32xf32>
      %104 = arith.addf %101, %103 : vector<16x32xf32>
      %105 = vector.broadcast %18 : vector<1x32xf32> to vector<16x32xf32>
      %106 = arith.mulf %104, %105 : vector<16x32xf32>
      %cst_94 = arith.constant dense<0.000000e+00> : vector<16xf32>
      %107 = vector.multi_reduction <add>, %106, %cst_94 [1] : vector<16x32xf32> to vector<16xf32>
      %108 = vector.shape_cast %107 : vector<16xf32> to vector<16x1xf32>
      %109 = vector.broadcast %19 : f32 to vector<16x1xf32>
      %110 = arith.addf %108, %109 : vector<16x1xf32>
      %111 = arith.negf %110 : vector<16x1xf32>
      %112 = math.exp %111 : vector<16x1xf32>
      %cst_95 = arith.constant 1.000000e+00 : f32
      %113 = vector.broadcast %cst_95 : f32 to vector<16x1xf32>
      %114 = arith.addf %113, %112 : vector<16x1xf32>
      %115 = arith.divf %113, %114 : vector<16x1xf32>
      %cst_96 = arith.constant 1.000000e+00 : f32
      %116 = vector.broadcast %cst_96 : f32 to vector<16x1xf32>
      %117 = arith.cmpf olt, %95, %116 : vector<16x1xf32>
      %118 = arith.extui %117 : vector<16x1xi1> to vector<16x1xi32>
      %119 = arith.sitofp %118 : vector<16x1xi32> to vector<16x1xf32>
      %120 = arith.mulf %115, %119 : vector<16x1xf32>
      %121 = arith.addf %95, %120 : vector<16x1xf32>
      %122 = vector.broadcast %cst_67 : f32 to vector<16x1xf32>
      %123 = arith.cmpf ogt, %121, %122 : vector<16x1xf32>
      %124 = arith.extui %123 : vector<16x1xi1> to vector<16x1xi32>
      %125 = arith.sitofp %124 : vector<16x1xi32> to vector<16x1xf32>
      %126 = arith.mulf %125, %119 : vector<16x1xf32>
      %127 = vector.broadcast %cst_67 : f32 to vector<16x1xf32>
      %128 = arith.cmpf ole, %121, %127 : vector<16x1xf32>
      %129 = arith.extui %128 : vector<16x1xi1> to vector<16x1xi32>
      %130 = arith.sitofp %129 : vector<16x1xi32> to vector<16x1xf32>
      %131 = arith.mulf %130, %119 : vector<16x1xf32>
      %132 = arith.mulf %115, %131 : vector<16x1xf32>
      %133 = arith.addf %95, %132 : vector<16x1xf32>
      %cst_97 = arith.constant 1.000000e+00 : f32
      %134 = vector.broadcast %cst_97 : f32 to vector<16x1xf32>
      %135 = arith.subf %134, %133 : vector<16x1xf32>
      %136 = arith.mulf %126, %135 : vector<16x1xf32>
      %137 = arith.addf %96, %136 : vector<16x1xf32>
      %138 = arith.mulf %126, %137 : vector<16x1xf32>
      %139 = arith.addf %133, %138 : vector<16x1xf32>
      %140 = arith.addf %97, %131 : vector<16x1xf32>
      %141 = arith.addf %140, %126 : vector<16x1xf32>
      %142 = arith.mulf %115, %131 : vector<16x1xf32>
      %143 = arith.mulf %126, %137 : vector<16x1xf32>
      %144 = arith.addf %142, %143 : vector<16x1xf32>
      %145 = arith.truncf %104 : vector<16x32xf32> to vector<16x32xbf16>
      %c0_98 = arith.constant 0 : index
      %c0_99 = arith.constant 0 : index
      %146 = vector.load %arg6[%c0_98, %c0_99] : memref<32x32xbf16, #tpu.memory_space<vmem>>, vector<32x32xbf16>
      %cst_100 = arith.constant dense<0.000000e+00> : vector<16x32xf32>
      %147 = tpu.matmul %145, %146, %cst_100 {dimension_numbers = #tpu.dot_dimension_numbers<[1], [0], [0], [1], [0, 0, 1, 1], [], []>} : vector<16x32xbf16>, vector<32x32xbf16>, vector<16x32xf32> -> vector<16x32xf32>
      %148 = vector.broadcast %20 : vector<1x32xf32> to vector<16x32xf32>
      %149 = arith.addf %147, %148 : vector<16x32xf32>
      %150 = arith.subf %149, %98 : vector<16x32xf32>
      %151 = vector.broadcast %144 : vector<16x1xf32> to vector<16x32xf32>
      %152 = arith.mulf %151, %150 : vector<16x32xf32>
      %153 = arith.addf %98, %152 : vector<16x32xf32>
      %c0_101 = arith.constant 0 : index
      %c0_102 = arith.constant 0 : index
      %154 = vector.load %arg11[%c0_101, %c0_102] : memref<16x32xf32, #tpu.memory_space<vmem>>, vector<16x32xf32>
      tpu.vector_store %arg11[%c0_101, %c0_102], %149 {strides = array<i32>} : memref<16x32xf32, #tpu.memory_space<vmem>>, vector<16x32xf32>,
      %c0_103 = arith.constant 0 : index
      %c0_104 = arith.constant 0 : index
      %155 = vector.load %arg12[%c0_103, %c0_104] : memref<16x32xf32, #tpu.memory_space<vmem>>, vector<16x32xf32>
      tpu.vector_store %arg12[%c0_103, %c0_104], %153 {strides = array<i32>} : memref<16x32xf32, #tpu.memory_space<vmem>>, vector<16x32xf32>,
      %c0_105 = arith.constant 0 : index
      %c0_106 = arith.constant 0 : index
      %156 = vector.load %arg13[%c0_105, %c0_106] : memref<16x1xf32, #tpu.memory_space<vmem>>, vector<16x1xf32>
      tpu.vector_store %arg13[%c0_105, %c0_106], %139 {strides = array<i32>} : memref<16x1xf32, #tpu.memory_space<vmem>>, vector<16x1xf32>,
      %c0_107 = arith.constant 0 : index
      %c0_108 = arith.constant 0 : index
      %157 = vector.load %arg14[%c0_107, %c0_108] : memref<16x1xf32, #tpu.memory_space<vmem>>, vector<16x1xf32>
      tpu.vector_store %arg14[%c0_107, %c0_108], %137 {strides = array<i32>} : memref<16x1xf32, #tpu.memory_space<vmem>>, vector<16x1xf32>,
      %c0_109 = arith.constant 0 : index
      %c0_110 = arith.constant 0 : index
      %158 = vector.load %arg15[%c0_109, %c0_110] : memref<16x1xf32, #tpu.memory_space<vmem>>, vector<16x1xf32>
      tpu.vector_store %arg15[%c0_109, %c0_110], %141 {strides = array<i32>} : memref<16x1xf32, #tpu.memory_space<vmem>>, vector<16x1xf32>,
    } else {
    }
    %c0_69 = arith.constant 0 : index
    %c0_70 = arith.constant 0 : index
    %89 = vector.load %arg12[%c0_69, %c0_70] : memref<16x32xf32, #tpu.memory_space<vmem>>, vector<16x32xf32>
    %c0_71 = arith.constant 0 : index
    %c0_72 = arith.constant 0 : index
    %90 = vector.load %arg8[%c0_71, %c0_72] : memref<16x32xf32, #tpu.memory_space<vmem>>, vector<16x32xf32>
    tpu.vector_store %arg8[%c0_71, %c0_72], %89 {strides = array<i32>} : memref<16x32xf32, #tpu.memory_space<vmem>>, vector<16x32xf32>,
    %c0_73 = arith.constant 0 : index
    %c0_74 = arith.constant 0 : index
    %91 = vector.load %arg14[%c0_73, %c0_74] : memref<16x1xf32, #tpu.memory_space<vmem>>, vector<16x1xf32>
    %c0_75 = arith.constant 0 : index
    %c0_76 = arith.constant 0 : index
    %92 = vector.load %arg9[%c0_75, %c0_76] : memref<16x1xf32, #tpu.memory_space<vmem>>, vector<16x1xf32>
    tpu.vector_store %arg9[%c0_75, %c0_76], %91 {strides = array<i32>} : memref<16x1xf32, #tpu.memory_space<vmem>>, vector<16x1xf32>,
    %c0_77 = arith.constant 0 : index
    %c0_78 = arith.constant 0 : index
    %93 = vector.load %arg15[%c0_77, %c0_78] : memref<16x1xf32, #tpu.memory_space<vmem>>, vector<16x1xf32>
    %c0_79 = arith.constant 0 : index
    %c0_80 = arith.constant 0 : index
    %94 = vector.load %arg10[%c0_79, %c0_80] : memref<16x1xf32, #tpu.memory_space<vmem>>, vector<16x1xf32>
    tpu.vector_store %arg10[%c0_79, %c0_80], %93 {strides = array<i32>} : memref<16x1xf32, #tpu.memory_space<vmem>>, vector<16x1xf32>,
    return
  }
  func.func @transform_0(%arg0: i32) -> (i32, i32) {
    %c0_i32 = arith.constant 0 : i32
    %c0_i32_0 = arith.constant 0 : i32
    return %arg0, %c0_i32 : i32, i32
  }
  func.func @transform_1(%arg0: i32) -> (i32, i32) {
    %c0_i32 = arith.constant 0 : i32
    %c0_i32_0 = arith.constant 0 : i32
    return %arg0, %c0_i32 : i32, i32
  }
  func.func @transform_2(%arg0: i32) -> (i32, i32) {
    %c0_i32 = arith.constant 0 : i32
    %c0_i32_0 = arith.constant 0 : i32
    %c0_i32_1 = arith.constant 0 : i32
    return %c0_i32, %c0_i32_0 : i32, i32
  }
  func.func @transform_3(%arg0: i32) -> (i32, i32) {
    %c0_i32 = arith.constant 0 : i32
    %c0_i32_0 = arith.constant 0 : i32
    %c0_i32_1 = arith.constant 0 : i32
    return %c0_i32, %c0_i32_0 : i32, i32
  }
  func.func @transform_4(%arg0: i32) -> (i32, i32) {
    %c0_i32 = arith.constant 0 : i32
    %c0_i32_0 = arith.constant 0 : i32
    %c0_i32_1 = arith.constant 0 : i32
    return %c0_i32, %c0_i32_0 : i32, i32
  }
  func.func @transform_5(%arg0: i32) -> (i32, i32) {
    %c0_i32 = arith.constant 0 : i32
    %c0_i32_0 = arith.constant 0 : i32
    %c0_i32_1 = arith.constant 0 : i32
    return %c0_i32, %c0_i32_0 : i32, i32
  }
  func.func @transform_6(%arg0: i32) -> (i32, i32) {
    %c0_i32 = arith.constant 0 : i32
    %c0_i32_0 = arith.constant 0 : i32
    %c0_i32_1 = arith.constant 0 : i32
    return %c0_i32, %c0_i32_0 : i32, i32
  }
  func.func @transform_7(%arg0: i32) -> (i32, i32) {
    %c0_i32 = arith.constant 0 : i32
    %c0_i32_0 = arith.constant 0 : i32
    return %arg0, %c0_i32 : i32, i32
  }
  func.func @transform_8(%arg0: i32) -> (i32, i32) {
    %c0_i32 = arith.constant 0 : i32
    %c0_i32_0 = arith.constant 0 : i32
    return %arg0, %c0_i32 : i32, i32
  }
  func.func @transform_9(%arg0: i32) -> (i32, i32) {
    %c0_i32 = arith.constant 0 : i32
    %c0_i32_0 = arith.constant 0 : i32
    return %arg0, %c0_i32 : i32, i32
  }
}

module attributes {stable_mosaic.version = 11 : i64} {
  func.func @_act_kernel(%arg0: i32, %arg1: memref<16x32xf32, #tpu.memory_space<vmem>>, %arg2: memref<16x32xf32, #tpu.memory_space<vmem>>, %arg3: memref<4x32xf32, #tpu.memory_space<vmem>>, %arg4: memref<1x32xf32, #tpu.memory_space<vmem>>, %arg5: memref<1x1xf32, #tpu.memory_space<smem>>, %arg6: memref<32x32xbf16, #tpu.memory_space<vmem>>, %arg7: memref<1x32xf32, #tpu.memory_space<vmem>>, %arg8: memref<16x32xf32, #tpu.memory_space<vmem>>, %arg9: memref<16x1xf32, #tpu.memory_space<vmem>>, %arg10: memref<16x1xf32, #tpu.memory_space<vmem>>, %arg11: memref<16x32xf32, #tpu.memory_space<vmem>>, %arg12: memref<16x32xf32, #tpu.memory_space<vmem>>, %arg13: memref<16x1xf32, #tpu.memory_space<vmem>>, %arg14: memref<16x1xf32, #tpu.memory_space<vmem>>, %arg15: memref<16x1xf32, #tpu.memory_space<vmem>>) attributes {dimension_semantics = [#tpu.dimension_semantics<parallel>], iteration_bounds = array<i64: 1>, scalar_prefetch = 0 : i64, scratch_operands = 5 : i64, tpu.core_type = #tpu.core_type<tc>, window_params = [{transform_indices = @transform_0, window_bounds = array<i64: 16, 32>}, {transform_indices = @transform_1, window_bounds = array<i64: 16, 32>}, {pipeline_mode = #tpu.pipeline_mode<synchronous>, transform_indices = @transform_2, window_bounds = array<i64: 4, 32>}, {pipeline_mode = #tpu.pipeline_mode<synchronous>, transform_indices = @transform_3, window_bounds = array<i64: 1, 32>}, {transform_indices = @transform_4, window_bounds = array<i64: 1, 1>}, {pipeline_mode = #tpu.pipeline_mode<synchronous>, transform_indices = @transform_5, window_bounds = array<i64: 32, 32>}, {pipeline_mode = #tpu.pipeline_mode<synchronous>, transform_indices = @transform_6, window_bounds = array<i64: 1, 32>}, {transform_indices = @transform_7, window_bounds = array<i64: 16, 32>}, {transform_indices = @transform_8, window_bounds = array<i64: 16, 1>}, {transform_indices = @transform_9, window_bounds = array<i64: 16, 1>}]} {
    %0 = tpu.iota {dimensions = array<i32: 0>} : vector<16x1xi32>
    %c16_i32 = arith.constant 16 : i32
    %1 = arith.muli %arg0, %c16_i32 : i32
    %2 = vector.broadcast %1 : i32 to vector<16x1xi32>
    %3 = arith.addi %0, %2 : vector<16x1xi32>
    %c16_i32_0 = arith.constant 16 : i32
    %4 = vector.broadcast %c16_i32_0 : i32 to vector<16x1xi32>
    %5 = arith.cmpi slt, %3, %4 : vector<16x1xi32>
    %cst = arith.constant 0.000000e+00 : f32
    %cst_1 = arith.constant 2.000000e+00 : f32
    %6 = vector.broadcast %cst : f32 to vector<16x1xf32>
    %7 = vector.broadcast %cst_1 : f32 to vector<16x1xf32>
    %8 = arith.select %5, %6, %7 : vector<16x1xi1>, vector<16x1xf32>
    %c0 = arith.constant 0 : index
    %c0_2 = arith.constant 0 : index
    %9 = vector.load %arg13[%c0, %c0_2] : memref<16x1xf32, #tpu.memory_space<vmem>>, vector<16x1xf32>
    tpu.vector_store %arg13[%c0, %c0_2], %8 {strides = array<i32>} : memref<16x1xf32, #tpu.memory_space<vmem>>, vector<16x1xf32>,
    %cst_3 = arith.constant 0.000000e+00 : f32
    %10 = vector.broadcast %cst_3 : f32 to vector<16x1xf32>
    %c0_4 = arith.constant 0 : index
    %c0_5 = arith.constant 0 : index
    %11 = vector.load %arg14[%c0_4, %c0_5] : memref<16x1xf32, #tpu.memory_space<vmem>>, vector<16x1xf32>
    tpu.vector_store %arg14[%c0_4, %c0_5], %10 {strides = array<i32>} : memref<16x1xf32, #tpu.memory_space<vmem>>, vector<16x1xf32>,
    %cst_6 = arith.constant 0.000000e+00 : f32
    %12 = vector.broadcast %cst_6 : f32 to vector<16x1xf32>
    %c0_7 = arith.constant 0 : index
    %c0_8 = arith.constant 0 : index
    %13 = vector.load %arg15[%c0_7, %c0_8] : memref<16x1xf32, #tpu.memory_space<vmem>>, vector<16x1xf32>
    tpu.vector_store %arg15[%c0_7, %c0_8], %12 {strides = array<i32>} : memref<16x1xf32, #tpu.memory_space<vmem>>, vector<16x1xf32>,
    %cst_9 = arith.constant 0.000000e+00 : f32
    %14 = vector.broadcast %cst_9 : f32 to vector<16x32xf32>
    %c0_10 = arith.constant 0 : index
    %c0_11 = arith.constant 0 : index
    %15 = vector.load %arg12[%c0_10, %c0_11] : memref<16x32xf32, #tpu.memory_space<vmem>>, vector<16x32xf32>
    tpu.vector_store %arg12[%c0_10, %c0_11], %14 {strides = array<i32>} : memref<16x32xf32, #tpu.memory_space<vmem>>, vector<16x32xf32>,
    %c0_12 = arith.constant 0 : index
    %c0_13 = arith.constant 0 : index
    %16 = vector.load %arg1[%c0_12, %c0_13] : memref<16x32xf32, #tpu.memory_space<vmem>>, vector<16x32xf32>
    %c0_14 = arith.constant 0 : index
    %c0_15 = arith.constant 0 : index
    %17 = vector.load %arg11[%c0_14, %c0_15] : memref<16x32xf32, #tpu.memory_space<vmem>>, vector<16x32xf32>
    tpu.vector_store %arg11[%c0_14, %c0_15], %16 {strides = array<i32>} : memref<16x32xf32, #tpu.memory_space<vmem>>, vector<16x32xf32>,
    %c0_16 = arith.constant 0 : index
    %c0_17 = arith.constant 0 : index
    %18 = vector.load %arg4[%c0_16, %c0_17] : memref<1x32xf32, #tpu.memory_space<vmem>>, vector<1x32xf32>
    %c0_18 = arith.constant 0 : index
    %c0_19 = arith.constant 0 : index
    %19 = memref.load %arg5[%c0_18, %c0_19] : memref<1x1xf32, #tpu.memory_space<smem>>
    %c0_20 = arith.constant 0 : index
    %c0_21 = arith.constant 0 : index
    %20 = vector.load %arg7[%c0_20, %c0_21] : memref<1x32xf32, #tpu.memory_space<vmem>>, vector<1x32xf32>
    %c0_22 = arith.constant 0 : index
    %c0_23 = arith.constant 0 : index
    %21 = vector.load %arg13[%c0_22, %c0_23] : memref<16x1xf32, #tpu.memory_space<vmem>>, vector<16x1xf32>
    %cst_24 = arith.constant 0.899999976 : f32
    %22 = vector.broadcast %cst_24 : f32 to vector<16x1xf32>
    %23 = arith.cmpf olt, %21, %22 : vector<16x1xf32>
    %c0_25 = arith.constant 0 : index
    %c0_26 = arith.constant 0 : index
    %24 = vector.load %arg15[%c0_25, %c0_26] : memref<16x1xf32, #tpu.memory_space<vmem>>, vector<16x1xf32>
    %cst_27 = arith.constant 4.000000e+00 : f32
    %25 = vector.broadcast %cst_27 : f32 to vector<16x1xf32>
    %26 = arith.cmpf olt, %24, %25 : vector<16x1xf32>
    %27 = arith.andi %23, %26 : vector<16x1xi1>
    %cst_28 = arith.constant 1.000000e+00 : f32
    %cst_29 = arith.constant 0.000000e+00 : f32
    %28 = vector.broadcast %cst_28 : f32 to vector<16x1xf32>
    %29 = vector.broadcast %cst_29 : f32 to vector<16x1xf32>
    %30 = arith.select %27, %28, %29 : vector<16x1xi1>, vector<16x1xf32>
    %31 = vector.shape_cast %30 : vector<16x1xf32> to vector<1x16x1xf32>
    %cst_30 = arith.constant dense<0xFF800000> : vector<1xf32>
    %32 = vector.multi_reduction <maximumf>, %31, %cst_30 [1, 2] : vector<1x16x1xf32> to vector<1xf32>
    %33 = vector.shape_cast %32 : vector<1xf32> to vector<1x1x1xf32>
    %34 = vector.extract %33[0, 0, 0] : f32 from vector<1x1x1xf32>
    %cst_31 = arith.constant 0.000000e+00 : f32
    %35 = arith.cmpf ogt, %34, %cst_31 : f32
    %c0_32 = arith.constant 0 : index
    %c0_33 = arith.constant 0 : index
    %36 = vector.load %arg13[%c0_32, %c0_33] : memref<16x1xf32, #tpu.memory_space<vmem>>, vector<16x1xf32>
    %c0_34 = arith.constant 0 : index
    %c0_35 = arith.constant 0 : index
    %37 = vector.load %arg14[%c0_34, %c0_35] : memref<16x1xf32, #tpu.memory_space<vmem>>, vector<16x1xf32>
    %c0_36 = arith.constant 0 : index
    %c0_37 = arith.constant 0 : index
    %38 = vector.load %arg15[%c0_36, %c0_37] : memref<16x1xf32, #tpu.memory_space<vmem>>, vector<16x1xf32>
    %c0_38 = arith.constant 0 : index
    %c0_39 = arith.constant 0 : index
    %39 = vector.load %arg12[%c0_38, %c0_39] : memref<16x32xf32, #tpu.memory_space<vmem>>, vector<16x32xf32>
    %c0_40 = arith.constant 0 : index
    %c0_41 = arith.constant 0 : index
    %40 = vector.load %arg11[%c0_40, %c0_41] : memref<16x32xf32, #tpu.memory_space<vmem>>, vector<16x32xf32>
    %c0_42 = arith.constant 0 : index
    %c0_43 = arith.constant 0 : index
    %41 = vector.load %arg2[%c0_42, %c0_43] : memref<16x32xf32, #tpu.memory_space<vmem>>, vector<16x32xf32>
    %42 = arith.addf %40, %41 : vector<16x32xf32>
    %c0_44 = arith.constant 0 : index
    %c0_45 = arith.constant 0 : index
    %43 = vector.load %arg3[%c0_44, %c0_45] : memref<4x32xf32, #tpu.memory_space<vmem>>, vector<1x32xf32>
    %44 = vector.broadcast %43 : vector<1x32xf32> to vector<16x32xf32>
    %45 = arith.addf %42, %44 : vector<16x32xf32>
    %46 = vector.broadcast %18 : vector<1x32xf32> to vector<16x32xf32>
    %47 = arith.mulf %45, %46 : vector<16x32xf32>
    %cst_46 = arith.constant dense<0.000000e+00> : vector<16xf32>
    %48 = vector.multi_reduction <add>, %47, %cst_46 [1] : vector<16x32xf32> to vector<16xf32>
    %49 = vector.shape_cast %48 : vector<16xf32> to vector<16x1xf32>
    %50 = vector.broadcast %19 : f32 to vector<16x1xf32>
    %51 = arith.addf %49, %50 : vector<16x1xf32>
    %52 = arith.negf %51 : vector<16x1xf32>
    %53 = math.exp %52 : vector<16x1xf32>
    %cst_47 = arith.constant 1.000000e+00 : f32
    %54 = vector.broadcast %cst_47 : f32 to vector<16x1xf32>
    %55 = arith.addf %54, %53 : vector<16x1xf32>
    %56 = arith.divf %54, %55 : vector<16x1xf32>
    %cst_48 = arith.constant 1.000000e+00 : f32
    %57 = vector.broadcast %cst_48 : f32 to vector<16x1xf32>
    %58 = arith.cmpf olt, %36, %57 : vector<16x1xf32>
    %59 = arith.extui %58 : vector<16x1xi1> to vector<16x1xi32>
    %60 = arith.sitofp %59 : vector<16x1xi32> to vector<16x1xf32>
    %61 = arith.mulf %56, %60 : vector<16x1xf32>
    %62 = arith.addf %36, %61 : vector<16x1xf32>
    %cst_49 = arith.constant 0.899999976 : f32
    %63 = vector.broadcast %cst_49 : f32 to vector<16x1xf32>
    %64 = arith.cmpf ogt, %62, %63 : vector<16x1xf32>
    %65 = arith.extui %64 : vector<16x1xi1> to vector<16x1xi32>
    %66 = arith.sitofp %65 : vector<16x1xi32> to vector<16x1xf32>
    %67 = arith.mulf %66, %60 : vector<16x1xf32>
    %cst_50 = arith.constant 0.899999976 : f32
    %68 = vector.broadcast %cst_50 : f32 to vector<16x1xf32>
    %69 = arith.cmpf ole, %62, %68 : vector<16x1xf32>
    %70 = arith.extui %69 : vector<16x1xi1> to vector<16x1xi32>
    %71 = arith.sitofp %70 : vector<16x1xi32> to vector<16x1xf32>
    %72 = arith.mulf %71, %60 : vector<16x1xf32>
    %73 = arith.mulf %56, %72 : vector<16x1xf32>
    %74 = arith.addf %36, %73 : vector<16x1xf32>
    %cst_51 = arith.constant 1.000000e+00 : f32
    %75 = vector.broadcast %cst_51 : f32 to vector<16x1xf32>
    %76 = arith.subf %75, %74 : vector<16x1xf32>
    %77 = arith.mulf %67, %76 : vector<16x1xf32>
    %78 = arith.addf %37, %77 : vector<16x1xf32>
    %79 = arith.mulf %67, %78 : vector<16x1xf32>
    %80 = arith.addf %74, %79 : vector<16x1xf32>
    %81 = arith.addf %38, %72 : vector<16x1xf32>
    %82 = arith.addf %81, %67 : vector<16x1xf32>
    %83 = arith.mulf %56, %72 : vector<16x1xf32>
    %84 = arith.mulf %67, %78 : vector<16x1xf32>
    %85 = arith.addf %83, %84 : vector<16x1xf32>
    %86 = arith.truncf %45 : vector<16x32xf32> to vector<16x32xbf16>
    %c0_52 = arith.constant 0 : index
    %c0_53 = arith.constant 0 : index
    %87 = vector.load %arg6[%c0_52, %c0_53] : memref<32x32xbf16, #tpu.memory_space<vmem>>, vector<32x32xbf16>
    %cst_54 = arith.constant dense<0.000000e+00> : vector<16x32xf32>
    %88 = tpu.matmul %86, %87, %cst_54 {dimension_numbers = #tpu.dot_dimension_numbers<[1], [0], [0], [1], [0, 0, 1, 1], [], []>} : vector<16x32xbf16>, vector<32x32xbf16>, vector<16x32xf32> -> vector<16x32xf32>
    %89 = vector.broadcast %20 : vector<1x32xf32> to vector<16x32xf32>
    %90 = arith.addf %88, %89 : vector<16x32xf32>
    %91 = arith.subf %90, %39 : vector<16x32xf32>
    %92 = vector.broadcast %85 : vector<16x1xf32> to vector<16x32xf32>
    %93 = arith.mulf %92, %91 : vector<16x32xf32>
    %94 = arith.addf %39, %93 : vector<16x32xf32>
    %c0_55 = arith.constant 0 : index
    %c0_56 = arith.constant 0 : index
    %95 = vector.load %arg11[%c0_55, %c0_56] : memref<16x32xf32, #tpu.memory_space<vmem>>, vector<16x32xf32>
    %96 = arith.select %35, %90, %95 : vector<16x32xf32>
    %c0_57 = arith.constant 0 : index
    %c0_58 = arith.constant 0 : index
    %97 = vector.load %arg11[%c0_57, %c0_58] : memref<16x32xf32, #tpu.memory_space<vmem>>, vector<16x32xf32>
    tpu.vector_store %arg11[%c0_57, %c0_58], %96 {strides = array<i32>} : memref<16x32xf32, #tpu.memory_space<vmem>>, vector<16x32xf32>,
    %c0_59 = arith.constant 0 : index
    %c0_60 = arith.constant 0 : index
    %98 = vector.load %arg12[%c0_59, %c0_60] : memref<16x32xf32, #tpu.memory_space<vmem>>, vector<16x32xf32>
    %99 = arith.select %35, %94, %98 : vector<16x32xf32>
    %c0_61 = arith.constant 0 : index
    %c0_62 = arith.constant 0 : index
    %100 = vector.load %arg12[%c0_61, %c0_62] : memref<16x32xf32, #tpu.memory_space<vmem>>, vector<16x32xf32>
    tpu.vector_store %arg12[%c0_61, %c0_62], %99 {strides = array<i32>} : memref<16x32xf32, #tpu.memory_space<vmem>>, vector<16x32xf32>,
    %c0_63 = arith.constant 0 : index
    %c0_64 = arith.constant 0 : index
    %101 = vector.load %arg13[%c0_63, %c0_64] : memref<16x1xf32, #tpu.memory_space<vmem>>, vector<16x1xf32>
    %102 = arith.select %35, %80, %101 : vector<16x1xf32>
    %c0_65 = arith.constant 0 : index
    %c0_66 = arith.constant 0 : index
    %103 = vector.load %arg13[%c0_65, %c0_66] : memref<16x1xf32, #tpu.memory_space<vmem>>, vector<16x1xf32>
    tpu.vector_store %arg13[%c0_65, %c0_66], %102 {strides = array<i32>} : memref<16x1xf32, #tpu.memory_space<vmem>>, vector<16x1xf32>,
    %c0_67 = arith.constant 0 : index
    %c0_68 = arith.constant 0 : index
    %104 = vector.load %arg14[%c0_67, %c0_68] : memref<16x1xf32, #tpu.memory_space<vmem>>, vector<16x1xf32>
    %105 = arith.select %35, %78, %104 : vector<16x1xf32>
    %c0_69 = arith.constant 0 : index
    %c0_70 = arith.constant 0 : index
    %106 = vector.load %arg14[%c0_69, %c0_70] : memref<16x1xf32, #tpu.memory_space<vmem>>, vector<16x1xf32>
    tpu.vector_store %arg14[%c0_69, %c0_70], %105 {strides = array<i32>} : memref<16x1xf32, #tpu.memory_space<vmem>>, vector<16x1xf32>,
    %c0_71 = arith.constant 0 : index
    %c0_72 = arith.constant 0 : index
    %107 = vector.load %arg15[%c0_71, %c0_72] : memref<16x1xf32, #tpu.memory_space<vmem>>, vector<16x1xf32>
    %108 = arith.select %35, %82, %107 : vector<16x1xf32>
    %c0_73 = arith.constant 0 : index
    %c0_74 = arith.constant 0 : index
    %109 = vector.load %arg15[%c0_73, %c0_74] : memref<16x1xf32, #tpu.memory_space<vmem>>, vector<16x1xf32>
    tpu.vector_store %arg15[%c0_73, %c0_74], %108 {strides = array<i32>} : memref<16x1xf32, #tpu.memory_space<vmem>>, vector<16x1xf32>,
    %c0_75 = arith.constant 0 : index
    %c0_76 = arith.constant 0 : index
    %110 = vector.load %arg13[%c0_75, %c0_76] : memref<16x1xf32, #tpu.memory_space<vmem>>, vector<16x1xf32>
    %cst_77 = arith.constant 0.899999976 : f32
    %111 = vector.broadcast %cst_77 : f32 to vector<16x1xf32>
    %112 = arith.cmpf olt, %110, %111 : vector<16x1xf32>
    %c0_78 = arith.constant 0 : index
    %c0_79 = arith.constant 0 : index
    %113 = vector.load %arg15[%c0_78, %c0_79] : memref<16x1xf32, #tpu.memory_space<vmem>>, vector<16x1xf32>
    %cst_80 = arith.constant 4.000000e+00 : f32
    %114 = vector.broadcast %cst_80 : f32 to vector<16x1xf32>
    %115 = arith.cmpf olt, %113, %114 : vector<16x1xf32>
    %116 = arith.andi %112, %115 : vector<16x1xi1>
    %cst_81 = arith.constant 1.000000e+00 : f32
    %cst_82 = arith.constant 0.000000e+00 : f32
    %117 = vector.broadcast %cst_81 : f32 to vector<16x1xf32>
    %118 = vector.broadcast %cst_82 : f32 to vector<16x1xf32>
    %119 = arith.select %116, %117, %118 : vector<16x1xi1>, vector<16x1xf32>
    %120 = vector.shape_cast %119 : vector<16x1xf32> to vector<1x16x1xf32>
    %cst_83 = arith.constant dense<0xFF800000> : vector<1xf32>
    %121 = vector.multi_reduction <maximumf>, %120, %cst_83 [1, 2] : vector<1x16x1xf32> to vector<1xf32>
    %122 = vector.shape_cast %121 : vector<1xf32> to vector<1x1x1xf32>
    %123 = vector.extract %122[0, 0, 0] : f32 from vector<1x1x1xf32>
    %cst_84 = arith.constant 0.000000e+00 : f32
    %124 = arith.cmpf ogt, %123, %cst_84 : f32
    %c0_85 = arith.constant 0 : index
    %c0_86 = arith.constant 0 : index
    %125 = vector.load %arg13[%c0_85, %c0_86] : memref<16x1xf32, #tpu.memory_space<vmem>>, vector<16x1xf32>
    %c0_87 = arith.constant 0 : index
    %c0_88 = arith.constant 0 : index
    %126 = vector.load %arg14[%c0_87, %c0_88] : memref<16x1xf32, #tpu.memory_space<vmem>>, vector<16x1xf32>
    %c0_89 = arith.constant 0 : index
    %c0_90 = arith.constant 0 : index
    %127 = vector.load %arg15[%c0_89, %c0_90] : memref<16x1xf32, #tpu.memory_space<vmem>>, vector<16x1xf32>
    %c0_91 = arith.constant 0 : index
    %c0_92 = arith.constant 0 : index
    %128 = vector.load %arg12[%c0_91, %c0_92] : memref<16x32xf32, #tpu.memory_space<vmem>>, vector<16x32xf32>
    %c0_93 = arith.constant 0 : index
    %c0_94 = arith.constant 0 : index
    %129 = vector.load %arg11[%c0_93, %c0_94] : memref<16x32xf32, #tpu.memory_space<vmem>>, vector<16x32xf32>
    %c0_95 = arith.constant 0 : index
    %c0_96 = arith.constant 0 : index
    %130 = vector.load %arg2[%c0_95, %c0_96] : memref<16x32xf32, #tpu.memory_space<vmem>>, vector<16x32xf32>
    %131 = arith.addf %129, %130 : vector<16x32xf32>
    %c1 = arith.constant 1 : index
    %c0_97 = arith.constant 0 : index
    %132 = vector.load %arg3[%c1, %c0_97] : memref<4x32xf32, #tpu.memory_space<vmem>>, vector<1x32xf32>
    %133 = vector.broadcast %132 : vector<1x32xf32> to vector<16x32xf32>
    %134 = arith.addf %131, %133 : vector<16x32xf32>
    %135 = vector.broadcast %18 : vector<1x32xf32> to vector<16x32xf32>
    %136 = arith.mulf %134, %135 : vector<16x32xf32>
    %cst_98 = arith.constant dense<0.000000e+00> : vector<16xf32>
    %137 = vector.multi_reduction <add>, %136, %cst_98 [1] : vector<16x32xf32> to vector<16xf32>
    %138 = vector.shape_cast %137 : vector<16xf32> to vector<16x1xf32>
    %139 = vector.broadcast %19 : f32 to vector<16x1xf32>
    %140 = arith.addf %138, %139 : vector<16x1xf32>
    %141 = arith.negf %140 : vector<16x1xf32>
    %142 = math.exp %141 : vector<16x1xf32>
    %cst_99 = arith.constant 1.000000e+00 : f32
    %143 = vector.broadcast %cst_99 : f32 to vector<16x1xf32>
    %144 = arith.addf %143, %142 : vector<16x1xf32>
    %145 = arith.divf %143, %144 : vector<16x1xf32>
    %cst_100 = arith.constant 1.000000e+00 : f32
    %146 = vector.broadcast %cst_100 : f32 to vector<16x1xf32>
    %147 = arith.cmpf olt, %125, %146 : vector<16x1xf32>
    %148 = arith.extui %147 : vector<16x1xi1> to vector<16x1xi32>
    %149 = arith.sitofp %148 : vector<16x1xi32> to vector<16x1xf32>
    %150 = arith.mulf %145, %149 : vector<16x1xf32>
    %151 = arith.addf %125, %150 : vector<16x1xf32>
    %cst_101 = arith.constant 0.899999976 : f32
    %152 = vector.broadcast %cst_101 : f32 to vector<16x1xf32>
    %153 = arith.cmpf ogt, %151, %152 : vector<16x1xf32>
    %154 = arith.extui %153 : vector<16x1xi1> to vector<16x1xi32>
    %155 = arith.sitofp %154 : vector<16x1xi32> to vector<16x1xf32>
    %156 = arith.mulf %155, %149 : vector<16x1xf32>
    %cst_102 = arith.constant 0.899999976 : f32
    %157 = vector.broadcast %cst_102 : f32 to vector<16x1xf32>
    %158 = arith.cmpf ole, %151, %157 : vector<16x1xf32>
    %159 = arith.extui %158 : vector<16x1xi1> to vector<16x1xi32>
    %160 = arith.sitofp %159 : vector<16x1xi32> to vector<16x1xf32>
    %161 = arith.mulf %160, %149 : vector<16x1xf32>
    %162 = arith.mulf %145, %161 : vector<16x1xf32>
    %163 = arith.addf %125, %162 : vector<16x1xf32>
    %cst_103 = arith.constant 1.000000e+00 : f32
    %164 = vector.broadcast %cst_103 : f32 to vector<16x1xf32>
    %165 = arith.subf %164, %163 : vector<16x1xf32>
    %166 = arith.mulf %156, %165 : vector<16x1xf32>
    %167 = arith.addf %126, %166 : vector<16x1xf32>
    %168 = arith.mulf %156, %167 : vector<16x1xf32>
    %169 = arith.addf %163, %168 : vector<16x1xf32>
    %170 = arith.addf %127, %161 : vector<16x1xf32>
    %171 = arith.addf %170, %156 : vector<16x1xf32>
    %172 = arith.mulf %145, %161 : vector<16x1xf32>
    %173 = arith.mulf %156, %167 : vector<16x1xf32>
    %174 = arith.addf %172, %173 : vector<16x1xf32>
    %175 = arith.truncf %134 : vector<16x32xf32> to vector<16x32xbf16>
    %c0_104 = arith.constant 0 : index
    %c0_105 = arith.constant 0 : index
    %176 = vector.load %arg6[%c0_104, %c0_105] : memref<32x32xbf16, #tpu.memory_space<vmem>>, vector<32x32xbf16>
    %cst_106 = arith.constant dense<0.000000e+00> : vector<16x32xf32>
    %177 = tpu.matmul %175, %176, %cst_106 {dimension_numbers = #tpu.dot_dimension_numbers<[1], [0], [0], [1], [0, 0, 1, 1], [], []>} : vector<16x32xbf16>, vector<32x32xbf16>, vector<16x32xf32> -> vector<16x32xf32>
    %178 = vector.broadcast %20 : vector<1x32xf32> to vector<16x32xf32>
    %179 = arith.addf %177, %178 : vector<16x32xf32>
    %180 = arith.subf %179, %128 : vector<16x32xf32>
    %181 = vector.broadcast %174 : vector<16x1xf32> to vector<16x32xf32>
    %182 = arith.mulf %181, %180 : vector<16x32xf32>
    %183 = arith.addf %128, %182 : vector<16x32xf32>
    %c0_107 = arith.constant 0 : index
    %c0_108 = arith.constant 0 : index
    %184 = vector.load %arg11[%c0_107, %c0_108] : memref<16x32xf32, #tpu.memory_space<vmem>>, vector<16x32xf32>
    %185 = arith.select %124, %179, %184 : vector<16x32xf32>
    %c0_109 = arith.constant 0 : index
    %c0_110 = arith.constant 0 : index
    %186 = vector.load %arg11[%c0_109, %c0_110] : memref<16x32xf32, #tpu.memory_space<vmem>>, vector<16x32xf32>
    tpu.vector_store %arg11[%c0_109, %c0_110], %185 {strides = array<i32>} : memref<16x32xf32, #tpu.memory_space<vmem>>, vector<16x32xf32>,
    %c0_111 = arith.constant 0 : index
    %c0_112 = arith.constant 0 : index
    %187 = vector.load %arg12[%c0_111, %c0_112] : memref<16x32xf32, #tpu.memory_space<vmem>>, vector<16x32xf32>
    %188 = arith.select %124, %183, %187 : vector<16x32xf32>
    %c0_113 = arith.constant 0 : index
    %c0_114 = arith.constant 0 : index
    %189 = vector.load %arg12[%c0_113, %c0_114] : memref<16x32xf32, #tpu.memory_space<vmem>>, vector<16x32xf32>
    tpu.vector_store %arg12[%c0_113, %c0_114], %188 {strides = array<i32>} : memref<16x32xf32, #tpu.memory_space<vmem>>, vector<16x32xf32>,
    %c0_115 = arith.constant 0 : index
    %c0_116 = arith.constant 0 : index
    %190 = vector.load %arg13[%c0_115, %c0_116] : memref<16x1xf32, #tpu.memory_space<vmem>>, vector<16x1xf32>
    %191 = arith.select %124, %169, %190 : vector<16x1xf32>
    %c0_117 = arith.constant 0 : index
    %c0_118 = arith.constant 0 : index
    %192 = vector.load %arg13[%c0_117, %c0_118] : memref<16x1xf32, #tpu.memory_space<vmem>>, vector<16x1xf32>
    tpu.vector_store %arg13[%c0_117, %c0_118], %191 {strides = array<i32>} : memref<16x1xf32, #tpu.memory_space<vmem>>, vector<16x1xf32>,
    %c0_119 = arith.constant 0 : index
    %c0_120 = arith.constant 0 : index
    %193 = vector.load %arg14[%c0_119, %c0_120] : memref<16x1xf32, #tpu.memory_space<vmem>>, vector<16x1xf32>
    %194 = arith.select %124, %167, %193 : vector<16x1xf32>
    %c0_121 = arith.constant 0 : index
    %c0_122 = arith.constant 0 : index
    %195 = vector.load %arg14[%c0_121, %c0_122] : memref<16x1xf32, #tpu.memory_space<vmem>>, vector<16x1xf32>
    tpu.vector_store %arg14[%c0_121, %c0_122], %194 {strides = array<i32>} : memref<16x1xf32, #tpu.memory_space<vmem>>, vector<16x1xf32>,
    %c0_123 = arith.constant 0 : index
    %c0_124 = arith.constant 0 : index
    %196 = vector.load %arg15[%c0_123, %c0_124] : memref<16x1xf32, #tpu.memory_space<vmem>>, vector<16x1xf32>
    %197 = arith.select %124, %171, %196 : vector<16x1xf32>
    %c0_125 = arith.constant 0 : index
    %c0_126 = arith.constant 0 : index
    %198 = vector.load %arg15[%c0_125, %c0_126] : memref<16x1xf32, #tpu.memory_space<vmem>>, vector<16x1xf32>
    tpu.vector_store %arg15[%c0_125, %c0_126], %197 {strides = array<i32>} : memref<16x1xf32, #tpu.memory_space<vmem>>, vector<16x1xf32>,
    %c0_127 = arith.constant 0 : index
    %c0_128 = arith.constant 0 : index
    %199 = vector.load %arg13[%c0_127, %c0_128] : memref<16x1xf32, #tpu.memory_space<vmem>>, vector<16x1xf32>
    %cst_129 = arith.constant 0.899999976 : f32
    %200 = vector.broadcast %cst_129 : f32 to vector<16x1xf32>
    %201 = arith.cmpf olt, %199, %200 : vector<16x1xf32>
    %c0_130 = arith.constant 0 : index
    %c0_131 = arith.constant 0 : index
    %202 = vector.load %arg15[%c0_130, %c0_131] : memref<16x1xf32, #tpu.memory_space<vmem>>, vector<16x1xf32>
    %cst_132 = arith.constant 4.000000e+00 : f32
    %203 = vector.broadcast %cst_132 : f32 to vector<16x1xf32>
    %204 = arith.cmpf olt, %202, %203 : vector<16x1xf32>
    %205 = arith.andi %201, %204 : vector<16x1xi1>
    %cst_133 = arith.constant 1.000000e+00 : f32
    %cst_134 = arith.constant 0.000000e+00 : f32
    %206 = vector.broadcast %cst_133 : f32 to vector<16x1xf32>
    %207 = vector.broadcast %cst_134 : f32 to vector<16x1xf32>
    %208 = arith.select %205, %206, %207 : vector<16x1xi1>, vector<16x1xf32>
    %209 = vector.shape_cast %208 : vector<16x1xf32> to vector<1x16x1xf32>
    %cst_135 = arith.constant dense<0xFF800000> : vector<1xf32>
    %210 = vector.multi_reduction <maximumf>, %209, %cst_135 [1, 2] : vector<1x16x1xf32> to vector<1xf32>
    %211 = vector.shape_cast %210 : vector<1xf32> to vector<1x1x1xf32>
    %212 = vector.extract %211[0, 0, 0] : f32 from vector<1x1x1xf32>
    %cst_136 = arith.constant 0.000000e+00 : f32
    %213 = arith.cmpf ogt, %212, %cst_136 : f32
    %c0_137 = arith.constant 0 : index
    %c0_138 = arith.constant 0 : index
    %214 = vector.load %arg13[%c0_137, %c0_138] : memref<16x1xf32, #tpu.memory_space<vmem>>, vector<16x1xf32>
    %c0_139 = arith.constant 0 : index
    %c0_140 = arith.constant 0 : index
    %215 = vector.load %arg14[%c0_139, %c0_140] : memref<16x1xf32, #tpu.memory_space<vmem>>, vector<16x1xf32>
    %c0_141 = arith.constant 0 : index
    %c0_142 = arith.constant 0 : index
    %216 = vector.load %arg15[%c0_141, %c0_142] : memref<16x1xf32, #tpu.memory_space<vmem>>, vector<16x1xf32>
    %c0_143 = arith.constant 0 : index
    %c0_144 = arith.constant 0 : index
    %217 = vector.load %arg12[%c0_143, %c0_144] : memref<16x32xf32, #tpu.memory_space<vmem>>, vector<16x32xf32>
    %c0_145 = arith.constant 0 : index
    %c0_146 = arith.constant 0 : index
    %218 = vector.load %arg11[%c0_145, %c0_146] : memref<16x32xf32, #tpu.memory_space<vmem>>, vector<16x32xf32>
    %c0_147 = arith.constant 0 : index
    %c0_148 = arith.constant 0 : index
    %219 = vector.load %arg2[%c0_147, %c0_148] : memref<16x32xf32, #tpu.memory_space<vmem>>, vector<16x32xf32>
    %220 = arith.addf %218, %219 : vector<16x32xf32>
    %c2 = arith.constant 2 : index
    %c0_149 = arith.constant 0 : index
    %221 = vector.load %arg3[%c2, %c0_149] : memref<4x32xf32, #tpu.memory_space<vmem>>, vector<1x32xf32>
    %222 = vector.broadcast %221 : vector<1x32xf32> to vector<16x32xf32>
    %223 = arith.addf %220, %222 : vector<16x32xf32>
    %224 = vector.broadcast %18 : vector<1x32xf32> to vector<16x32xf32>
    %225 = arith.mulf %223, %224 : vector<16x32xf32>
    %cst_150 = arith.constant dense<0.000000e+00> : vector<16xf32>
    %226 = vector.multi_reduction <add>, %225, %cst_150 [1] : vector<16x32xf32> to vector<16xf32>
    %227 = vector.shape_cast %226 : vector<16xf32> to vector<16x1xf32>
    %228 = vector.broadcast %19 : f32 to vector<16x1xf32>
    %229 = arith.addf %227, %228 : vector<16x1xf32>
    %230 = arith.negf %229 : vector<16x1xf32>
    %231 = math.exp %230 : vector<16x1xf32>
    %cst_151 = arith.constant 1.000000e+00 : f32
    %232 = vector.broadcast %cst_151 : f32 to vector<16x1xf32>
    %233 = arith.addf %232, %231 : vector<16x1xf32>
    %234 = arith.divf %232, %233 : vector<16x1xf32>
    %cst_152 = arith.constant 1.000000e+00 : f32
    %235 = vector.broadcast %cst_152 : f32 to vector<16x1xf32>
    %236 = arith.cmpf olt, %214, %235 : vector<16x1xf32>
    %237 = arith.extui %236 : vector<16x1xi1> to vector<16x1xi32>
    %238 = arith.sitofp %237 : vector<16x1xi32> to vector<16x1xf32>
    %239 = arith.mulf %234, %238 : vector<16x1xf32>
    %240 = arith.addf %214, %239 : vector<16x1xf32>
    %cst_153 = arith.constant 0.899999976 : f32
    %241 = vector.broadcast %cst_153 : f32 to vector<16x1xf32>
    %242 = arith.cmpf ogt, %240, %241 : vector<16x1xf32>
    %243 = arith.extui %242 : vector<16x1xi1> to vector<16x1xi32>
    %244 = arith.sitofp %243 : vector<16x1xi32> to vector<16x1xf32>
    %245 = arith.mulf %244, %238 : vector<16x1xf32>
    %cst_154 = arith.constant 0.899999976 : f32
    %246 = vector.broadcast %cst_154 : f32 to vector<16x1xf32>
    %247 = arith.cmpf ole, %240, %246 : vector<16x1xf32>
    %248 = arith.extui %247 : vector<16x1xi1> to vector<16x1xi32>
    %249 = arith.sitofp %248 : vector<16x1xi32> to vector<16x1xf32>
    %250 = arith.mulf %249, %238 : vector<16x1xf32>
    %251 = arith.mulf %234, %250 : vector<16x1xf32>
    %252 = arith.addf %214, %251 : vector<16x1xf32>
    %cst_155 = arith.constant 1.000000e+00 : f32
    %253 = vector.broadcast %cst_155 : f32 to vector<16x1xf32>
    %254 = arith.subf %253, %252 : vector<16x1xf32>
    %255 = arith.mulf %245, %254 : vector<16x1xf32>
    %256 = arith.addf %215, %255 : vector<16x1xf32>
    %257 = arith.mulf %245, %256 : vector<16x1xf32>
    %258 = arith.addf %252, %257 : vector<16x1xf32>
    %259 = arith.addf %216, %250 : vector<16x1xf32>
    %260 = arith.addf %259, %245 : vector<16x1xf32>
    %261 = arith.mulf %234, %250 : vector<16x1xf32>
    %262 = arith.mulf %245, %256 : vector<16x1xf32>
    %263 = arith.addf %261, %262 : vector<16x1xf32>
    %264 = arith.truncf %223 : vector<16x32xf32> to vector<16x32xbf16>
    %c0_156 = arith.constant 0 : index
    %c0_157 = arith.constant 0 : index
    %265 = vector.load %arg6[%c0_156, %c0_157] : memref<32x32xbf16, #tpu.memory_space<vmem>>, vector<32x32xbf16>
    %cst_158 = arith.constant dense<0.000000e+00> : vector<16x32xf32>
    %266 = tpu.matmul %264, %265, %cst_158 {dimension_numbers = #tpu.dot_dimension_numbers<[1], [0], [0], [1], [0, 0, 1, 1], [], []>} : vector<16x32xbf16>, vector<32x32xbf16>, vector<16x32xf32> -> vector<16x32xf32>
    %267 = vector.broadcast %20 : vector<1x32xf32> to vector<16x32xf32>
    %268 = arith.addf %266, %267 : vector<16x32xf32>
    %269 = arith.subf %268, %217 : vector<16x32xf32>
    %270 = vector.broadcast %263 : vector<16x1xf32> to vector<16x32xf32>
    %271 = arith.mulf %270, %269 : vector<16x32xf32>
    %272 = arith.addf %217, %271 : vector<16x32xf32>
    %c0_159 = arith.constant 0 : index
    %c0_160 = arith.constant 0 : index
    %273 = vector.load %arg11[%c0_159, %c0_160] : memref<16x32xf32, #tpu.memory_space<vmem>>, vector<16x32xf32>
    %274 = arith.select %213, %268, %273 : vector<16x32xf32>
    %c0_161 = arith.constant 0 : index
    %c0_162 = arith.constant 0 : index
    %275 = vector.load %arg11[%c0_161, %c0_162] : memref<16x32xf32, #tpu.memory_space<vmem>>, vector<16x32xf32>
    tpu.vector_store %arg11[%c0_161, %c0_162], %274 {strides = array<i32>} : memref<16x32xf32, #tpu.memory_space<vmem>>, vector<16x32xf32>,
    %c0_163 = arith.constant 0 : index
    %c0_164 = arith.constant 0 : index
    %276 = vector.load %arg12[%c0_163, %c0_164] : memref<16x32xf32, #tpu.memory_space<vmem>>, vector<16x32xf32>
    %277 = arith.select %213, %272, %276 : vector<16x32xf32>
    %c0_165 = arith.constant 0 : index
    %c0_166 = arith.constant 0 : index
    %278 = vector.load %arg12[%c0_165, %c0_166] : memref<16x32xf32, #tpu.memory_space<vmem>>, vector<16x32xf32>
    tpu.vector_store %arg12[%c0_165, %c0_166], %277 {strides = array<i32>} : memref<16x32xf32, #tpu.memory_space<vmem>>, vector<16x32xf32>,
    %c0_167 = arith.constant 0 : index
    %c0_168 = arith.constant 0 : index
    %279 = vector.load %arg13[%c0_167, %c0_168] : memref<16x1xf32, #tpu.memory_space<vmem>>, vector<16x1xf32>
    %280 = arith.select %213, %258, %279 : vector<16x1xf32>
    %c0_169 = arith.constant 0 : index
    %c0_170 = arith.constant 0 : index
    %281 = vector.load %arg13[%c0_169, %c0_170] : memref<16x1xf32, #tpu.memory_space<vmem>>, vector<16x1xf32>
    tpu.vector_store %arg13[%c0_169, %c0_170], %280 {strides = array<i32>} : memref<16x1xf32, #tpu.memory_space<vmem>>, vector<16x1xf32>,
    %c0_171 = arith.constant 0 : index
    %c0_172 = arith.constant 0 : index
    %282 = vector.load %arg14[%c0_171, %c0_172] : memref<16x1xf32, #tpu.memory_space<vmem>>, vector<16x1xf32>
    %283 = arith.select %213, %256, %282 : vector<16x1xf32>
    %c0_173 = arith.constant 0 : index
    %c0_174 = arith.constant 0 : index
    %284 = vector.load %arg14[%c0_173, %c0_174] : memref<16x1xf32, #tpu.memory_space<vmem>>, vector<16x1xf32>
    tpu.vector_store %arg14[%c0_173, %c0_174], %283 {strides = array<i32>} : memref<16x1xf32, #tpu.memory_space<vmem>>, vector<16x1xf32>,
    %c0_175 = arith.constant 0 : index
    %c0_176 = arith.constant 0 : index
    %285 = vector.load %arg15[%c0_175, %c0_176] : memref<16x1xf32, #tpu.memory_space<vmem>>, vector<16x1xf32>
    %286 = arith.select %213, %260, %285 : vector<16x1xf32>
    %c0_177 = arith.constant 0 : index
    %c0_178 = arith.constant 0 : index
    %287 = vector.load %arg15[%c0_177, %c0_178] : memref<16x1xf32, #tpu.memory_space<vmem>>, vector<16x1xf32>
    tpu.vector_store %arg15[%c0_177, %c0_178], %286 {strides = array<i32>} : memref<16x1xf32, #tpu.memory_space<vmem>>, vector<16x1xf32>,
    %c0_179 = arith.constant 0 : index
    %c0_180 = arith.constant 0 : index
    %288 = vector.load %arg13[%c0_179, %c0_180] : memref<16x1xf32, #tpu.memory_space<vmem>>, vector<16x1xf32>
    %cst_181 = arith.constant 0.899999976 : f32
    %289 = vector.broadcast %cst_181 : f32 to vector<16x1xf32>
    %290 = arith.cmpf olt, %288, %289 : vector<16x1xf32>
    %c0_182 = arith.constant 0 : index
    %c0_183 = arith.constant 0 : index
    %291 = vector.load %arg15[%c0_182, %c0_183] : memref<16x1xf32, #tpu.memory_space<vmem>>, vector<16x1xf32>
    %cst_184 = arith.constant 4.000000e+00 : f32
    %292 = vector.broadcast %cst_184 : f32 to vector<16x1xf32>
    %293 = arith.cmpf olt, %291, %292 : vector<16x1xf32>
    %294 = arith.andi %290, %293 : vector<16x1xi1>
    %cst_185 = arith.constant 1.000000e+00 : f32
    %cst_186 = arith.constant 0.000000e+00 : f32
    %295 = vector.broadcast %cst_185 : f32 to vector<16x1xf32>
    %296 = vector.broadcast %cst_186 : f32 to vector<16x1xf32>
    %297 = arith.select %294, %295, %296 : vector<16x1xi1>, vector<16x1xf32>
    %298 = vector.shape_cast %297 : vector<16x1xf32> to vector<1x16x1xf32>
    %cst_187 = arith.constant dense<0xFF800000> : vector<1xf32>
    %299 = vector.multi_reduction <maximumf>, %298, %cst_187 [1, 2] : vector<1x16x1xf32> to vector<1xf32>
    %300 = vector.shape_cast %299 : vector<1xf32> to vector<1x1x1xf32>
    %301 = vector.extract %300[0, 0, 0] : f32 from vector<1x1x1xf32>
    %cst_188 = arith.constant 0.000000e+00 : f32
    %302 = arith.cmpf ogt, %301, %cst_188 : f32
    %c0_189 = arith.constant 0 : index
    %c0_190 = arith.constant 0 : index
    %303 = vector.load %arg13[%c0_189, %c0_190] : memref<16x1xf32, #tpu.memory_space<vmem>>, vector<16x1xf32>
    %c0_191 = arith.constant 0 : index
    %c0_192 = arith.constant 0 : index
    %304 = vector.load %arg14[%c0_191, %c0_192] : memref<16x1xf32, #tpu.memory_space<vmem>>, vector<16x1xf32>
    %c0_193 = arith.constant 0 : index
    %c0_194 = arith.constant 0 : index
    %305 = vector.load %arg15[%c0_193, %c0_194] : memref<16x1xf32, #tpu.memory_space<vmem>>, vector<16x1xf32>
    %c0_195 = arith.constant 0 : index
    %c0_196 = arith.constant 0 : index
    %306 = vector.load %arg12[%c0_195, %c0_196] : memref<16x32xf32, #tpu.memory_space<vmem>>, vector<16x32xf32>
    %c0_197 = arith.constant 0 : index
    %c0_198 = arith.constant 0 : index
    %307 = vector.load %arg11[%c0_197, %c0_198] : memref<16x32xf32, #tpu.memory_space<vmem>>, vector<16x32xf32>
    %c0_199 = arith.constant 0 : index
    %c0_200 = arith.constant 0 : index
    %308 = vector.load %arg2[%c0_199, %c0_200] : memref<16x32xf32, #tpu.memory_space<vmem>>, vector<16x32xf32>
    %309 = arith.addf %307, %308 : vector<16x32xf32>
    %c3 = arith.constant 3 : index
    %c0_201 = arith.constant 0 : index
    %310 = vector.load %arg3[%c3, %c0_201] : memref<4x32xf32, #tpu.memory_space<vmem>>, vector<1x32xf32>
    %311 = vector.broadcast %310 : vector<1x32xf32> to vector<16x32xf32>
    %312 = arith.addf %309, %311 : vector<16x32xf32>
    %313 = vector.broadcast %18 : vector<1x32xf32> to vector<16x32xf32>
    %314 = arith.mulf %312, %313 : vector<16x32xf32>
    %cst_202 = arith.constant dense<0.000000e+00> : vector<16xf32>
    %315 = vector.multi_reduction <add>, %314, %cst_202 [1] : vector<16x32xf32> to vector<16xf32>
    %316 = vector.shape_cast %315 : vector<16xf32> to vector<16x1xf32>
    %317 = vector.broadcast %19 : f32 to vector<16x1xf32>
    %318 = arith.addf %316, %317 : vector<16x1xf32>
    %319 = arith.negf %318 : vector<16x1xf32>
    %320 = math.exp %319 : vector<16x1xf32>
    %cst_203 = arith.constant 1.000000e+00 : f32
    %321 = vector.broadcast %cst_203 : f32 to vector<16x1xf32>
    %322 = arith.addf %321, %320 : vector<16x1xf32>
    %323 = arith.divf %321, %322 : vector<16x1xf32>
    %cst_204 = arith.constant 1.000000e+00 : f32
    %324 = vector.broadcast %cst_204 : f32 to vector<16x1xf32>
    %325 = arith.cmpf olt, %303, %324 : vector<16x1xf32>
    %326 = arith.extui %325 : vector<16x1xi1> to vector<16x1xi32>
    %327 = arith.sitofp %326 : vector<16x1xi32> to vector<16x1xf32>
    %328 = arith.mulf %323, %327 : vector<16x1xf32>
    %329 = arith.addf %303, %328 : vector<16x1xf32>
    %cst_205 = arith.constant 0.899999976 : f32
    %330 = vector.broadcast %cst_205 : f32 to vector<16x1xf32>
    %331 = arith.cmpf ogt, %329, %330 : vector<16x1xf32>
    %332 = arith.extui %331 : vector<16x1xi1> to vector<16x1xi32>
    %333 = arith.sitofp %332 : vector<16x1xi32> to vector<16x1xf32>
    %334 = arith.mulf %333, %327 : vector<16x1xf32>
    %cst_206 = arith.constant 0.899999976 : f32
    %335 = vector.broadcast %cst_206 : f32 to vector<16x1xf32>
    %336 = arith.cmpf ole, %329, %335 : vector<16x1xf32>
    %337 = arith.extui %336 : vector<16x1xi1> to vector<16x1xi32>
    %338 = arith.sitofp %337 : vector<16x1xi32> to vector<16x1xf32>
    %339 = arith.mulf %338, %327 : vector<16x1xf32>
    %340 = arith.mulf %323, %339 : vector<16x1xf32>
    %341 = arith.addf %303, %340 : vector<16x1xf32>
    %cst_207 = arith.constant 1.000000e+00 : f32
    %342 = vector.broadcast %cst_207 : f32 to vector<16x1xf32>
    %343 = arith.subf %342, %341 : vector<16x1xf32>
    %344 = arith.mulf %334, %343 : vector<16x1xf32>
    %345 = arith.addf %304, %344 : vector<16x1xf32>
    %346 = arith.mulf %334, %345 : vector<16x1xf32>
    %347 = arith.addf %341, %346 : vector<16x1xf32>
    %348 = arith.addf %305, %339 : vector<16x1xf32>
    %349 = arith.addf %348, %334 : vector<16x1xf32>
    %350 = arith.mulf %323, %339 : vector<16x1xf32>
    %351 = arith.mulf %334, %345 : vector<16x1xf32>
    %352 = arith.addf %350, %351 : vector<16x1xf32>
    %353 = arith.truncf %312 : vector<16x32xf32> to vector<16x32xbf16>
    %c0_208 = arith.constant 0 : index
    %c0_209 = arith.constant 0 : index
    %354 = vector.load %arg6[%c0_208, %c0_209] : memref<32x32xbf16, #tpu.memory_space<vmem>>, vector<32x32xbf16>
    %cst_210 = arith.constant dense<0.000000e+00> : vector<16x32xf32>
    %355 = tpu.matmul %353, %354, %cst_210 {dimension_numbers = #tpu.dot_dimension_numbers<[1], [0], [0], [1], [0, 0, 1, 1], [], []>} : vector<16x32xbf16>, vector<32x32xbf16>, vector<16x32xf32> -> vector<16x32xf32>
    %356 = vector.broadcast %20 : vector<1x32xf32> to vector<16x32xf32>
    %357 = arith.addf %355, %356 : vector<16x32xf32>
    %358 = arith.subf %357, %306 : vector<16x32xf32>
    %359 = vector.broadcast %352 : vector<16x1xf32> to vector<16x32xf32>
    %360 = arith.mulf %359, %358 : vector<16x32xf32>
    %361 = arith.addf %306, %360 : vector<16x32xf32>
    %c0_211 = arith.constant 0 : index
    %c0_212 = arith.constant 0 : index
    %362 = vector.load %arg11[%c0_211, %c0_212] : memref<16x32xf32, #tpu.memory_space<vmem>>, vector<16x32xf32>
    %363 = arith.select %302, %357, %362 : vector<16x32xf32>
    %c0_213 = arith.constant 0 : index
    %c0_214 = arith.constant 0 : index
    %364 = vector.load %arg11[%c0_213, %c0_214] : memref<16x32xf32, #tpu.memory_space<vmem>>, vector<16x32xf32>
    tpu.vector_store %arg11[%c0_213, %c0_214], %363 {strides = array<i32>} : memref<16x32xf32, #tpu.memory_space<vmem>>, vector<16x32xf32>,
    %c0_215 = arith.constant 0 : index
    %c0_216 = arith.constant 0 : index
    %365 = vector.load %arg12[%c0_215, %c0_216] : memref<16x32xf32, #tpu.memory_space<vmem>>, vector<16x32xf32>
    %366 = arith.select %302, %361, %365 : vector<16x32xf32>
    %c0_217 = arith.constant 0 : index
    %c0_218 = arith.constant 0 : index
    %367 = vector.load %arg12[%c0_217, %c0_218] : memref<16x32xf32, #tpu.memory_space<vmem>>, vector<16x32xf32>
    tpu.vector_store %arg12[%c0_217, %c0_218], %366 {strides = array<i32>} : memref<16x32xf32, #tpu.memory_space<vmem>>, vector<16x32xf32>,
    %c0_219 = arith.constant 0 : index
    %c0_220 = arith.constant 0 : index
    %368 = vector.load %arg13[%c0_219, %c0_220] : memref<16x1xf32, #tpu.memory_space<vmem>>, vector<16x1xf32>
    %369 = arith.select %302, %347, %368 : vector<16x1xf32>
    %c0_221 = arith.constant 0 : index
    %c0_222 = arith.constant 0 : index
    %370 = vector.load %arg13[%c0_221, %c0_222] : memref<16x1xf32, #tpu.memory_space<vmem>>, vector<16x1xf32>
    tpu.vector_store %arg13[%c0_221, %c0_222], %369 {strides = array<i32>} : memref<16x1xf32, #tpu.memory_space<vmem>>, vector<16x1xf32>,
    %c0_223 = arith.constant 0 : index
    %c0_224 = arith.constant 0 : index
    %371 = vector.load %arg14[%c0_223, %c0_224] : memref<16x1xf32, #tpu.memory_space<vmem>>, vector<16x1xf32>
    %372 = arith.select %302, %345, %371 : vector<16x1xf32>
    %c0_225 = arith.constant 0 : index
    %c0_226 = arith.constant 0 : index
    %373 = vector.load %arg14[%c0_225, %c0_226] : memref<16x1xf32, #tpu.memory_space<vmem>>, vector<16x1xf32>
    tpu.vector_store %arg14[%c0_225, %c0_226], %372 {strides = array<i32>} : memref<16x1xf32, #tpu.memory_space<vmem>>, vector<16x1xf32>,
    %c0_227 = arith.constant 0 : index
    %c0_228 = arith.constant 0 : index
    %374 = vector.load %arg15[%c0_227, %c0_228] : memref<16x1xf32, #tpu.memory_space<vmem>>, vector<16x1xf32>
    %375 = arith.select %302, %349, %374 : vector<16x1xf32>
    %c0_229 = arith.constant 0 : index
    %c0_230 = arith.constant 0 : index
    %376 = vector.load %arg15[%c0_229, %c0_230] : memref<16x1xf32, #tpu.memory_space<vmem>>, vector<16x1xf32>
    tpu.vector_store %arg15[%c0_229, %c0_230], %375 {strides = array<i32>} : memref<16x1xf32, #tpu.memory_space<vmem>>, vector<16x1xf32>,
    %c0_231 = arith.constant 0 : index
    %c0_232 = arith.constant 0 : index
    %377 = vector.load %arg12[%c0_231, %c0_232] : memref<16x32xf32, #tpu.memory_space<vmem>>, vector<16x32xf32>
    %c0_233 = arith.constant 0 : index
    %c0_234 = arith.constant 0 : index
    %378 = vector.load %arg8[%c0_233, %c0_234] : memref<16x32xf32, #tpu.memory_space<vmem>>, vector<16x32xf32>
    tpu.vector_store %arg8[%c0_233, %c0_234], %377 {strides = array<i32>} : memref<16x32xf32, #tpu.memory_space<vmem>>, vector<16x32xf32>,
    %c0_235 = arith.constant 0 : index
    %c0_236 = arith.constant 0 : index
    %379 = vector.load %arg14[%c0_235, %c0_236] : memref<16x1xf32, #tpu.memory_space<vmem>>, vector<16x1xf32>
    %c0_237 = arith.constant 0 : index
    %c0_238 = arith.constant 0 : index
    %380 = vector.load %arg9[%c0_237, %c0_238] : memref<16x1xf32, #tpu.memory_space<vmem>>, vector<16x1xf32>
    tpu.vector_store %arg9[%c0_237, %c0_238], %379 {strides = array<i32>} : memref<16x1xf32, #tpu.memory_space<vmem>>, vector<16x1xf32>,
    %c0_239 = arith.constant 0 : index
    %c0_240 = arith.constant 0 : index
    %381 = vector.load %arg15[%c0_239, %c0_240] : memref<16x1xf32, #tpu.memory_space<vmem>>, vector<16x1xf32>
    %c0_241 = arith.constant 0 : index
    %c0_242 = arith.constant 0 : index
    %382 = vector.load %arg10[%c0_241, %c0_242] : memref<16x1xf32, #tpu.memory_space<vmem>>, vector<16x1xf32>
    tpu.vector_store %arg10[%c0_241, %c0_242], %381 {strides = array<i32>} : memref<16x1xf32, #tpu.memory_space<vmem>>, vector<16x1xf32>,
    return
  }
  func.func @transform_0(%arg0: i32) -> (i32, i32) {
    %c0_i32 = arith.constant 0 : i32
    %c0_i32_0 = arith.constant 0 : i32
    return %arg0, %c0_i32 : i32, i32
  }
  func.func @transform_1(%arg0: i32) -> (i32, i32) {
    %c0_i32 = arith.constant 0 : i32
    %c0_i32_0 = arith.constant 0 : i32
    return %arg0, %c0_i32 : i32, i32
  }
  func.func @transform_2(%arg0: i32) -> (i32, i32) {
    %c0_i32 = arith.constant 0 : i32
    %c0_i32_0 = arith.constant 0 : i32
    %c0_i32_1 = arith.constant 0 : i32
    return %c0_i32, %c0_i32_0 : i32, i32
  }
  func.func @transform_3(%arg0: i32) -> (i32, i32) {
    %c0_i32 = arith.constant 0 : i32
    %c0_i32_0 = arith.constant 0 : i32
    %c0_i32_1 = arith.constant 0 : i32
    return %c0_i32, %c0_i32_0 : i32, i32
  }
  func.func @transform_4(%arg0: i32) -> (i32, i32) {
    %c0_i32 = arith.constant 0 : i32
    %c0_i32_0 = arith.constant 0 : i32
    %c0_i32_1 = arith.constant 0 : i32
    return %c0_i32, %c0_i32_0 : i32, i32
  }
  func.func @transform_5(%arg0: i32) -> (i32, i32) {
    %c0_i32 = arith.constant 0 : i32
    %c0_i32_0 = arith.constant 0 : i32
    %c0_i32_1 = arith.constant 0 : i32
    return %c0_i32, %c0_i32_0 : i32, i32
  }
  func.func @transform_6(%arg0: i32) -> (i32, i32) {
    %c0_i32 = arith.constant 0 : i32
    %c0_i32_0 = arith.constant 0 : i32
    %c0_i32_1 = arith.constant 0 : i32
    return %c0_i32, %c0_i32_0 : i32, i32
  }
  func.func @transform_7(%arg0: i32) -> (i32, i32) {
    %c0_i32 = arith.constant 0 : i32
    %c0_i32_0 = arith.constant 0 : i32
    return %arg0, %c0_i32 : i32, i32
  }
  func.func @transform_8(%arg0: i32) -> (i32, i32) {
    %c0_i32 = arith.constant 0 : i32
    %c0_i32_0 = arith.constant 0 : i32
    return %arg0, %c0_i32 : i32, i32
  }
  func.func @transform_9(%arg0: i32) -> (i32, i32) {
    %c0_i32 = arith.constant 0 : i32
    %c0_i32_0 = arith.constant 0 : i32
    return %arg0, %c0_i32 : i32, i32
  }
}

</mosaic_0001>

<bundles_post_ra>
// kernel: tpu_custom_call.1
= control target key start
LH: loop header
LB: loop body
LE: loop exit
PB: predicated region body
PF: predicated region fallthrough
CT: control target
= control target key end

     0   :  { %16 = vsyncpa [#allocation9], 0  ;;  %s1564_s0 = inlined_call_operand.hbm [shape: f32[16,32], index: 0, kind: input, shape index: {}]   ;;  %s1565_s1 = inlined_call_operand.hbm [shape: f32[16,32], index: 1, kind: input, shape index: {}]   ;;  %s1566_s2 = inlined_call_operand.vmem [shape: f32[4,32], index: 2, kind: input, shape index: {}]   ;;  %s1567_s3 = inlined_call_operand.vmem [shape: f32[1,32], index: 3, kind: input, shape index: {}]   ;;  %s1568_s4 = inlined_call_operand.<no memory space> [shape: f32[1,1], index: 4, kind: input, shape index: {}]   ;;  %s1569_s5 = inlined_call_operand.hbm [shape: bf16[32,32], index: 5, kind: input, shape index: {}]   ;;  %s1570_s6 = inlined_call_operand.vmem [shape: f32[1,32], index: 6, kind: input, shape index: {}]   ;;  %s1571_s7 = inlined_call_operand.hbm [shape: f32[16,32], index: 7, kind: output, shape index: {0}]   ;;  %s1572_s8 = inlined_call_operand.vmem [shape: f32[16,1], index: 8, kind: output, shape index: {1}]   ;;  %s1573_s9 = inlined_call_operand.vmem [shape: f32[16,1], index: 9, kind: output, shape index: {2}]  }
   0x1   :  { %17 = vsyncpa [#allocation12], 0 }
   0x2   :  { %18 = vsyncpa [#allocation10], 0  ;;  %s1262_s30 = smov [#allocation11]   ;;  %s1263_s11 = smov [#allocation8]  }
   0x3   :  { %s36_s10 = sshll.u32 %s1262_s30, 4  ;;  %s24_s12 = sshll.u32 %s1263_s11, 4  ;;  %s37_s10 = int_to_ptr.vmem [resolvable:$true] %s36_s10  ;;  %s25_s12 = int_to_ptr.vmem [resolvable:$true] %s24_s12 }
   0x4   :  { %s1184_s13 = scalar_lea.vmem %s37_s10, 256  ;;  %p1189_p1 = scmp.lt.s32.totalorder %s37_s10, %s37_s10 }
   0x5   :  { %p1185_p0 = scmp.ne.s32.totalorder %s37_s10, %s1184_s13  ;;  %p1190_p2 = scmp.lt.s32.totalorder %s1184_s13, %s1184_s13 }
   0x7   :  { %p1191_p3 = por %p1190_p2, %p1189_p1 }
   0x9   :  { %p1192_p4 = pnand %p1191_p3, %p1185_p0 }
   0xb   :  { %1195 = shalt.err (!%p1192_p4)
}
   0xc   :  { %s1264_s14 = smov 128   ;;  %s1265_s15 = smov 8  }
   0xd   :  { %42 = dma.hbm_to_vmem [thread:$0]  %s1565_s1, 256, %s37_s10, [#allocation12], %s1264_s14, %s1264_s14, %s1265_s15  }
   0xe   :  { %s1204_s18 = scalar_lea.vmem %s25_s12, 256  ;;  %p1209_p6 = scmp.lt.s32.totalorder %s25_s12, %s25_s12 }
   0xf   :  { %p1205_p5 = scmp.ne.s32.totalorder %s25_s12, %s1204_s18  ;;  %p1210_p7 = scmp.lt.s32.totalorder %s1204_s18, %s1204_s18 }
  0x11   :  { %p1211_p8 = por %p1210_p7, %p1209_p6 }
  0x13   :  { %p1212_p9 = pnand %p1211_p8, %p1205_p5 }
  0x15   :  { %1215 = shalt.err (!%p1212_p9)
}
  0x16   :  { %30 = dma.hbm_to_vmem [thread:$0]  %s1564_s0, 256, %s25_s12, [#allocation9], %s1264_s14, %s1264_s14, %s1265_s15  }
  0x17   :  { %s1266_s21 = smov [#allocation13]  }
  0x18   :  { %s54_s22 = sshll.u32 %s1266_s21, 4  ;;  %s55_s22 = int_to_ptr.vmem [resolvable:$true] %s54_s22 }
  0x19   :  { %s1224_s23 = scalar_lea.vmem %s55_s22, 256  ;;  %p1229_p11 = scmp.lt.s32.totalorder %s55_s22, %s55_s22 }
  0x1a   :  { %p1225_p10 = scmp.ne.s32.totalorder %s55_s22, %s1224_s23  ;;  %p1230_p12 = scmp.lt.s32.totalorder %s1224_s23, %s1224_s23 }
  0x1c   :  { %p1231_p13 = por %p1230_p12, %p1229_p11 }
  0x1e   :  { %p1232_p0 = pnand %p1231_p13, %p1225_p10 }
  0x20   :  { %1235 = shalt.err (!%p1232_p0)
}
  0x21   :  { %s1267_s1 = smov 64   ;;  %s1268_s24 = smov 4  }
  0x22   :  { %60 = dma.hbm_to_vmem [thread:$0]  %s1569_s5, 256, %s55_s22, [#allocation12], %s1267_s1, %s1267_s1, %s1268_s24  }
  0x23   :  { %1256 = dma.done.wait [#allocation9], 256  }
  0x24   :  { %1257 = vsyncadd [#allocation9], 4294967040 }
  0x25   :  { %1258 = dma.done.wait [#allocation12], 512  }
  0x26   :  { %1259 = vsyncadd [#allocation12], 4294966784  ;;  %vm84_vm0 = vcmask 7168   ;;  %vm91_vm1 = vcmask 261120   ;;  %v1269_v0 = vmov 0.0   ;;  %v94_v3 = vld [vmem:[#allocation8] sm:$0xff] }
  0x27   :  { %85 = vst.msk [vmem:[#allocation4] sm:$0xff] %vm84_vm0, %v1269_v0  ;;  %86 = vst.msk [vmem:[#allocation4 + $0x8] sm:$0xff] %vm84_vm0, %v1269_v0  ;;  %v1367_v1 = vld [vmem:[%s1567_s3] sm:$0x1]  ;;  %v95_v4 = vld [vmem:[#allocation8 + $0x8] sm:$0xff] }
  0x28   :  { %87 = vst.msk [vmem:[#allocation5] sm:$0xff] %vm84_vm0, %v1269_v0  ;;  %88 = vst.msk [vmem:[#allocation5 + $0x8] sm:$0xff] %vm84_vm0, %v1269_v0  ;;  %v1372_v2 = vld [vmem:[%s1570_s6] sm:$0x1] }
  0x29   :  { %89 = vst.msk [vmem:[#allocation6] sm:$0xff] %vm84_vm0, %v1269_v0  ;;  %90 = vst.msk [vmem:[#allocation6 + $0x8] sm:$0xff] %vm84_vm0, %v1269_v0 }
  0x2a   :  { %92 = vst.msk [vmem:[#allocation3] sm:$0xff] %vm91_vm1, %v1269_v0  ;;  %93 = vst.msk [vmem:[#allocation3 + $0x8] sm:$0xff] %vm91_vm1, %v1269_v0 }
  0x2b   :  { %96 = vst.msk [vmem:[#allocation2] sm:$0xff] %vm91_vm1, %v94_v3  ;;  %97 = vst.msk [vmem:[#allocation2 + $0x8] sm:$0xff] %vm91_vm1, %v95_v4 }
  0x2e   :  { %v101_v5 = vld [vmem:[#allocation4] sm:$0xff]  ;;  %v102_v6 = vld [vmem:[#allocation4 + $0x8] sm:$0xff] }
  0x2f   :  { %vm103_vm2 = vcmp.lt.f32.partialorder %v101_v5, 0.9  ;;  %vm104_vm3 = vcmp.lt.f32.partialorder %v102_v6, 0.9 }
  0x30   :  { %v105_v7 = vld [vmem:[#allocation6] sm:$0xff]  ;;  %v106_v8 = vld [vmem:[#allocation6 + $0x8] sm:$0xff] }
  0x31   :  { %vm107_vm4 = vcmp.lt.f32.partialorder %v105_v7, 4.0  ;;  %vm108_vm5 = vcmp.lt.f32.partialorder %v106_v8, 4.0 }
  0x32   :  { %vm109_vm6 = vmand %vm103_vm2, %vm107_vm4 }
  0x33   :  { %vm110_vm7 = vmand %vm104_vm3, %vm108_vm5  ;;  %v111_v9 = vsel %vm109_vm6, 1.0, %v1269_v0 }
  0x34   :  { %v112_v10 = vsel %vm110_vm7, 1.0, %v1269_v0  ;;  %v113_v11 = vsel %vm84_vm0, %v111_v9, -inf }
  0x35   :  { %v114_v12 = vsel %vm84_vm0, %v112_v10, -inf }
  0x36   :  { %v115_v13 = vmax.f32 %v113_v11, %v114_v12 }
  0x38   :  { %116 = vmax.xlane.f32.xlu0 %v115_v13 }
  0xc1   :  { %v117_v14 = vpop.xlane.xlu0 %116 }
  0xc2   :  { %v118_v15 = vrot.slane %v117_v14, 4 }
  0xc4   :  { %v119_v16 = vmax.f32 %v117_v14, %v118_v15 }
  0xc6   :  { %v120_v17 = vrot.slane %v119_v16, 2 }
  0xc8   :  { %v121_v18 = vmax.f32 %v119_v16, %v120_v17 }
  0xca   :  { %v122_v19 = vrot.slane %v121_v18, 1 }
  0xcc   :  { %v123_v20 = vmax.f32 %v121_v18, %v122_v19 }
  0xce   :  { %1099 = vpush %v123_v20 }
  0xff   :  { %s1100_s3 = spop %1099 }
 0x100   :  { %p125_p1 = scmp.gt.f32.partialorder %s1100_s3, 0.0 }
 0x101   :  { %v137_v21 = vld [vmem:[#allocation2] sm:$0xff] (%p125_p1)  ;;  %v151_v24 = vlaneseq (%p125_p1)  ;;  %v138_v26 = vld [vmem:[#allocation2 + $0x8] sm:$0xff] (%p125_p1)  ;;  %v1270_v28 = vmov (%p125_p1), 0.0   ;;  %vm1271_vm8 = vmmov (%p125_p1), 0   ;;  %v1130_v31 = vld [vmem:[#allocation13 + $0x8] sm:$0xff] (%p125_p1)   ;;  %v1272_v42 = vmov (%p125_p1), 0  }
 0x102   :  { %128 = sbr.rel (!%p125_p1) target bundleno = 595 (0x253), region = 45  ;;  %v139_v22 = vld [vmem:[#allocation11] sm:$0xff] (%p125_p1)  ;;  %v140_v27 = vld [vmem:[#allocation11 + $0x8] sm:$0xff] (%p125_p1)  ;;  %1067 = vmatprep.subr.bf16.mxu0 (%p125_p1), %v1270_v28  ;;  %1071 = vmatprep.mubr.msk.bf16.mxu0 (%p125_p1), %vm1271_vm8, %v1270_v28  ;;  %v1131_v35 = vld [vmem:[#allocation13] sm:$0xff] (%p125_p1)   ;;  %v164_v43 = vstv (%p125_p1), %s1568_s4 }
 0x103   :  { %v1007_v23 = vld [vmem:[%s1566_s2] ss:$0 sm:$0xff] (%p125_p1)  ;;  %v141_v25 = vadd.f32 (%p125_p1), %v139_v22, %v137_v21  ;;  %v1385_v29 = vshrl.u32 (%p125_p1), %v151_v24, 7  ;;  %v142_v30 = vadd.f32 (%p125_p1), %v140_v27, %v138_v26  ;;  %1068 = vmatpush3.bf16.msra.mxu0 (%p125_p1), %v1130_v31  ;;  %1128 = vset.pattern.permute.xlu1 (%p125_p1), %v1272_v42  ;;  %v130_v55 = vld [vmem:[#allocation4 + $0x8] sm:$0xff] (%p125_p1)  ;;  %v131_v20 = vld [vmem:[#allocation5] sm:$0xff] (%p125_p1) }
 0x104   :  { %1069 = vmatprep.subr.bf16.mxu0 (%p125_p1), %v1270_v28  ;;  %1129 = vset.pattern.permute.xlu0 (%p125_p1), %v1272_v42  ;;  %v129_v54 = vld [vmem:[#allocation4] sm:$0xff] (%p125_p1)  ;;  %vm180_vm10 = vcmp.lt.f32.partialorder (%p125_p1), %v130_v55, 1.0  ;;  %v134_v10 = vld [vmem:[#allocation6 + $0x8] sm:$0xff] (%p125_p1)  ;;  %v132_v26 = vld [vmem:[#allocation5 + $0x8] sm:$0xff] (%p125_p1) }
 0x105   :  { %v148_v32 = vadd.f32 (%p125_p1), %v1007_v23, %v141_v25  ;;  %v153_v33 = vsub.s32 (%p125_p1), 0, %v1385_v29  ;;  %v149_v34 = vadd.f32 (%p125_p1), %v1007_v23, %v142_v30  ;;  %vm179_vm9 = vcmp.lt.f32.partialorder (%p125_p1), %v129_v54, 1.0  ;;  %v133_v63 = vld [vmem:[#allocation6] sm:$0xff] (%p125_p1)  ;;  %v135_v42 = vld [vmem:[#allocation3] sm:$0xff] (%p125_p1) }
 0x106   :  { %v1010_v56 = vsel (%p125_p1), %vm179_vm9, 1.0, %v1270_v28  ;;  %v1011_v59 = vsel (%p125_p1), %vm180_vm10, 1.0, %v1270_v28 }
 0x107   :  { %v154_v36 = vrot.slane %v1367_v1, %v153_v33  ;;  %v225_v37 = vpack.c.bf16 %v149_v34, %v148_v32  ;;  %1070 = vmatpush3.bf16.msra.mxu0 %v1131_v35  ;;  %v234_v27 = vrot.slane %v1372_v2, %v153_v33 }
 0x109   :  { %v156_v38 = vmul.f32 %v154_v36, %v148_v32  ;;  %v157_v39 = vmul.f32 %v154_v36, %v149_v34 }
 0x10a   :  { %1072 = vmatmul.mubr.msk.bf16.vlgmr.msra.gmra.mxu0 %vm91_vm1, %v225_v37 }
 0x10b   :  { %v158_v40 = vsel %vm91_vm1, %v156_v38, 0.0  ;;  %v161_v41 = vsel %vm91_vm1, %v157_v39, 0.0 }
 0x10c   :  { %159 = vadd.xlane.f32.xlu0 %v158_v40 }
 0x110   :  { %162 = vadd.xlane.f32.xlu0 %v161_v41 }
 0x195   :  { %v160_v44 = vpop.xlane.xlu0 %159 }
 0x196   :  { %v165_v45 = vadd.f32 %v164_v43, %v160_v44 }
 0x198   :  { %v1008_v46 = vmul.f32 -1.442695, %v165_v45  ;;  %v136_v45 = vld [vmem:[#allocation3 + $0x8] sm:$0xff] }
 0x199   :  { %v163_v47 = vpop.xlane.xlu0 %162 }
 0x19a   :  { %1132 = vpow2.f32 %v1008_v46  ;;  %v166_v48 = vadd.f32 %v164_v43, %v163_v47 }
 0x19c   :  { %v1009_v49 = vmul.f32 -1.442695, %v166_v48 }
 0x19e   :  { %1134 = vpow2.f32 %v1009_v49 }
 0x1a7   :  { %v1133_v50 = vpop.eup %1132 }
 0x1a8   :  { %v173_v51 = vadd.f32 1.0, %v1133_v50 }
 0x1aa   :  { %1136 = vrcp.f32 %v173_v51 }
 0x1ab   :  { %v1135_v52 = vpop.eup %1134 }
 0x1ac   :  { %v174_v53 = vadd.f32 1.0, %v1135_v52 }
 0x1ae   :  { %1138 = vrcp.f32 %v174_v53 }
 0x1b7   :  { %v1137_v57 = vpop.eup %1136 }
 0x1b8   :  { %v185_v58 = vmul.f32 %v1137_v57, %v1010_v56 }
 0x1ba   :  { %v187_v60 = vadd.f32 %v185_v58, %v129_v54 }
 0x1bb   :  { %v1139_v61 = vpop.eup %1138 }
 0x1bc   :  { %vm189_vm11 = vcmp.gt.f32.partialorder %v187_v60, 0.9  ;;  %vm197_vm12 = vcmp.le.f32.partialorder %v187_v60, 0.9  ;;  %v186_v62 = vmul.f32 %v1139_v61, %v1011_v59 }
 0x1bd   :  { %v1012_v3 = vsel %vm189_vm11, 1.0, %v1270_v28  ;;  %v1014_v4 = vsel %vm197_vm12, 1.0, %v1270_v28 }
 0x1be   :  { %v203_v5 = vmul.f32 %v1014_v4, %v1010_v56  ;;  %v188_v6 = vadd.f32 %v186_v62, %v130_v55  ;;  %v195_v7 = vmul.f32 %v1012_v3, %v1010_v56 }
 0x1c0   :  { %v205_v8 = vmul.f32 %v1137_v57, %v203_v5  ;;  %v219_v9 = vadd.f32 %v203_v5, %v133_v63  ;;  %vm190_vm13 = vcmp.gt.f32.partialorder %v188_v6, 0.9  ;;  %vm198_vm14 = vcmp.le.f32.partialorder %v188_v6, 0.9 }
 0x1c1   :  { %v1013_v11 = vsel %vm190_vm13, 1.0, %v1270_v28  ;;  %v1015_v12 = vsel %vm198_vm14, 1.0, %v1270_v28 }
 0x1c2   :  { %v207_v13 = vadd.f32 %v205_v8, %v129_v54  ;;  %v221_v14 = vadd.f32 %v219_v9, %v195_v7  ;;  %v204_v15 = vmul.f32 %v1015_v12, %v1011_v59  ;;  %v196_v17 = vmul.f32 %v1013_v11, %v1011_v59 }
 0x1c4   :  { %v209_v16 = vsub.f32 1.0, %v207_v13  ;;  %316 = vst.msk [vmem:[#allocation6] sm:$0xff] %vm84_vm0, %v221_v14  ;;  %v206_v18 = vmul.f32 %v1139_v61, %v204_v15  ;;  %v220_v19 = vadd.f32 %v204_v15, %v134_v10 }
 0x1c6   :  { %v211_v21 = vmul.f32 %v209_v16, %v195_v7  ;;  %v208_v22 = vadd.f32 %v206_v18, %v130_v55  ;;  %v222_v23 = vadd.f32 %v220_v19, %v196_v17 }
 0x1c8   :  { %v213_v24 = vadd.f32 %v211_v21, %v131_v20  ;;  %v210_v25 = vsub.f32 1.0, %v208_v22  ;;  %317 = vst.msk [vmem:[#allocation6 + $0x8] sm:$0xff] %vm84_vm0, %v222_v23 }
 0x1ca   :  { %v215_v28 = vmul.f32 %v213_v24, %v195_v7  ;;  %314 = vst.msk [vmem:[#allocation5] sm:$0xff] %vm84_vm0, %v213_v24  ;;  %v212_v30 = vmul.f32 %v210_v25, %v196_v17  ;;  %v285_v35 = vpop.f32.mrf.mxu0 }
 0x1cb   :  { %v286_v36 = vadd.f32 %v285_v35, %v234_v27 }
 0x1cc   :  { %v223_v31 = vadd.f32 %v215_v28, %v205_v8  ;;  %v217_v32 = vadd.f32 %v215_v28, %v207_v13  ;;  %v214_v34 = vadd.f32 %v212_v30, %v132_v26  ;;  %v1073_v38 = vpop.f32.mrf.mxu0 }
 0x1cd   :  { %308 = vst.msk [vmem:[#allocation2] sm:$0xff] %vm91_vm1, %v286_v36  ;;  %v292_v43 = vsub.f32 %v286_v36, %v135_v42 }
 0x1ce   :  { %296 = vperm.xlu1 %1128, %v223_v31   ;;  %312 = vst.msk [vmem:[#allocation4] sm:$0xff] %vm84_vm0, %v217_v32  ;;  %v216_v37 = vmul.f32 %v214_v34, %v196_v17  ;;  %315 = vst.msk [vmem:[#allocation5 + $0x8] sm:$0xff] %vm84_vm0, %v214_v34  ;;  %v288_v39 = vpop.f32.mrf.mxu0 }
 0x1cf   :  { %v289_v40 = vadd.f32 %v288_v39, %v234_v27 }
 0x1d0   :  { %v218_v29 = vadd.f32 %v216_v37, %v208_v22  ;;  %v224_v33 = vadd.f32 %v216_v37, %v206_v18  ;;  %v1074_v41 = vpop.f32.mrf.mxu0 }
 0x1d1   :  { %309 = vst.msk [vmem:[#allocation2 + $0x8] sm:$0xff] %vm91_vm1, %v289_v40  ;;  %v293_v48 = vsub.f32 %v289_v40, %v136_v45 }
 0x1d2   :  { %313 = vst.msk [vmem:[#allocation4 + $0x8] sm:$0xff] %vm84_vm0, %v218_v29  ;;  %301 = vperm.xlu1 %1128, %v224_v33  }
 0x249   :  { %v297_v44 = vpop.permute.xlu1 %296 }
 0x24a   :  { %v304_v46 = vmul.f32 %v297_v44, %v292_v43 }
 0x24c   :  { %v306_v47 = vadd.f32 %v304_v46, %v135_v42 }
 0x24d   :  { %v302_v49 = vpop.permute.xlu1 %301 }
 0x24e   :  { %310 = vst.msk [vmem:[#allocation3] sm:$0xff] %vm91_vm1, %v306_v47  ;;  %v305_v50 = vmul.f32 %v302_v49, %v293_v48 }
 0x250   :  { %v307_v51 = vadd.f32 %v305_v50, %v136_v45 }
 0x252   :  { %311 = vst.msk [vmem:[#allocation3 + $0x8] sm:$0xff] %vm91_vm1, %v307_v51 }
 0x253 PF:  { %v318_v52 = vld [vmem:[#allocation4] sm:$0xff]  ;;  %v319_v53 = vld [vmem:[#allocation4 + $0x8] sm:$0xff] }
 0x254   :  { %v322_v54 = vld [vmem:[#allocation6] sm:$0xff]  ;;  %vm320_vm15 = vcmp.lt.f32.partialorder %v318_v52, 0.9  ;;  %vm321_vm2 = vcmp.lt.f32.partialorder %v319_v53, 0.9  ;;  %v323_v55 = vld [vmem:[#allocation6 + $0x8] sm:$0xff] }
 0x255   :  { %vm324_vm3 = vcmp.lt.f32.partialorder %v322_v54, 4.0  ;;  %vm325_vm4 = vcmp.lt.f32.partialorder %v323_v55, 4.0 }
 0x256   :  { %vm326_vm5 = vmand %vm320_vm15, %vm324_vm3 }
 0x257   :  { %vm327_vm6 = vmand %vm321_vm2, %vm325_vm4  ;;  %v328_v56 = vsel %vm326_vm5, 1.0, %v1269_v0 }
 0x258   :  { %v329_v57 = vsel %vm327_vm6, 1.0, %v1269_v0  ;;  %v330_v58 = vsel %vm84_vm0, %v328_v56, -inf }
 0x259   :  { %v331_v59 = vsel %vm84_vm0, %v329_v57, -inf }
 0x25a   :  { %v332_v60 = vmax.f32 %v330_v58, %v331_v59 }
 0x25c   :  { %333 = vmax.xlane.f32.xlu0 %v332_v60 }
 0x2e5   :  { %v334_v61 = vpop.xlane.xlu0 %333 }
 0x2e6   :  { %v335_v62 = vrot.slane %v334_v61, 4 }
 0x2e8   :  { %v336_v63 = vmax.f32 %v334_v61, %v335_v62 }
 0x2ea   :  { %v337_v3 = vrot.slane %v336_v63, 2 }
 0x2ec   :  { %v338_v4 = vmax.f32 %v336_v63, %v337_v3 }
 0x2ee   :  { %v339_v5 = vrot.slane %v338_v4, 1 }
 0x2f0   :  { %v340_v6 = vmax.f32 %v338_v4, %v339_v5 }
 0x2f2   :  { %1101 = vpush %v340_v6 }
 0x323   :  { %s1102_s11 = spop %1101 }
 0x324   :  { %p342_p2 = scmp.gt.f32.partialorder %s1102_s11, 0.0 }
 0x325   :  { %v354_v7 = vld [vmem:[#allocation2] sm:$0xff] (%p342_p2)  ;;  %v368_v10 = vlaneseq (%p342_p2)  ;;  %v355_v12 = vld [vmem:[#allocation2 + $0x8] sm:$0xff] (%p342_p2)  ;;  %v1273_v14 = vmov (%p342_p2), 0.0   ;;  %vm1274_vm7 = vmmov (%p342_p2), 0   ;;  %v1142_v17 = vld [vmem:[#allocation13 + $0x8] sm:$0xff] (%p342_p2)   ;;  %v1275_v28 = vmov (%p342_p2), 0  }
 0x326   :  { %345 = sbr.rel (!%p342_p2) target bundleno = 1143 (0x477), region = 49  ;;  %v356_v8 = vld [vmem:[#allocation11] sm:$0xff] (%p342_p2)  ;;  %v357_v13 = vld [vmem:[#allocation11 + $0x8] sm:$0xff] (%p342_p2)  ;;  %1075 = vmatprep.subr.bf16.mxu0 (%p342_p2), %v1273_v14  ;;  %1079 = vmatprep.mubr.msk.bf16.mxu0 (%p342_p2), %vm1274_vm7, %v1273_v14  ;;  %v1143_v21 = vld [vmem:[#allocation13] sm:$0xff] (%p342_p2)   ;;  %v381_v30 = vstv (%p342_p2), %s1568_s4 }
 0x327   :  { %v1019_v9 = vld [vmem:[%s1566_s2 + $0x1] ss:$0 sm:$0xff] (%p342_p2)  ;;  %v358_v11 = vadd.f32 (%p342_p2), %v356_v8, %v354_v7  ;;  %v1426_v15 = vshrl.u32 (%p342_p2), %v368_v10, 7  ;;  %v359_v16 = vadd.f32 (%p342_p2), %v357_v13, %v355_v12  ;;  %1076 = vmatpush3.bf16.msra.mxu0 (%p342_p2), %v1142_v17  ;;  %1140 = vset.pattern.permute.xlu1 (%p342_p2), %v1275_v28  ;;  %v347_v41 = vld [vmem:[#allocation4 + $0x8] sm:$0xff] (%p342_p2)  ;;  %v348_v6 = vld [vmem:[#allocation5] sm:$0xff] (%p342_p2) }
 0x328   :  { %1077 = vmatprep.subr.bf16.mxu0 (%p342_p2), %v1273_v14  ;;  %1141 = vset.pattern.permute.xlu0 (%p342_p2), %v1275_v28  ;;  %v346_v40 = vld [vmem:[#allocation4] sm:$0xff] (%p342_p2)  ;;  %vm397_vm9 = vcmp.lt.f32.partialorder (%p342_p2), %v347_v41, 1.0  ;;  %v351_v57 = vld [vmem:[#allocation6 + $0x8] sm:$0xff] (%p342_p2)  ;;  %v349_v12 = vld [vmem:[#allocation5 + $0x8] sm:$0xff] (%p342_p2) }
 0x329   :  { %v365_v18 = vadd.f32 (%p342_p2), %v1019_v9, %v358_v11  ;;  %v370_v19 = vsub.s32 (%p342_p2), 0, %v1426_v15  ;;  %v366_v20 = vadd.f32 (%p342_p2), %v1019_v9, %v359_v16  ;;  %vm396_vm8 = vcmp.lt.f32.partialorder (%p342_p2), %v346_v40, 1.0  ;;  %v350_v49 = vld [vmem:[#allocation6] sm:$0xff] (%p342_p2)  ;;  %v352_v28 = vld [vmem:[#allocation3] sm:$0xff] (%p342_p2) }
 0x32a   :  { %v1022_v42 = vsel (%p342_p2), %vm396_vm8, 1.0, %v1273_v14  ;;  %v1023_v45 = vsel (%p342_p2), %vm397_vm9, 1.0, %v1273_v14 }
 0x32b   :  { %v371_v22 = vrot.slane %v1367_v1, %v370_v19  ;;  %v442_v23 = vpack.c.bf16 %v366_v20, %v365_v18  ;;  %1078 = vmatpush3.bf16.msra.mxu0 %v1143_v21  ;;  %v451_v13 = vrot.slane %v1372_v2, %v370_v19 }
 0x32d   :  { %v373_v24 = vmul.f32 %v371_v22, %v365_v18  ;;  %v374_v25 = vmul.f32 %v371_v22, %v366_v20 }
 0x32e   :  { %1080 = vmatmul.mubr.msk.bf16.vlgmr.msra.gmra.mxu0 %vm91_vm1, %v442_v23 }
 0x32f   :  { %v375_v26 = vsel %vm91_vm1, %v373_v24, 0.0  ;;  %v378_v27 = vsel %vm91_vm1, %v374_v25, 0.0 }
 0x330   :  { %376 = vadd.xlane.f32.xlu0 %v375_v26 }
 0x334   :  { %379 = vadd.xlane.f32.xlu0 %v378_v27 }
 0x3b9   :  { %v377_v31 = vpop.xlane.xlu0 %376 }
 0x3ba   :  { %v382_v32 = vadd.f32 %v381_v30, %v377_v31 }
 0x3bc   :  { %v1020_v34 = vmul.f32 -1.442695, %v382_v32  ;;  %v353_v32 = vld [vmem:[#allocation3 + $0x8] sm:$0xff] }
 0x3bd   :  { %v380_v35 = vpop.xlane.xlu0 %379 }
 0x3be   :  { %1144 = vpow2.f32 %v1020_v34  ;;  %v383_v36 = vadd.f32 %v381_v30, %v380_v35 }
 0x3c0   :  { %v1021_v37 = vmul.f32 -1.442695, %v383_v36 }
 0x3c2   :  { %1146 = vpow2.f32 %v1021_v37 }
 0x3cb   :  { %v1145_v38 = vpop.eup %1144 }
 0x3cc   :  { %v390_v29 = vadd.f32 1.0, %v1145_v38 }
 0x3ce   :  { %1148 = vrcp.f32 %v390_v29 }
 0x3cf   :  { %v1147_v33 = vpop.eup %1146 }
 0x3d0   :  { %v391_v39 = vadd.f32 1.0, %v1147_v33 }
 0x3d2   :  { %1150 = vrcp.f32 %v391_v39 }
 0x3db   :  { %v1149_v43 = vpop.eup %1148 }
 0x3dc   :  { %v402_v44 = vmul.f32 %v1149_v43, %v1022_v42 }
 0x3de   :  { %v404_v46 = vadd.f32 %v402_v44, %v346_v40 }
 0x3df   :  { %v1151_v47 = vpop.eup %1150 }
 0x3e0   :  { %vm406_vm10 = vcmp.gt.f32.partialorder %v404_v46, 0.9  ;;  %vm414_vm11 = vcmp.le.f32.partialorder %v404_v46, 0.9  ;;  %v403_v48 = vmul.f32 %v1151_v47, %v1023_v45 }
 0x3e1   :  { %v1024_v50 = vsel %vm406_vm10, 1.0, %v1273_v14  ;;  %v1026_v51 = vsel %vm414_vm11, 1.0, %v1273_v14 }
 0x3e2   :  { %v420_v52 = vmul.f32 %v1026_v51, %v1022_v42  ;;  %v405_v53 = vadd.f32 %v403_v48, %v347_v41  ;;  %v412_v54 = vmul.f32 %v1024_v50, %v1022_v42 }
 0x3e4   :  { %v422_v55 = vmul.f32 %v1149_v43, %v420_v52  ;;  %v436_v56 = vadd.f32 %v420_v52, %v350_v49  ;;  %vm407_vm12 = vcmp.gt.f32.partialorder %v405_v53, 0.9  ;;  %vm415_vm13 = vcmp.le.f32.partialorder %v405_v53, 0.9 }
 0x3e5   :  { %v1025_v58 = vsel %vm407_vm12, 1.0, %v1273_v14  ;;  %v1027_v59 = vsel %vm415_vm13, 1.0, %v1273_v14 }
 0x3e6   :  { %v424_v60 = vadd.f32 %v422_v55, %v346_v40  ;;  %v438_v61 = vadd.f32 %v436_v56, %v412_v54  ;;  %v421_v62 = vmul.f32 %v1027_v59, %v1023_v45  ;;  %v413_v3 = vmul.f32 %v1025_v58, %v1023_v45 }
 0x3e8   :  { %v426_v63 = vsub.f32 1.0, %v424_v60  ;;  %533 = vst.msk [vmem:[#allocation6] sm:$0xff] %vm84_vm0, %v438_v61  ;;  %v423_v4 = vmul.f32 %v1151_v47, %v421_v62  ;;  %v437_v5 = vadd.f32 %v421_v62, %v351_v57 }
 0x3ea   :  { %v428_v7 = vmul.f32 %v426_v63, %v412_v54  ;;  %v425_v8 = vadd.f32 %v423_v4, %v347_v41  ;;  %v439_v9 = vadd.f32 %v437_v5, %v413_v3 }
 0x3ec   :  { %v430_v10 = vadd.f32 %v428_v7, %v348_v6  ;;  %v427_v11 = vsub.f32 1.0, %v425_v8  ;;  %534 = vst.msk [vmem:[#allocation6 + $0x8] sm:$0xff] %vm84_vm0, %v439_v9 }
 0x3ee   :  { %v432_v14 = vmul.f32 %v430_v10, %v412_v54  ;;  %531 = vst.msk [vmem:[#allocation5] sm:$0xff] %vm84_vm0, %v430_v10  ;;  %v429_v16 = vmul.f32 %v427_v11, %v413_v3  ;;  %v502_v21 = vpop.f32.mrf.mxu0 }
 0x3ef   :  { %v503_v22 = vadd.f32 %v502_v21, %v451_v13 }
 0x3f0   :  { %v440_v17 = vadd.f32 %v432_v14, %v422_v55  ;;  %v434_v18 = vadd.f32 %v432_v14, %v424_v60  ;;  %v431_v20 = vadd.f32 %v429_v16, %v349_v12  ;;  %v1081_v24 = vpop.f32.mrf.mxu0 }
 0x3f1   :  { %525 = vst.msk [vmem:[#allocation2] sm:$0xff] %vm91_vm1, %v503_v22  ;;  %v509_v30 = vsub.f32 %v503_v22, %v352_v28 }
 0x3f2   :  { %513 = vperm.xlu1 %1140, %v440_v17   ;;  %529 = vst.msk [vmem:[#allocation4] sm:$0xff] %vm84_vm0, %v434_v18  ;;  %v433_v23 = vmul.f32 %v431_v20, %v413_v3  ;;  %532 = vst.msk [vmem:[#allocation5 + $0x8] sm:$0xff] %vm84_vm0, %v431_v20  ;;  %v505_v25 = vpop.f32.mrf.mxu0 }
 0x3f3   :  { %v506_v26 = vadd.f32 %v505_v25, %v451_v13 }
 0x3f4   :  { %v435_v15 = vadd.f32 %v433_v23, %v425_v8  ;;  %v441_v19 = vadd.f32 %v433_v23, %v423_v4  ;;  %v1082_v27 = vpop.f32.mrf.mxu0 }
 0x3f5   :  { %526 = vst.msk [vmem:[#allocation2 + $0x8] sm:$0xff] %vm91_vm1, %v506_v26  ;;  %v510_v36 = vsub.f32 %v506_v26, %v353_v32 }
 0x3f6   :  { %530 = vst.msk [vmem:[#allocation4 + $0x8] sm:$0xff] %vm84_vm0, %v435_v15  ;;  %518 = vperm.xlu1 %1140, %v441_v19  }
 0x46d   :  { %v514_v31 = vpop.permute.xlu1 %513 }
 0x46e   :  { %v521_v34 = vmul.f32 %v514_v31, %v509_v30 }
 0x470   :  { %v523_v35 = vadd.f32 %v521_v34, %v352_v28 }
 0x471   :  { %v519_v37 = vpop.permute.xlu1 %518 }
 0x472   :  { %527 = vst.msk [vmem:[#allocation3] sm:$0xff] %vm91_vm1, %v523_v35  ;;  %v522_v38 = vmul.f32 %v519_v37, %v510_v36 }
 0x474   :  { %v524_v29 = vadd.f32 %v522_v38, %v353_v32 }
 0x476   :  { %528 = vst.msk [vmem:[#allocation3 + $0x8] sm:$0xff] %vm91_vm1, %v524_v29 }
 0x477 PF:  { %v535_v33 = vld [vmem:[#allocation4] sm:$0xff]  ;;  %v536_v39 = vld [vmem:[#allocation4 + $0x8] sm:$0xff] }
 0x478   :  { %v539_v40 = vld [vmem:[#allocation6] sm:$0xff]  ;;  %vm537_vm14 = vcmp.lt.f32.partialorder %v535_v33, 0.9  ;;  %vm538_vm15 = vcmp.lt.f32.partialorder %v536_v39, 0.9  ;;  %v540_v41 = vld [vmem:[#allocation6 + $0x8] sm:$0xff] }
 0x479   :  { %vm541_vm2 = vcmp.lt.f32.partialorder %v539_v40, 4.0  ;;  %vm542_vm3 = vcmp.lt.f32.partialorder %v540_v41, 4.0 }
 0x47a   :  { %vm543_vm4 = vmand %vm537_vm14, %vm541_vm2 }
 0x47b   :  { %vm544_vm5 = vmand %vm538_vm15, %vm542_vm3  ;;  %v545_v42 = vsel %vm543_vm4, 1.0, %v1269_v0 }
 0x47c   :  { %v546_v43 = vsel %vm544_vm5, 1.0, %v1269_v0  ;;  %v547_v44 = vsel %vm84_vm0, %v545_v42, -inf }
 0x47d   :  { %v548_v45 = vsel %vm84_vm0, %v546_v43, -inf }
 0x47e   :  { %v549_v46 = vmax.f32 %v547_v44, %v548_v45 }
 0x480   :  { %550 = vmax.xlane.f32.xlu0 %v549_v46 }
 0x509   :  { %v551_v47 = vpop.xlane.xlu0 %550 }
 0x50a   :  { %v552_v48 = vrot.slane %v551_v47, 4 }
 0x50c   :  { %v553_v49 = vmax.f32 %v551_v47, %v552_v48 }
 0x50e   :  { %v554_v50 = vrot.slane %v553_v49, 2 }
 0x510   :  { %v555_v51 = vmax.f32 %v553_v49, %v554_v50 }
 0x512   :  { %v556_v52 = vrot.slane %v555_v51, 1 }
 0x514   :  { %v557_v53 = vmax.f32 %v555_v51, %v556_v52 }
 0x516   :  { %1103 = vpush %v557_v53 }
 0x547   :  { %s1104_s18 = spop %1103 }
 0x548   :  { %p559_p3 = scmp.gt.f32.partialorder %s1104_s18, 0.0 }
 0x549   :  { %v571_v54 = vld [vmem:[#allocation2] sm:$0xff] (%p559_p3)  ;;  %v585_v57 = vlaneseq (%p559_p3)  ;;  %v572_v59 = vld [vmem:[#allocation2 + $0x8] sm:$0xff] (%p559_p3)  ;;  %v1276_v61 = vmov (%p559_p3), 0.0   ;;  %vm1277_vm6 = vmmov (%p559_p3), 0   ;;  %v1154_v3 = vld [vmem:[#allocation13 + $0x8] sm:$0xff] (%p559_p3)   ;;  %v1278_v14 = vmov (%p559_p3), 0  }
 0x54a   :  { %562 = sbr.rel (!%p559_p3) target bundleno = 1691 (0x69b), region = 53  ;;  %v573_v55 = vld [vmem:[#allocation11] sm:$0xff] (%p559_p3)  ;;  %v574_v60 = vld [vmem:[#allocation11 + $0x8] sm:$0xff] (%p559_p3)  ;;  %1083 = vmatprep.subr.bf16.mxu0 (%p559_p3), %v1276_v61  ;;  %1087 = vmatprep.mubr.msk.bf16.mxu0 (%p559_p3), %vm1277_vm6, %v1276_v61  ;;  %v1155_v7 = vld [vmem:[#allocation13] sm:$0xff] (%p559_p3)   ;;  %v598_v16 = vstv (%p559_p3), %s1568_s4 }
 0x54b   :  { %v1031_v56 = vld [vmem:[%s1566_s2 + $0x2] ss:$0 sm:$0xff] (%p559_p3)  ;;  %v575_v58 = vadd.f32 (%p559_p3), %v573_v55, %v571_v54  ;;  %v1467_v62 = vshrl.u32 (%p559_p3), %v585_v57, 7  ;;  %v576_v63 = vadd.f32 (%p559_p3), %v574_v60, %v572_v59  ;;  %1084 = vmatpush3.bf16.msra.mxu0 (%p559_p3), %v1154_v3  ;;  %1152 = vset.pattern.permute.xlu1 (%p559_p3), %v1278_v14  ;;  %v564_v27 = vld [vmem:[#allocation4 + $0x8] sm:$0xff] (%p559_p3)  ;;  %v565_v53 = vld [vmem:[#allocation5] sm:$0xff] (%p559_p3) }
 0x54c   :  { %1085 = vmatprep.subr.bf16.mxu0 (%p559_p3), %v1276_v61  ;;  %1153 = vset.pattern.permute.xlu0 (%p559_p3), %v1278_v14  ;;  %v563_v26 = vld [vmem:[#allocation4] sm:$0xff] (%p559_p3)  ;;  %vm614_vm8 = vcmp.lt.f32.partialorder (%p559_p3), %v564_v27, 1.0  ;;  %v568_v43 = vld [vmem:[#allocation6 + $0x8] sm:$0xff] (%p559_p3)  ;;  %v566_v59 = vld [vmem:[#allocation5 + $0x8] sm:$0xff] (%p559_p3) }
 0x54d   :  { %v582_v4 = vadd.f32 (%p559_p3), %v1031_v56, %v575_v58  ;;  %v587_v5 = vsub.s32 (%p559_p3), 0, %v1467_v62  ;;  %v583_v6 = vadd.f32 (%p559_p3), %v1031_v56, %v576_v63  ;;  %vm613_vm7 = vcmp.lt.f32.partialorder (%p559_p3), %v563_v26, 1.0  ;;  %v567_v37 = vld [vmem:[#allocation6] sm:$0xff] (%p559_p3)  ;;  %v569_v14 = vld [vmem:[#allocation3] sm:$0xff] (%p559_p3) }
 0x54e   :  { %v1034_v28 = vsel (%p559_p3), %vm613_vm7, 1.0, %v1276_v61  ;;  %v1035_v32 = vsel (%p559_p3), %vm614_vm8, 1.0, %v1276_v61 }
 0x54f   :  { %v588_v8 = vrot.slane %v1367_v1, %v587_v5  ;;  %v659_v9 = vpack.c.bf16 %v583_v6, %v582_v4  ;;  %1086 = vmatpush3.bf16.msra.mxu0 %v1155_v7  ;;  %v668_v60 = vrot.slane %v1372_v2, %v587_v5 }
 0x551   :  { %v590_v10 = vmul.f32 %v588_v8, %v582_v4  ;;  %v591_v11 = vmul.f32 %v588_v8, %v583_v6 }
 0x552   :  { %1088 = vmatmul.mubr.msk.bf16.vlgmr.msra.gmra.mxu0 %vm91_vm1, %v659_v9 }
 0x553   :  { %v592_v12 = vsel %vm91_vm1, %v590_v10, 0.0  ;;  %v595_v13 = vsel %vm91_vm1, %v591_v11, 0.0 }
 0x554   :  { %593 = vadd.xlane.f32.xlu0 %v592_v12 }
 0x558   :  { %596 = vadd.xlane.f32.xlu0 %v595_v13 }
 0x5dd   :  { %v594_v17 = vpop.xlane.xlu0 %593 }
 0x5de   :  { %v599_v18 = vadd.f32 %v598_v16, %v594_v17 }
 0x5e0   :  { %v1032_v20 = vmul.f32 -1.442695, %v599_v18  ;;  %v570_v18 = vld [vmem:[#allocation3 + $0x8] sm:$0xff] }
 0x5e1   :  { %v597_v21 = vpop.xlane.xlu0 %596 }
 0x5e2   :  { %1156 = vpow2.f32 %v1032_v20  ;;  %v600_v22 = vadd.f32 %v598_v16, %v597_v21 }
 0x5e4   :  { %v1033_v23 = vmul.f32 -1.442695, %v600_v22 }
 0x5e6   :  { %1158 = vpow2.f32 %v1033_v23 }
 0x5ef   :  { %v1157_v24 = vpop.eup %1156 }
 0x5f0   :  { %v607_v15 = vadd.f32 1.0, %v1157_v24 }
 0x5f2   :  { %1160 = vrcp.f32 %v607_v15 }
 0x5f3   :  { %v1159_v19 = vpop.eup %1158 }
 0x5f4   :  { %v608_v25 = vadd.f32 1.0, %v1159_v19 }
 0x5f6   :  { %1162 = vrcp.f32 %v608_v25 }
 0x5ff   :  { %v1161_v30 = vpop.eup %1160 }
 0x600   :  { %v619_v31 = vmul.f32 %v1161_v30, %v1034_v28 }
 0x602   :  { %v621_v34 = vadd.f32 %v619_v31, %v563_v26 }
 0x603   :  { %v1163_v35 = vpop.eup %1162 }
 0x604   :  { %vm623_vm9 = vcmp.gt.f32.partialorder %v621_v34, 0.9  ;;  %vm631_vm10 = vcmp.le.f32.partialorder %v621_v34, 0.9  ;;  %v620_v36 = vmul.f32 %v1163_v35, %v1035_v32 }
 0x605   :  { %v1036_v38 = vsel %vm623_vm9, 1.0, %v1276_v61  ;;  %v1038_v29 = vsel %vm631_vm10, 1.0, %v1276_v61 }
 0x606   :  { %v637_v33 = vmul.f32 %v1038_v29, %v1034_v28  ;;  %v622_v39 = vadd.f32 %v620_v36, %v564_v27  ;;  %v629_v40 = vmul.f32 %v1036_v38, %v1034_v28 }
 0x608   :  { %v639_v41 = vmul.f32 %v1161_v30, %v637_v33  ;;  %v653_v42 = vadd.f32 %v637_v33, %v567_v37  ;;  %vm624_vm11 = vcmp.gt.f32.partialorder %v622_v39, 0.9  ;;  %vm632_vm12 = vcmp.le.f32.partialorder %v622_v39, 0.9 }
 0x609   :  { %v1037_v44 = vsel %vm624_vm11, 1.0, %v1276_v61  ;;  %v1039_v45 = vsel %vm632_vm12, 1.0, %v1276_v61 }
 0x60a   :  { %v641_v46 = vadd.f32 %v639_v41, %v563_v26  ;;  %v655_v47 = vadd.f32 %v653_v42, %v629_v40  ;;  %v638_v48 = vmul.f32 %v1039_v45, %v1035_v32  ;;  %v630_v50 = vmul.f32 %v1037_v44, %v1035_v32 }
 0x60c   :  { %v643_v49 = vsub.f32 1.0, %v641_v46  ;;  %750 = vst.msk [vmem:[#allocation6] sm:$0xff] %vm84_vm0, %v655_v47  ;;  %v640_v51 = vmul.f32 %v1163_v35, %v638_v48  ;;  %v654_v52 = vadd.f32 %v638_v48, %v568_v43 }
 0x60e   :  { %v645_v54 = vmul.f32 %v643_v49, %v629_v40  ;;  %v642_v55 = vadd.f32 %v640_v51, %v564_v27  ;;  %v656_v56 = vadd.f32 %v654_v52, %v630_v50 }
 0x610   :  { %v647_v57 = vadd.f32 %v645_v54, %v565_v53  ;;  %v644_v58 = vsub.f32 1.0, %v642_v55  ;;  %751 = vst.msk [vmem:[#allocation6 + $0x8] sm:$0xff] %vm84_vm0, %v656_v56 }
 0x612   :  { %v649_v61 = vmul.f32 %v647_v57, %v629_v40  ;;  %748 = vst.msk [vmem:[#allocation5] sm:$0xff] %vm84_vm0, %v647_v57  ;;  %v646_v63 = vmul.f32 %v644_v58, %v630_v50  ;;  %v719_v7 = vpop.f32.mrf.mxu0 }
 0x613   :  { %v720_v8 = vadd.f32 %v719_v7, %v668_v60 }
 0x614   :  { %v657_v3 = vadd.f32 %v649_v61, %v639_v41  ;;  %v651_v4 = vadd.f32 %v649_v61, %v641_v46  ;;  %v648_v6 = vadd.f32 %v646_v63, %v566_v59  ;;  %v1089_v10 = vpop.f32.mrf.mxu0 }
 0x615   :  { %742 = vst.msk [vmem:[#allocation2] sm:$0xff] %vm91_vm1, %v720_v8  ;;  %v726_v16 = vsub.f32 %v720_v8, %v569_v14 }
 0x616   :  { %730 = vperm.xlu1 %1152, %v657_v3   ;;  %746 = vst.msk [vmem:[#allocation4] sm:$0xff] %vm84_vm0, %v651_v4  ;;  %v650_v9 = vmul.f32 %v648_v6, %v630_v50  ;;  %749 = vst.msk [vmem:[#allocation5 + $0x8] sm:$0xff] %vm84_vm0, %v648_v6  ;;  %v722_v11 = vpop.f32.mrf.mxu0 }
 0x617   :  { %v723_v12 = vadd.f32 %v722_v11, %v668_v60 }
 0x618   :  { %v652_v62 = vadd.f32 %v650_v9, %v642_v55  ;;  %v658_v5 = vadd.f32 %v650_v9, %v640_v51  ;;  %v1090_v13 = vpop.f32.mrf.mxu0 }
 0x619   :  { %743 = vst.msk [vmem:[#allocation2 + $0x8] sm:$0xff] %vm91_vm1, %v723_v12  ;;  %v727_v22 = vsub.f32 %v723_v12, %v570_v18 }
 0x61a   :  { %747 = vst.msk [vmem:[#allocation4 + $0x8] sm:$0xff] %vm84_vm0, %v652_v62  ;;  %735 = vperm.xlu1 %1152, %v658_v5  }
 0x691   :  { %v731_v17 = vpop.permute.xlu1 %730 }
 0x692   :  { %v738_v20 = vmul.f32 %v731_v17, %v726_v16 }
 0x694   :  { %v740_v21 = vadd.f32 %v738_v20, %v569_v14 }
 0x695   :  { %v736_v23 = vpop.permute.xlu1 %735 }
 0x696   :  { %744 = vst.msk [vmem:[#allocation3] sm:$0xff] %vm91_vm1, %v740_v21  ;;  %v739_v24 = vmul.f32 %v736_v23, %v727_v22 }
 0x698   :  { %v741_v15 = vadd.f32 %v739_v24, %v570_v18 }
 0x69a   :  { %745 = vst.msk [vmem:[#allocation3 + $0x8] sm:$0xff] %vm91_vm1, %v741_v15 }
 0x69b PF:  { %v752_v19 = vld [vmem:[#allocation4] sm:$0xff]  ;;  %v753_v25 = vld [vmem:[#allocation4 + $0x8] sm:$0xff] }
 0x69c   :  { %v756_v26 = vld [vmem:[#allocation6] sm:$0xff]  ;;  %vm754_vm13 = vcmp.lt.f32.partialorder %v752_v19, 0.9  ;;  %vm755_vm14 = vcmp.lt.f32.partialorder %v753_v25, 0.9  ;;  %v757_v27 = vld [vmem:[#allocation6 + $0x8] sm:$0xff] }
 0x69d   :  { %vm758_vm15 = vcmp.lt.f32.partialorder %v756_v26, 4.0  ;;  %vm759_vm2 = vcmp.lt.f32.partialorder %v757_v27, 4.0 }
 0x69e   :  { %vm760_vm3 = vmand %vm754_vm13, %vm758_vm15 }
 0x69f   :  { %vm761_vm4 = vmand %vm755_vm14, %vm759_vm2  ;;  %v762_v28 = vsel %vm760_vm3, 1.0, %v1269_v0 }
 0x6a0   :  { %v763_v30 = vsel %vm761_vm4, 1.0, %v1269_v0  ;;  %v764_v31 = vsel %vm84_vm0, %v762_v28, -inf }
 0x6a1   :  { %v765_v32 = vsel %vm84_vm0, %v763_v30, -inf }
 0x6a2   :  { %v766_v34 = vmax.f32 %v764_v31, %v765_v32 }
 0x6a4   :  { %767 = vmax.xlane.f32.xlu0 %v766_v34 }
 0x72d   :  { %v768_v35 = vpop.xlane.xlu0 %767 }
 0x72e   :  { %v769_v36 = vrot.slane %v768_v35, 4 }
 0x730   :  { %v770_v37 = vmax.f32 %v768_v35, %v769_v36 }
 0x732   :  { %v771_v38 = vrot.slane %v770_v37, 2 }
 0x734   :  { %v772_v29 = vmax.f32 %v770_v37, %v771_v38 }
 0x736   :  { %v773_v33 = vrot.slane %v772_v29, 1 }
 0x738   :  { %v774_v39 = vmax.f32 %v772_v29, %v773_v33 }
 0x73a   :  { %1105 = vpush %v774_v39 }
 0x76b   :  { %s1106_s23 = spop %1105 }
 0x76c   :  { %p776_p4 = scmp.gt.f32.partialorder %s1106_s23, 0.0 }
 0x76d   :  { %v788_v40 = vld [vmem:[#allocation2] sm:$0xff] (%p776_p4)  ;;  %v802_v42 = vlaneseq (%p776_p4)  ;;  %v789_v44 = vld [vmem:[#allocation2 + $0x8] sm:$0xff] (%p776_p4)  ;;  %v1279_v46 = vmov (%p776_p4), 0.0   ;;  %vm1280_vm5 = vmmov (%p776_p4), 0   ;;  %v1166_v49 = vld [vmem:[#allocation13 + $0x8] sm:$0xff] (%p776_p4)   ;;  %v1281_v60 = vmov (%p776_p4), 0  }
 0x76e   :  { %779 = sbr.rel (!%p776_p4) target bundleno = 2239 (0x8bf), region = 57  ;;  %v790_v41 = vld [vmem:[#allocation11] sm:$0xff] (%p776_p4)  ;;  %v791_v45 = vld [vmem:[#allocation11 + $0x8] sm:$0xff] (%p776_p4)  ;;  %1091 = vmatprep.subr.bf16.mxu0 (%p776_p4), %v1279_v46  ;;  %1095 = vmatprep.mubr.msk.bf16.mxu0 (%p776_p4), %vm1280_vm5, %v1279_v46  ;;  %v1167_v53 = vld [vmem:[#allocation13] sm:$0xff] (%p776_p4)   ;;  %v815_v61 = vstv (%p776_p4), %s1568_s4 }
 0x76f   :  { %v1043_v0 = vld [vmem:[%s1566_s2 + $0x3] ss:$0 sm:$0xff] (%p776_p4)  ;;  %v792_v43 = vadd.f32 (%p776_p4), %v790_v41, %v788_v40  ;;  %v1508_v47 = vshrl.u32 (%p776_p4), %v802_v42, 7  ;;  %v793_v48 = vadd.f32 (%p776_p4), %v791_v45, %v789_v44  ;;  %1092 = vmatpush3.bf16.msra.mxu0 (%p776_p4), %v1166_v49  ;;  %1164 = vset.pattern.permute.xlu1 (%p776_p4), %v1281_v60  ;;  %v781_v11 = vld [vmem:[#allocation4 + $0x8] sm:$0xff] (%p776_p4)  ;;  %v782_v29 = vld [vmem:[#allocation5] sm:$0xff] (%p776_p4) }
 0x770   :  { %1093 = vmatprep.subr.bf16.mxu0 (%p776_p4), %v1279_v46  ;;  %1165 = vset.pattern.permute.xlu0 (%p776_p4), %v1281_v60  ;;  %v780_v5 = vld [vmem:[#allocation4] sm:$0xff] (%p776_p4)  ;;  %vm831_vm7 = vcmp.lt.f32.partialorder (%p776_p4), %v781_v11, 1.0  ;;  %v785_v27 = vld [vmem:[#allocation6 + $0x8] sm:$0xff] (%p776_p4)  ;;  %v783_v42 = vld [vmem:[#allocation5 + $0x8] sm:$0xff] (%p776_p4) }
 0x771   :  { %v799_v50 = vadd.f32 (%p776_p4), %v1043_v0, %v792_v43  ;;  %v804_v51 = vsub.s32 (%p776_p4), 0, %v1508_v47  ;;  %v800_v52 = vadd.f32 (%p776_p4), %v1043_v0, %v793_v48  ;;  %vm830_vm6 = vcmp.lt.f32.partialorder (%p776_p4), %v780_v5, 1.0  ;;  %v784_v21 = vld [vmem:[#allocation6] sm:$0xff] (%p776_p4)  ;;  %v787_v60 = vld [vmem:[#allocation3 + $0x8] sm:$0xff] (%p776_p4) }
 0x772   :  { %v1046_v12 = vsel (%p776_p4), %vm830_vm6, 1.0, %v1279_v46  ;;  %v1047_v16 = vsel (%p776_p4), %vm831_vm7, 1.0, %v1279_v46 }
 0x773   :  { %v805_v54 = vrot.slane %v1367_v1, %v804_v51  ;;  %v876_v55 = vpack.c.bf16 %v800_v52, %v799_v50  ;;  %1094 = vmatpush3.bf16.msra.mxu0 %v1167_v53  ;;  %v885_v43 = vrot.slane %v1372_v2, %v804_v51 }
 0x775   :  { %v807_v56 = vmul.f32 %v805_v54, %v799_v50  ;;  %v808_v57 = vmul.f32 %v805_v54, %v800_v52 }
 0x776   :  { %1096 = vmatmul.mubr.msk.bf16.vlgmr.msra.gmra.mxu0 %vm91_vm1, %v876_v55 }
 0x777   :  { %v809_v58 = vsel %vm91_vm1, %v807_v56, 0.0  ;;  %v812_v59 = vsel %vm91_vm1, %v808_v57, 0.0  ;;  %v786_v57 = vld [vmem:[#allocation3] sm:$0xff] }
 0x778   :  { %810 = vadd.xlane.f32.xlu0 %v809_v58 }
 0x77c   :  { %813 = vadd.xlane.f32.xlu0 %v812_v59 }
 0x801   :  { %v811_v1 = vpop.xlane.xlu0 %810 }
 0x802   :  { %v816_v63 = vadd.f32 %v815_v61, %v811_v1 }
 0x804   :  { %v1044_v3 = vmul.f32 -1.442695, %v816_v63 }
 0x805   :  { %v814_v4 = vpop.xlane.xlu0 %813 }
 0x806   :  { %1168 = vpow2.f32 %v1044_v3  ;;  %v817_v6 = vadd.f32 %v815_v61, %v814_v4 }
 0x808   :  { %v1045_v7 = vmul.f32 -1.442695, %v817_v6 }
 0x80a   :  { %1170 = vpow2.f32 %v1045_v7 }
 0x813   :  { %v1169_v8 = vpop.eup %1168 }
 0x814   :  { %v824_v9 = vadd.f32 1.0, %v1169_v8 }
 0x816   :  { %1172 = vrcp.f32 %v824_v9 }
 0x817   :  { %v1171_v10 = vpop.eup %1170 }
 0x818   :  { %v825_v62 = vadd.f32 1.0, %v1171_v10 }
 0x81a   :  { %1174 = vrcp.f32 %v825_v62 }
 0x823   :  { %v1173_v13 = vpop.eup %1172 }
 0x824   :  { %v836_v14 = vmul.f32 %v1173_v13, %v1046_v12 }
 0x826   :  { %v838_v17 = vadd.f32 %v836_v14, %v780_v5 }
 0x827   :  { %v1175_v18 = vpop.eup %1174 }
 0x828   :  { %vm840_vm8 = vcmp.gt.f32.partialorder %v838_v17, 0.9  ;;  %vm848_vm9 = vcmp.le.f32.partialorder %v838_v17, 0.9  ;;  %v837_v20 = vmul.f32 %v1175_v18, %v1047_v16 }
 0x829   :  { %v1048_v22 = vsel %vm840_vm8, 1.0, %v1279_v46  ;;  %v1050_v23 = vsel %vm848_vm9, 1.0, %v1279_v46 }
 0x82a   :  { %v854_v24 = vmul.f32 %v1050_v23, %v1046_v12  ;;  %v839_v15 = vadd.f32 %v837_v20, %v781_v11  ;;  %v846_v19 = vmul.f32 %v1048_v22, %v1046_v12 }
 0x82c   :  { %v856_v25 = vmul.f32 %v1173_v13, %v854_v24  ;;  %v870_v26 = vadd.f32 %v854_v24, %v784_v21  ;;  %vm841_vm10 = vcmp.gt.f32.partialorder %v839_v15, 0.9  ;;  %vm849_vm11 = vcmp.le.f32.partialorder %v839_v15, 0.9 }
 0x82d   :  { %v1049_v28 = vsel %vm841_vm10, 1.0, %v1279_v46  ;;  %v1051_v30 = vsel %vm849_vm11, 1.0, %v1279_v46 }
 0x82e   :  { %v858_v31 = vadd.f32 %v856_v25, %v780_v5  ;;  %v872_v32 = vadd.f32 %v870_v26, %v846_v19  ;;  %v855_v34 = vmul.f32 %v1051_v30, %v1047_v16  ;;  %v847_v36 = vmul.f32 %v1049_v28, %v1047_v16 }
 0x830   :  { %v860_v35 = vsub.f32 1.0, %v858_v31  ;;  %967 = vst.msk [vmem:[#allocation6] sm:$0xff] %vm84_vm0, %v872_v32  ;;  %v857_v37 = vmul.f32 %v1175_v18, %v855_v34  ;;  %v871_v38 = vadd.f32 %v855_v34, %v785_v27 }
 0x832   :  { %v862_v33 = vmul.f32 %v860_v35, %v846_v19  ;;  %v859_v39 = vadd.f32 %v857_v37, %v781_v11  ;;  %v873_v40 = vadd.f32 %v871_v38, %v847_v36 }
 0x834   :  { %v864_v41 = vadd.f32 %v862_v33, %v782_v29  ;;  %v861_v0 = vsub.f32 1.0, %v859_v39  ;;  %968 = vst.msk [vmem:[#allocation6 + $0x8] sm:$0xff] %vm84_vm0, %v873_v40 }
 0x836   :  { %v866_v44 = vmul.f32 %v864_v41, %v846_v19  ;;  %965 = vst.msk [vmem:[#allocation5] sm:$0xff] %vm84_vm0, %v864_v41  ;;  %v863_v45 = vmul.f32 %v861_v0, %v847_v36  ;;  %v936_v50 = vpop.f32.mrf.mxu0 }
 0x837   :  { %v937_v52 = vadd.f32 %v936_v50, %v885_v43 }
 0x838   :  { %v874_v46 = vadd.f32 %v866_v44, %v856_v25  ;;  %v868_v48 = vadd.f32 %v866_v44, %v858_v31  ;;  %v865_v49 = vadd.f32 %v863_v45, %v783_v42  ;;  %v1097_v54 = vpop.f32.mrf.mxu0 }
 0x839   :  { %959 = vst.msk [vmem:[#allocation2] sm:$0xff] %vm91_vm1, %v937_v52  ;;  %v943_v58 = vsub.f32 %v937_v52, %v786_v57 }
 0x83a   :  { %947 = vperm.xlu1 %1164, %v874_v46   ;;  %963 = vst.msk [vmem:[#allocation4] sm:$0xff] %vm84_vm0, %v868_v48  ;;  %v867_v53 = vmul.f32 %v865_v49, %v847_v36  ;;  %966 = vst.msk [vmem:[#allocation5 + $0x8] sm:$0xff] %vm84_vm0, %v865_v49  ;;  %v939_v51 = vpop.f32.mrf.mxu0 }
 0x83b   :  { %v940_v55 = vadd.f32 %v939_v51, %v885_v43 }
 0x83c   :  { %v869_v47 = vadd.f32 %v867_v53, %v859_v39  ;;  %v875_v2 = vadd.f32 %v867_v53, %v857_v37  ;;  %v1098_v56 = vpop.f32.mrf.mxu0 }
 0x83d   :  { %960 = vst.msk [vmem:[#allocation2 + $0x8] sm:$0xff] %vm91_vm1, %v940_v55  ;;  %v944_v63 = vsub.f32 %v940_v55, %v787_v60 }
 0x83e   :  { %964 = vst.msk [vmem:[#allocation4 + $0x8] sm:$0xff] %vm84_vm0, %v869_v47  ;;  %952 = vperm.xlu1 %1164, %v875_v2  }
 0x8b5   :  { %v948_v59 = vpop.permute.xlu1 %947 }
 0x8b6   :  { %v955_v61 = vmul.f32 %v948_v59, %v943_v58 }
 0x8b8   :  { %v957_v1 = vadd.f32 %v955_v61, %v786_v57 }
 0x8b9   :  { %v953_v3 = vpop.permute.xlu1 %952 }
 0x8ba   :  { %961 = vst.msk [vmem:[#allocation3] sm:$0xff] %vm91_vm1, %v957_v1  ;;  %v956_v4 = vmul.f32 %v953_v3, %v944_v63 }
 0x8bc   :  { %v958_v6 = vadd.f32 %v956_v4, %v787_v60 }
 0x8be   :  { %962 = vst.msk [vmem:[#allocation3 + $0x8] sm:$0xff] %vm91_vm1, %v958_v6 }
 0x8bf PF:  { %v973_v9 = vld [vmem:[#allocation5] sm:$0xff]  ;;  %v974_v10 = vld [vmem:[#allocation5 + $0x8] sm:$0xff]  ;;  %v977_v62 = vld [vmem:[#allocation6] sm:$0xff]  ;;  %s1282_s0 = smov [#allocation14]  }
 0x8c0   :  { %975 = vst.msk [vmem:[%s1572_s8] sm:$0xff] %vm84_vm0, %v973_v9  ;;  %v978_v5 = vld [vmem:[#allocation6 + $0x8] sm:$0xff]  ;;  %s986_s5 = sshll.u32 %s1282_s0, 4  ;;  %976 = vst.msk [vmem:[%s1572_s8 + $0x8] sm:$0xff] %vm84_vm0, %v974_v10  ;;  %s987_s5 = int_to_ptr.vmem [resolvable:$true] %s986_s5 }
 0x8c1   :  { %v969_v7 = vld [vmem:[#allocation3] sm:$0xff]  ;;  %979 = vst.msk [vmem:[%s1573_s9] sm:$0xff] %vm84_vm0, %v977_v62  ;;  %980 = vst.msk [vmem:[%s1573_s9 + $0x8] sm:$0xff] %vm84_vm0, %v978_v5  ;;  %s1236_s10 = scalar_lea.vmem %s987_s5, 256  ;;  %p1241_p6 = scmp.lt.s32.totalorder %s987_s5, %s987_s5 }
 0x8c2   :  { %971 = vst.msk [vmem:[#allocation14] sm:$0xff] %vm91_vm1, %v969_v7  ;;  %p1237_p5 = scmp.ne.s32.totalorder %s987_s5, %s1236_s10  ;;  %p1242_p7 = scmp.lt.s32.totalorder %s1236_s10, %s1236_s10 }
 0x8c4   :  { %p1243_p8 = por %p1242_p7, %p1241_p6 }
 0x8c5   :  { %v970_v8 = vld [vmem:[#allocation3 + $0x8] sm:$0xff] }
 0x8c6   :  { %972 = vst.msk [vmem:[#allocation14 + $0x8] sm:$0xff] %vm91_vm1, %v970_v8  ;;  %p1244_p9 = pnand %p1243_p8, %p1237_p5 }
 0x8c8   :  { %1247 = shalt.err (!%p1244_p9)
}
 0x8c9   :  { %992 = dma.vmem_to_hbm [thread:$0]  %s987_s5, 256, %s1571_s7, [#allocation10], %s1264_s14, %s1264_s14, %s1265_s15  }
 0x8ca   :  { %1260 = dma.done.wait [#allocation10], 256  }
 0x8cb   :  { %1261 = vsyncadd [#allocation10], 4294967040 }
 0x8cc   :  { %1004 = vsyncpa [#allocation9], 1 }
 0x8cd   :  { %1005 = vsyncpa [#allocation12], 1 }
 0x8ce   :  { %1006 = vsyncpa [#allocation10], 1 }

// kernel: tpu_custom_call.1
= control target key start
LH: loop header
LB: loop body
LE: loop exit
PB: predicated region body
PF: predicated region fallthrough
CT: control target
= control target key end

     0   :  { %16 = vsyncpa [#allocation9], 0  ;;  %s1830_s0 = inlined_call_operand.hbm [shape: f32[16,32], index: 0, kind: input, shape index: {}]   ;;  %s1831_s1 = inlined_call_operand.hbm [shape: f32[16,32], index: 1, kind: input, shape index: {}]   ;;  %s1832_s2 = inlined_call_operand.vmem [shape: f32[4,32], index: 2, kind: input, shape index: {}]   ;;  %s1833_s3 = inlined_call_operand.vmem [shape: f32[1,32], index: 3, kind: input, shape index: {}]   ;;  %s1834_s4 = inlined_call_operand.<no memory space> [shape: f32[1,1], index: 4, kind: input, shape index: {}]   ;;  %s1835_s5 = inlined_call_operand.hbm [shape: bf16[32,32], index: 5, kind: input, shape index: {}]   ;;  %s1836_s6 = inlined_call_operand.vmem [shape: f32[1,32], index: 6, kind: input, shape index: {}]   ;;  %s1837_s7 = inlined_call_operand.hbm [shape: f32[16,32], index: 7, kind: output, shape index: {0}]   ;;  %s1838_s8 = inlined_call_operand.vmem [shape: f32[16,1], index: 8, kind: output, shape index: {1}]   ;;  %s1839_s9 = inlined_call_operand.vmem [shape: f32[16,1], index: 9, kind: output, shape index: {2}]  }
   0x1   :  { %17 = vsyncpa [#allocation12], 0 }
   0x2   :  { %18 = vsyncpa [#allocation10], 0  ;;  %s1265_s30 = smov [#allocation11]   ;;  %s1266_s11 = smov [#allocation8]  }
   0x3   :  { %s36_s10 = sshll.u32 %s1265_s30, 4  ;;  %s24_s12 = sshll.u32 %s1266_s11, 4  ;;  %s37_s10 = int_to_ptr.vmem [resolvable:$true] %s36_s10  ;;  %s25_s12 = int_to_ptr.vmem [resolvable:$true] %s24_s12 }
   0x4   :  { %s1187_s13 = scalar_lea.vmem %s37_s10, 256  ;;  %p1192_p1 = scmp.lt.s32.totalorder %s37_s10, %s37_s10 }
   0x5   :  { %p1188_p0 = scmp.ne.s32.totalorder %s37_s10, %s1187_s13  ;;  %p1193_p2 = scmp.lt.s32.totalorder %s1187_s13, %s1187_s13 }
   0x7   :  { %p1194_p3 = por %p1193_p2, %p1192_p1 }
   0x9   :  { %p1195_p4 = pnand %p1194_p3, %p1188_p0 }
   0xb   :  { %1198 = shalt.err (!%p1195_p4)
}
   0xc   :  { %s1267_s14 = smov 128   ;;  %s1268_s15 = smov 8  }
   0xd   :  { %42 = dma.hbm_to_vmem [thread:$0]  %s1831_s1, 256, %s37_s10, [#allocation12], %s1267_s14, %s1267_s14, %s1268_s15  }
   0xe   :  { %s1207_s18 = scalar_lea.vmem %s25_s12, 256  ;;  %p1212_p6 = scmp.lt.s32.totalorder %s25_s12, %s25_s12 }
   0xf   :  { %p1208_p5 = scmp.ne.s32.totalorder %s25_s12, %s1207_s18  ;;  %p1213_p7 = scmp.lt.s32.totalorder %s1207_s18, %s1207_s18 }
  0x11   :  { %p1214_p8 = por %p1213_p7, %p1212_p6 }
  0x13   :  { %p1215_p9 = pnand %p1214_p8, %p1208_p5 }
  0x15   :  { %1218 = shalt.err (!%p1215_p9)
}
  0x16   :  { %30 = dma.hbm_to_vmem [thread:$0]  %s1830_s0, 256, %s25_s12, [#allocation9], %s1267_s14, %s1267_s14, %s1268_s15  }
  0x17   :  { %s1269_s21 = smov [#allocation13]  }
  0x18   :  { %s54_s22 = sshll.u32 %s1269_s21, 4  ;;  %s55_s22 = int_to_ptr.vmem [resolvable:$true] %s54_s22 }
  0x19   :  { %s1227_s23 = scalar_lea.vmem %s55_s22, 256  ;;  %p1232_p11 = scmp.lt.s32.totalorder %s55_s22, %s55_s22 }
  0x1a   :  { %p1228_p10 = scmp.ne.s32.totalorder %s55_s22, %s1227_s23  ;;  %p1233_p12 = scmp.lt.s32.totalorder %s1227_s23, %s1227_s23 }
  0x1c   :  { %p1234_p13 = por %p1233_p12, %p1232_p11 }
  0x1e   :  { %p1235_p0 = pnand %p1234_p13, %p1228_p10 }
  0x20   :  { %1238 = shalt.err (!%p1235_p0)
}
  0x21   :  { %s1270_s1 = smov 64   ;;  %s1271_s24 = smov 4  }
  0x22   :  { %60 = dma.hbm_to_vmem [thread:$0]  %s1835_s5, 256, %s55_s22, [#allocation12], %s1270_s1, %s1270_s1, %s1271_s24  }
  0x23   :  { %1259 = dma.done.wait [#allocation9], 256  }
  0x24   :  { %1260 = vsyncadd [#allocation9], 4294967040 }
  0x25   :  { %1261 = dma.done.wait [#allocation12], 512  }
  0x26   :  { %1262 = vsyncadd [#allocation12], 4294966784  ;;  %vm84_vm0 = vcmask 7168   ;;  %vm91_vm1 = vcmask 261120   ;;  %v1272_v0 = vmov 0.0   ;;  %vm1273_vm2 = vmmov 0  }
  0x27   :  { %1086 = vmatprep.subr.bf16.mxu0 %v1272_v0  ;;  %85 = vst.msk [vmem:[#allocation4] sm:$0xff] %vm84_vm0, %v1272_v0  ;;  %86 = vst.msk [vmem:[#allocation4 + $0x8] sm:$0xff] %vm84_vm0, %v1272_v0  ;;  %1090 = vmatprep.mubr.msk.bf16.mxu0 %vm1273_vm2, %v1272_v0  ;;  %v1139_v1 = vld [vmem:[#allocation13 + $0x8] sm:$0xff]   ;;  %v1140_v6 = vld [vmem:[#allocation13] sm:$0xff]   ;;  %v1415_v36 = vstv %s1834_s4 }
  0x28   :  { %89 = vst.msk [vmem:[#allocation6] sm:$0xff] %vm84_vm0, %v1272_v0  ;;  %90 = vst.msk [vmem:[#allocation6 + $0x8] sm:$0xff] %vm84_vm0, %v1272_v0  ;;  %1094 = vmatprep.subr.bf16.mxu1 %v1272_v0  ;;  %1098 = vmatprep.mubr.msk.bf16.mxu1 %vm1273_vm2, %v1272_v0  ;;  %v94_v8 = vld [vmem:[#allocation8] sm:$0xff]  ;;  %v95_v11 = vld [vmem:[#allocation8 + $0x8] sm:$0xff] }
  0x29   :  { %87 = vst.msk [vmem:[#allocation5] sm:$0xff] %vm84_vm0, %v1272_v0  ;;  %88 = vst.msk [vmem:[#allocation5 + $0x8] sm:$0xff] %vm84_vm0, %v1272_v0  ;;  %1087 = vmatpush3.bf16.msra.mxu0 %v1139_v1  ;;  %v1383_v14 = vld [vmem:[#allocation11] sm:$0xff]  ;;  %v1385_v15 = vld [vmem:[#allocation11 + $0x8] sm:$0xff] }
  0x2a   :  { %92 = vst.msk [vmem:[#allocation3] sm:$0xff] %vm91_vm1, %v1272_v0  ;;  %93 = vst.msk [vmem:[#allocation3 + $0x8] sm:$0xff] %vm91_vm1, %v1272_v0  ;;  %1088 = vmatprep.subr.bf16.mxu0 %v1272_v0  ;;  %v1024_v17 = vld [vmem:[%s1832_s2] ss:$0 sm:$0xff]  ;;  %v1141_v29 = vld [vmem:[#allocation13 + $0x8] sm:$0xff]  }
  0x2b   :  { %96 = vst.msk [vmem:[#allocation2] sm:$0xff] %vm91_vm1, %v94_v8  ;;  %97 = vst.msk [vmem:[#allocation2 + $0x8] sm:$0xff] %vm91_vm1, %v95_v11  ;;  %v1401_v21 = vld [vmem:[%s1833_s3] ss:$0 sm:$0xff]  ;;  %1095 = vmatpush3.bf16.msra.mxu1 %v1141_v29  ;;  %v1142_v30 = vld [vmem:[#allocation13] sm:$0xff]  }
  0x2c   :  { %1096 = vmatprep.subr.bf16.mxu1 %v1272_v0 }
  0x2d   :  { %1089 = vmatpush3.bf16.msra.mxu0 %v1140_v6 }
  0x2e   :  { %v1363_v2 = vld [vmem:[#allocation4] sm:$0xff]  ;;  %v1365_v3 = vld [vmem:[#allocation4 + $0x8] sm:$0xff]  ;;  %1102 = vmatprep.subr.bf16.mxu0 %v1272_v0 }
  0x2f   :  { %v1367_v4 = vld [vmem:[#allocation6] sm:$0xff]  ;;  %vm103_vm3 = vcmp.lt.f32.partialorder %v1363_v2, 0.9  ;;  %vm104_vm4 = vcmp.lt.f32.partialorder %v1365_v3, 0.9  ;;  %v1371_v5 = vld [vmem:[#allocation6 + $0x8] sm:$0xff]  ;;  %1097 = vmatpush3.bf16.msra.mxu1 %v1142_v30 }
  0x30   :  { %vm107_vm5 = vcmp.lt.f32.partialorder %v1367_v4, 4.0  ;;  %vm108_vm6 = vcmp.lt.f32.partialorder %v1371_v5, 4.0  ;;  %1110 = vmatprep.subr.bf16.mxu1 %v1272_v0  ;;  %vm172_vm9 = vcmp.lt.f32.partialorder %v1363_v2, 1.0  ;;  %vm173_vm10 = vcmp.lt.f32.partialorder %v1365_v3, 1.0 }
  0x31   :  { %vm109_vm7 = vmand %vm103_vm3, %vm107_vm5  ;;  %v1028_v49 = vsel %vm172_vm9, 1.0, %v1272_v0  ;;  %v1029_v50 = vsel %vm173_vm10, 1.0, %v1272_v0 }
  0x32   :  { %vm110_vm8 = vmand %vm104_vm4, %vm108_vm6  ;;  %v111_v7 = vsel %vm109_vm7, 1.0, %v1272_v0  ;;  %v1387_v16 = vld [vmem:[#allocation2] sm:$0xff]  ;;  %v1392_v18 = vld [vmem:[#allocation2 + $0x8] sm:$0xff] }
  0x33   :  { %v112_v9 = vsel %vm110_vm8, 1.0, %v1272_v0  ;;  %v113_v10 = vsel %vm84_vm0, %v111_v7, -inf  ;;  %v134_v19 = vadd.f32 %v1383_v14, %v1387_v16  ;;  %v135_v20 = vadd.f32 %v1385_v15, %v1392_v18 }
  0x34   :  { %v114_v12 = vsel %vm84_vm0, %v112_v9, -inf }
  0x35   :  { %v115_v13 = vmax.f32 %v113_v10, %v114_v12  ;;  %v141_v22 = vadd.f32 %v1024_v17, %v134_v19  ;;  %v142_v23 = vadd.f32 %v1024_v17, %v135_v20  ;;  %v126_v12 = vld [vmem:[#allocation5] sm:$0xff] }
  0x37   :  { %116 = vmax.xlane.f32.xlu0 %v115_v13  ;;  %v149_v24 = vmul.f32 %v1401_v21, %v141_v22  ;;  %v218_v25 = vpack.c.bf16 %v142_v23, %v141_v22  ;;  %v150_v26 = vmul.f32 %v1401_v21, %v142_v23  ;;  %v127_v13 = vld [vmem:[#allocation5 + $0x8] sm:$0xff] }
  0x39   :  { %v151_v27 = vsel %vm91_vm1, %v149_v24, 0.0  ;;  %1091 = vmatmul.mubr.msk.bf16.vlgmr.msra.gmra.mxu0 %vm91_vm1, %v218_v25  ;;  %v154_v28 = vsel %vm91_vm1, %v150_v26, 0.0  ;;  %v1436_v26 = vld [vmem:[%s1836_s6] ss:$0 sm:$0xff] }
  0x3a   :  { %155 = vadd.xlane.f32.xlu1 %v154_v28  ;;  %1106 = vmatprep.mubr.msk.bf16.mxu0 %vm1273_vm2, %v1272_v0 }
  0x3b   :  { %152 = vadd.xlane.f32.xlu0 %v151_v27 }
  0xc0   :  { %v117_v31 = vpop.xlane.xlu0 %116 }
  0xc1   :  { %v118_v32 = vrot.slane %v117_v31, 4 }
  0xc3   :  { %v119_v33 = vmax.f32 %v117_v31, %v118_v32  ;;  %v156_v40 = vpop.xlane.xlu1 %155 }
  0xc4   :  { %v153_v38 = vpop.xlane.xlu0 %152  ;;  %v159_v42 = vadd.f32 %v1415_v36, %v156_v40 }
  0xc5   :  { %v120_v34 = vrot.slane %v119_v33, 2  ;;  %v158_v41 = vadd.f32 %v1415_v36, %v153_v38 }
  0xc6   :  { %v1027_v44 = vmul.f32 -1.442695, %v159_v42 }
  0xc7   :  { %v121_v35 = vmax.f32 %v119_v33, %v120_v34  ;;  %v1026_v43 = vmul.f32 -1.442695, %v158_v41 }
  0xc9   :  { %v122_v37 = vrot.slane %v121_v35, 1  ;;  %1147 = vpow2.f32 %v1026_v43 }
  0xca   :  { %1149 = vpow2.f32 %v1027_v44 }
  0xcb   :  { %v123_v39 = vmax.f32 %v121_v35, %v122_v37 }
  0xcd   :  { %1118 = vpush %v123_v39 }
  0xd6   :  { %v1148_v45 = vpop.eup %1147 }
  0xd7   :  { %v1150_v46 = vpop.eup %1149  ;;  %v166_v47 = vadd.f32 1.0, %v1148_v45 }
  0xd8   :  { %v167_v48 = vadd.f32 1.0, %v1150_v46 }
  0xd9   :  { %1151 = vrcp.f32 %v166_v47 }
  0xda   :  { %1153 = vrcp.f32 %v167_v48 }
  0xe6   :  { %v1152_v51 = vpop.eup %1151 }
  0xe7   :  { %v1154_v52 = vpop.eup %1153  ;;  %v178_v53 = vmul.f32 %v1152_v51, %v1028_v49 }
  0xe8   :  { %v179_v54 = vmul.f32 %v1154_v52, %v1029_v50 }
  0xe9   :  { %v180_v55 = vadd.f32 %v178_v53, %v1363_v2 }
  0xea   :  { %v181_v56 = vadd.f32 %v179_v54, %v1365_v3 }
  0xeb   :  { %vm190_vm11 = vcmp.le.f32.partialorder %v180_v55, 0.9  ;;  %vm182_vm13 = vcmp.gt.f32.partialorder %v180_v55, 0.9 }
  0xec   :  { %vm191_vm12 = vcmp.le.f32.partialorder %v181_v56, 0.9  ;;  %v1032_v57 = vsel %vm190_vm11, 1.0, %v1272_v0  ;;  %vm183_vm14 = vcmp.gt.f32.partialorder %v181_v56, 0.9  ;;  %v1030_v63 = vsel %vm182_vm13, 1.0, %v1272_v0 }
  0xed   :  { %v1033_v58 = vsel %vm191_vm12, 1.0, %v1272_v0  ;;  %v196_v59 = vmul.f32 %v1032_v57, %v1028_v49  ;;  %v1031_v1 = vsel %vm183_vm14, 1.0, %v1272_v0  ;;  %v188_v8 = vmul.f32 %v1030_v63, %v1028_v49 }
  0xee   :  { %v197_v60 = vmul.f32 %v1033_v58, %v1029_v50  ;;  %v189_v10 = vmul.f32 %v1031_v1, %v1029_v50 }
  0xef   :  { %v198_v61 = vmul.f32 %v1152_v51, %v196_v59  ;;  %v212_v25 = vadd.f32 %v196_v59, %v1367_v4 }
  0xf0   :  { %v199_v62 = vmul.f32 %v1154_v52, %v197_v60  ;;  %v213_v23 = vadd.f32 %v197_v60, %v1371_v5 }
  0xf1   :  { %v200_v6 = vadd.f32 %v198_v61, %v1363_v2  ;;  %v214_v37 = vadd.f32 %v212_v25, %v188_v8 }
  0xf2   :  { %v201_v7 = vadd.f32 %v199_v62, %v1365_v3  ;;  %v215_v35 = vadd.f32 %v213_v23, %v189_v10 }
  0xf3   :  { %v202_v9 = vsub.f32 1.0, %v200_v6 }
  0xf4   :  { %v203_v11 = vsub.f32 1.0, %v201_v7 }
  0xf5   :  { %v204_v17 = vmul.f32 %v202_v9, %v188_v8 }
  0xf6   :  { %v205_v19 = vmul.f32 %v203_v11, %v189_v10 }
  0xf7   :  { %v206_v20 = vadd.f32 %v204_v17, %v126_v12 }
  0xf8   :  { %v207_v22 = vadd.f32 %v205_v19, %v127_v13 }
  0xf9   :  { %v208_v24 = vmul.f32 %v206_v20, %v188_v8  ;;  %v278_v29 = vpop.f32.mrf.mxu0  ;;  %v1144_v8 = vld [vmem:[#allocation13] sm:$0xff]  }
  0xfa   :  { %v209_v27 = vmul.f32 %v207_v22, %v189_v10  ;;  %v1441_v33 = vadd.f32 %v1436_v26, %v278_v29 }
  0xfb   :  { %v210_v28 = vadd.f32 %v208_v24, %v200_v6  ;;  %v1438_v30 = vadd.f32 %v208_v24, %v198_v61  ;;  %v1092_v39 = vpop.f32.mrf.mxu0 }
  0xfc   :  { %v211_v31 = vadd.f32 %v209_v27, %v201_v7  ;;  %v1443_v34 = vadd.f32 %v209_v27, %v199_v62  ;;  %v1143_v7 = vld [vmem:[#allocation13 + $0x8] sm:$0xff]  }
  0xfd   :  { %v281_v45 = vpop.f32.mrf.mxu0  ;;  %1103 = vmatpush3.bf16.msra.mxu0 %v1143_v7 }
  0xfe   :  { %s1119_s4 = spop %1118  ;;  %v1477_v46 = vadd.f32 %v1436_v26, %v281_v45  ;;  %1104 = vmatprep.subr.bf16.mxu0 %v1272_v0 }
  0xff   :  { %p125_p1 = scmp.gt.f32.partialorder %s1119_s4, 0.0 }
 0x101   :  { %s301_s11 = scalar_select %p125_p1, 1, 0  ;;  %1105 = vmatpush3.bf16.msra.mxu0 %v1144_v8 }
 0x103   :  { %v302_v32 = vstv %s301_s11 }
 0x104   :  { %vm1445_vm15 = vcmp.eq.s32.totalorder %v302_v32, 1 }
 0x105   :  { %v316_v40 = vsel %vm1445_vm15, %v210_v28, %v1363_v2  ;;  %v317_v41 = vsel %vm1445_vm15, %v211_v31, %v1365_v3  ;;  %v322_v42 = vsel %vm1445_vm15, %v206_v20, %v126_v12  ;;  %v323_v43 = vsel %vm1445_vm15, %v207_v22, %v127_v13 }
 0x106   :  { %318 = vst.msk [vmem:[#allocation4] sm:$0xff] %vm84_vm0, %v316_v40  ;;  %319 = vst.msk [vmem:[#allocation4 + $0x8] sm:$0xff] %vm84_vm0, %v317_v41  ;;  %v328_v2 = vsel %vm1445_vm15, %v214_v37, %v1367_v4  ;;  %v329_v3 = vsel %vm1445_vm15, %v215_v35, %v1371_v5  ;;  %v304_v44 = vsel %vm1445_vm15, %v1441_v33, %v1387_v16  ;;  %v1093_v4 = vpop.f32.mrf.mxu0  ;;  %v1038_v16 = vld [vmem:[%s1832_s2 + $0x1] ss:$0 sm:$0xff] }
 0x107   :  { %324 = vst.msk [vmem:[#allocation5] sm:$0xff] %vm84_vm0, %v322_v42  ;;  %325 = vst.msk [vmem:[#allocation5 + $0x8] sm:$0xff] %vm84_vm0, %v323_v43  ;;  %v305_v5 = vsel %vm1445_vm15, %v1477_v46, %v1392_v18 }
 0x108   :  { %330 = vst.msk [vmem:[#allocation6] sm:$0xff] %vm84_vm0, %v328_v2  ;;  %331 = vst.msk [vmem:[#allocation6 + $0x8] sm:$0xff] %vm84_vm0, %v329_v3 }
 0x109   :  { %306 = vst.msk [vmem:[#allocation2] sm:$0xff] %vm91_vm1, %v304_v44  ;;  %307 = vst.msk [vmem:[#allocation2 + $0x8] sm:$0xff] %vm91_vm1, %v305_v5 }
 0x10d   :  { %v1487_v47 = vld [vmem:[#allocation4] sm:$0xff]  ;;  %v1489_v48 = vld [vmem:[#allocation4 + $0x8] sm:$0xff] }
 0x10e   :  { %vm334_vm3 = vcmp.lt.f32.partialorder %v1487_v47, 0.9  ;;  %vm335_vm4 = vcmp.lt.f32.partialorder %v1489_v48, 0.9  ;;  %vm397_vm9 = vcmp.lt.f32.partialorder %v1489_v48, 1.0 }
 0x10f   :  { %v1495_v50 = vld [vmem:[#allocation6] sm:$0xff]  ;;  %v1499_v51 = vld [vmem:[#allocation6 + $0x8] sm:$0xff]  ;;  %v1042_v42 = vsel %vm397_vm9, 1.0, %v1272_v0 }
 0x110   :  { %v1491_v49 = vld [vmem:[#allocation2] sm:$0xff]  ;;  %vm338_vm5 = vcmp.lt.f32.partialorder %v1495_v50, 4.0  ;;  %vm339_vm6 = vcmp.lt.f32.partialorder %v1499_v51, 4.0  ;;  %v1503_v52 = vld [vmem:[#allocation2 + $0x8] sm:$0xff] }
 0x111   :  { %v365_v18 = vadd.f32 %v1491_v49, %v1383_v14  ;;  %vm340_vm7 = vmand %vm334_vm3, %vm338_vm5  ;;  %v366_v55 = vadd.f32 %v1503_v52, %v1385_v15 }
 0x112   :  { %vm341_vm8 = vmand %vm335_vm4, %vm339_vm6  ;;  %v342_v54 = vsel %vm340_vm7, 1.0, %v1272_v0 }
 0x113   :  { %v372_v53 = vadd.f32 %v1038_v16, %v365_v18  ;;  %v343_v56 = vsel %vm341_vm8, 1.0, %v1272_v0  ;;  %v344_v57 = vsel %vm84_vm0, %v342_v54, -inf  ;;  %v373_v60 = vadd.f32 %v1038_v16, %v366_v55 }
 0x114   :  { %v345_v58 = vsel %vm84_vm0, %v343_v56, -inf }
 0x115   :  { %v374_v59 = vmul.f32 %v1401_v21, %v372_v53  ;;  %v346_v61 = vmax.f32 %v344_v57, %v345_v58  ;;  %v442_v63 = vpack.c.bf16 %v373_v60, %v372_v53  ;;  %v375_v1 = vmul.f32 %v1401_v21, %v373_v60 }
 0x117   :  { %v376_v62 = vsel %vm91_vm1, %v374_v59, 0.0  ;;  %347 = vmax.xlane.f32.xlu1 %v346_v61  ;;  %1099 = vmatmul.mubr.msk.bf16.vlgmr.msra.gmra.mxu1 %vm91_vm1, %v442_v63  ;;  %v379_v6 = vsel %vm91_vm1, %v375_v1, 0.0  ;;  %v357_v59 = vld [vmem:[#allocation5] sm:$0xff] }
 0x118   :  { %377 = vadd.xlane.f32.xlu0 %v376_v62  ;;  %1114 = vmatprep.mubr.msk.bf16.mxu1 %vm1273_vm2, %v1272_v0  ;;  %vm396_vm2 = vcmp.lt.f32.partialorder %v1487_v47, 1.0 }
 0x119   :  { %v1041_v37 = vsel %vm396_vm2, 1.0, %v1272_v0 }
 0x11b   :  { %380 = vadd.xlane.f32.xlu1 %v379_v6  ;;  %v358_v6 = vld [vmem:[#allocation5 + $0x8] sm:$0xff] }
 0x1a0   :  { %v348_v9 = vpop.xlane.xlu1 %347 }
 0x1a1   :  { %v378_v10 = vpop.xlane.xlu0 %377  ;;  %v349_v11 = vrot.slane %v348_v9, 4 }
 0x1a2   :  { %v382_v12 = vadd.f32 %v378_v10, %v1415_v36 }
 0x1a3   :  { %v350_v13 = vmax.f32 %v348_v9, %v349_v11 }
 0x1a4   :  { %v1039_v17 = vmul.f32 -1.442695, %v382_v12  ;;  %v381_v19 = vpop.xlane.xlu1 %380 }
 0x1a5   :  { %v351_v20 = vrot.slane %v350_v13, 2  ;;  %v383_v22 = vadd.f32 %v381_v19, %v1415_v36 }
 0x1a6   :  { %1155 = vpow2.f32 %v1039_v17 }
 0x1a7   :  { %v1040_v23 = vmul.f32 -1.442695, %v383_v22  ;;  %v352_v24 = vmax.f32 %v350_v13, %v351_v20 }
 0x1a9   :  { %1157 = vpow2.f32 %v1040_v23  ;;  %v353_v25 = vrot.slane %v352_v24, 1 }
 0x1ab   :  { %v354_v27 = vmax.f32 %v352_v24, %v353_v25 }
 0x1ad   :  { %1120 = vpush %v354_v27 }
 0x1b3   :  { %v1156_v28 = vpop.eup %1155 }
 0x1b4   :  { %v390_v29 = vadd.f32 1.0, %v1156_v28 }
 0x1b6   :  { %1159 = vrcp.f32 %v390_v29  ;;  %v1158_v31 = vpop.eup %1157 }
 0x1b7   :  { %v391_v32 = vadd.f32 1.0, %v1158_v31 }
 0x1b9   :  { %1161 = vrcp.f32 %v391_v32 }
 0x1c3   :  { %v1160_v35 = vpop.eup %1159 }
 0x1c4   :  { %v402_v39 = vmul.f32 %v1160_v35, %v1041_v37 }
 0x1c6   :  { %v404_v40 = vadd.f32 %v402_v39, %v1487_v47  ;;  %v1162_v41 = vpop.eup %1161 }
 0x1c7   :  { %v403_v43 = vmul.f32 %v1162_v41, %v1042_v42 }
 0x1c8   :  { %vm414_vm10 = vcmp.le.f32.partialorder %v404_v40, 0.9  ;;  %vm406_vm11 = vcmp.gt.f32.partialorder %v404_v40, 0.9  ;;  %v1050_v40 = vld [vmem:[%s1832_s2 + $0x2] ss:$0 sm:$0xff] }
 0x1c9   :  { %v1045_v2 = vsel %vm414_vm10, 1.0, %v1272_v0  ;;  %v405_v44 = vadd.f32 %v403_v43, %v1489_v48  ;;  %v1043_v4 = vsel %vm406_vm11, 1.0, %v1272_v0 }
 0x1ca   :  { %v420_v3 = vmul.f32 %v1045_v2, %v1041_v37  ;;  %v412_v53 = vmul.f32 %v1043_v4, %v1041_v37 }
 0x1cb   :  { %vm415_vm12 = vcmp.le.f32.partialorder %v405_v44, 0.9  ;;  %vm407_vm13 = vcmp.gt.f32.partialorder %v405_v44, 0.9 }
 0x1cc   :  { %v422_v45 = vmul.f32 %v1160_v35, %v420_v3  ;;  %v1046_v5 = vsel %vm415_vm12, 1.0, %v1272_v0  ;;  %v1044_v56 = vsel %vm407_vm13, 1.0, %v1272_v0  ;;  %v436_v19 = vadd.f32 %v420_v3, %v1495_v50 }
 0x1cd   :  { %v421_v18 = vmul.f32 %v1046_v5, %v1042_v42  ;;  %v413_v61 = vmul.f32 %v1044_v56, %v1042_v42 }
 0x1ce   :  { %v424_v16 = vadd.f32 %v422_v45, %v1487_v47  ;;  %v438_v28 = vadd.f32 %v436_v19, %v412_v53 }
 0x1cf   :  { %v423_v55 = vmul.f32 %v1162_v41, %v421_v18  ;;  %v437_v20 = vadd.f32 %v421_v18, %v1499_v51 }
 0x1d0   :  { %v426_v54 = vsub.f32 1.0, %v424_v16 }
 0x1d1   :  { %v425_v58 = vadd.f32 %v423_v55, %v1489_v48  ;;  %v439_v29 = vadd.f32 %v437_v20, %v413_v61 }
 0x1d2   :  { %v428_v57 = vmul.f32 %v426_v54, %v412_v53 }
 0x1d3   :  { %v427_v62 = vsub.f32 1.0, %v425_v58 }
 0x1d4   :  { %v430_v60 = vadd.f32 %v428_v57, %v357_v59 }
 0x1d5   :  { %v429_v1 = vmul.f32 %v427_v62, %v413_v61  ;;  %v1274_v62 = vmov 0  }
 0x1d6   :  { %v432_v63 = vmul.f32 %v430_v60, %v412_v53  ;;  %1138 = vset.pattern.permute.xlu1 %v1274_v62  ;;  %1137 = vset.pattern.permute.xlu0 %v1274_v62 }
 0x1d7   :  { %v431_v7 = vadd.f32 %v429_v1, %v358_v6  ;;  %v496_v10 = vpop.f32.mrf.mxu1 }
 0x1d8   :  { %v1533_v8 = vadd.f32 %v432_v63, %v422_v45  ;;  %v434_v22 = vadd.f32 %v432_v63, %v424_v16  ;;  %v1540_v24 = vadd.f32 %v1436_v26, %v496_v10 }
 0x1d9   :  { %v433_v9 = vmul.f32 %v431_v7, %v413_v61  ;;  %v1100_v11 = vpop.f32.mrf.mxu1  ;;  %v1146_v61 = vld [vmem:[#allocation13] sm:$0xff]  }
 0x1db   :  { %v1535_v12 = vadd.f32 %v433_v9, %v423_v55  ;;  %v499_v13 = vpop.f32.mrf.mxu1  ;;  %v435_v23 = vadd.f32 %v433_v9, %v425_v58 }
 0x1dc   :  { %v1543_v25 = vadd.f32 %v1436_v26, %v499_v13 }
 0x1dd   :  { %v1101_v17 = vpop.f32.mrf.mxu1 }
 0x1de   :  { %s1121_s13 = spop %1120 }
 0x1df   :  { %p356_p2 = scmp.gt.f32.partialorder %s1121_s13, 0.0 }
 0x1e1   :  { %s519_s16 = scalar_select %p356_p2, 1, 0 }
 0x1e3   :  { %v520_v27 = vstv %s519_s16 }
 0x1e4   :  { %vm1545_vm14 = vcmp.eq.s32.totalorder %v520_v27, 1 }
 0x1e5   :  { %v522_v32 = vsel %vm1545_vm14, %v1540_v24, %v1491_v49  ;;  %v523_v35 = vsel %vm1545_vm14, %v1543_v25, %v1503_v52  ;;  %v534_v37 = vsel %vm1545_vm14, %v434_v22, %v1487_v47  ;;  %v535_v39 = vsel %vm1545_vm14, %v435_v23, %v1489_v48 }
 0x1e6   :  { %524 = vst.msk [vmem:[#allocation2] sm:$0xff] %vm91_vm1, %v522_v32  ;;  %525 = vst.msk [vmem:[#allocation2 + $0x8] sm:$0xff] %vm91_vm1, %v523_v35  ;;  %v540_v49 = vsel %vm1545_vm14, %v430_v60, %v357_v59  ;;  %v541_v52 = vsel %vm1545_vm14, %v431_v7, %v358_v6  ;;  %v546_v47 = vsel %vm1545_vm14, %v438_v28, %v1495_v50  ;;  %v1145_v60 = vld [vmem:[#allocation13 + $0x8] sm:$0xff]  }
 0x1e7   :  { %536 = vst.msk [vmem:[#allocation4] sm:$0xff] %vm84_vm0, %v534_v37  ;;  %537 = vst.msk [vmem:[#allocation4 + $0x8] sm:$0xff] %vm84_vm0, %v535_v39  ;;  %v547_v48 = vsel %vm1545_vm14, %v439_v29, %v1499_v51  ;;  %1111 = vmatpush3.bf16.msra.mxu1 %v1145_v60 }
 0x1e8   :  { %542 = vst.msk [vmem:[#allocation5] sm:$0xff] %vm84_vm0, %v540_v49  ;;  %543 = vst.msk [vmem:[#allocation5 + $0x8] sm:$0xff] %vm84_vm0, %v541_v52  ;;  %1112 = vmatprep.subr.bf16.mxu1 %v1272_v0 }
 0x1e9   :  { %548 = vst.msk [vmem:[#allocation6] sm:$0xff] %vm84_vm0, %v546_v47  ;;  %549 = vst.msk [vmem:[#allocation6 + $0x8] sm:$0xff] %vm84_vm0, %v547_v48 }
 0x1eb   :  { %1113 = vmatpush3.bf16.msra.mxu1 %v1146_v61 }
 0x1ed   :  { %v1584_v41 = vld [vmem:[#allocation2] sm:$0xff]  ;;  %v1586_v42 = vld [vmem:[#allocation2 + $0x8] sm:$0xff] }
 0x1ee   :  { %v1588_v50 = vld [vmem:[#allocation4] sm:$0xff]  ;;  %v583_v51 = vadd.f32 %v1584_v41, %v1383_v14  ;;  %v584_v43 = vadd.f32 %v1586_v42, %v1385_v15  ;;  %v1594_v2 = vld [vmem:[#allocation4 + $0x8] sm:$0xff] }
 0x1ef   :  { %vm552_vm3 = vcmp.lt.f32.partialorder %v1588_v50, 0.9  ;;  %vm553_vm4 = vcmp.lt.f32.partialorder %v1594_v2, 0.9  ;;  %vm614_vm2 = vcmp.lt.f32.partialorder %v1588_v50, 1.0  ;;  %vm615_vm9 = vcmp.lt.f32.partialorder %v1594_v2, 1.0 }
 0x1f0   :  { %v1597_v3 = vld [vmem:[#allocation6] sm:$0xff]  ;;  %v1599_v44 = vld [vmem:[#allocation6 + $0x8] sm:$0xff]  ;;  %v590_v45 = vadd.f32 %v1050_v40, %v583_v51  ;;  %v591_v4 = vadd.f32 %v1050_v40, %v584_v43  ;;  %v1053_v37 = vsel %vm614_vm2, 1.0, %v1272_v0  ;;  %v1054_v47 = vsel %vm615_vm9, 1.0, %v1272_v0 }
 0x1f1   :  { %vm556_vm5 = vcmp.lt.f32.partialorder %v1597_v3, 4.0  ;;  %vm557_vm6 = vcmp.lt.f32.partialorder %v1599_v44, 4.0 }
 0x1f2   :  { %vm558_vm7 = vmand %vm552_vm3, %vm556_vm5  ;;  %v660_v16 = vpack.c.bf16 %v591_v4, %v590_v45  ;;  %v592_v54 = vmul.f32 %v1401_v21, %v590_v45  ;;  %v593_v58 = vmul.f32 %v1401_v21, %v591_v4 }
 0x1f3   :  { %vm559_vm8 = vmand %vm553_vm4, %vm557_vm6  ;;  %v560_v5 = vsel %vm558_vm7, 1.0, %v1272_v0 }
 0x1f4   :  { %v561_v18 = vsel %vm559_vm8, 1.0, %v1272_v0  ;;  %v562_v53 = vsel %vm84_vm0, %v560_v5, -inf  ;;  %1107 = vmatmul.mubr.msk.bf16.vlgmr.msra.gmra.mxu0 %vm91_vm1, %v660_v16  ;;  %v594_v57 = vsel %vm91_vm1, %v592_v54, 0.0  ;;  %v597_v59 = vsel %vm91_vm1, %v593_v58, 0.0 }
 0x1f5   :  { %v563_v55 = vsel %vm84_vm0, %v561_v18, -inf  ;;  %595 = vadd.xlane.f32.xlu1 %v594_v57 }
 0x1f6   :  { %v564_v56 = vmax.f32 %v562_v53, %v563_v55 }
 0x1f8   :  { %565 = vmax.xlane.f32.xlu0 %v564_v56 }
 0x1fc   :  { %598 = vadd.xlane.f32.xlu0 %v597_v59 }
 0x27e   :  { %v596_v63 = vpop.xlane.xlu1 %595 }
 0x27f   :  { %v600_v6 = vadd.f32 %v596_v63, %v1415_v36 }
 0x281   :  { %v566_v1 = vpop.xlane.xlu0 %565  ;;  %v1051_v9 = vmul.f32 -1.442695, %v600_v6 }
 0x282   :  { %v567_v7 = vrot.slane %v566_v1, 4 }
 0x283   :  { %1163 = vpow2.f32 %v1051_v9  ;;  %v576_v9 = vld [vmem:[#allocation5 + $0x8] sm:$0xff] }
 0x284   :  { %v568_v10 = vmax.f32 %v566_v1, %v567_v7  ;;  %v575_v1 = vld [vmem:[#allocation5] sm:$0xff] }
 0x285   :  { %v599_v11 = vpop.xlane.xlu0 %598 }
 0x286   :  { %v569_v13 = vrot.slane %v568_v10, 2  ;;  %v601_v17 = vadd.f32 %v599_v11, %v1415_v36 }
 0x288   :  { %v1052_v19 = vmul.f32 -1.442695, %v601_v17  ;;  %v570_v20 = vmax.f32 %v568_v10, %v569_v13 }
 0x28a   :  { %1165 = vpow2.f32 %v1052_v19  ;;  %v571_v22 = vrot.slane %v570_v20, 1 }
 0x28c   :  { %v572_v23 = vmax.f32 %v570_v20, %v571_v22 }
 0x28e   :  { %1122 = vpush %v572_v23 }
 0x290   :  { %v1164_v27 = vpop.eup %1163 }
 0x291   :  { %v608_v28 = vadd.f32 1.0, %v1164_v27 }
 0x293   :  { %1167 = vrcp.f32 %v608_v28 }
 0x297   :  { %v1166_v29 = vpop.eup %1165 }
 0x298   :  { %v609_v32 = vadd.f32 1.0, %v1166_v29 }
 0x29a   :  { %1169 = vrcp.f32 %v609_v32 }
 0x2a0   :  { %v1168_v35 = vpop.eup %1167 }
 0x2a1   :  { %v620_v39 = vmul.f32 %v1168_v35, %v1053_v37 }
 0x2a3   :  { %v622_v49 = vadd.f32 %v620_v39, %v1588_v50 }
 0x2a5   :  { %vm632_vm10 = vcmp.le.f32.partialorder %v622_v49, 0.9  ;;  %vm624_vm12 = vcmp.gt.f32.partialorder %v622_v49, 0.9 }
 0x2a6   :  { %v1057_v48 = vsel %vm632_vm10, 1.0, %v1272_v0  ;;  %v1055_v53 = vsel %vm624_vm12, 1.0, %v1272_v0 }
 0x2a7   :  { %v1170_v52 = vpop.eup %1169  ;;  %v638_v51 = vmul.f32 %v1057_v48, %v1053_v37  ;;  %v630_v58 = vmul.f32 %v1055_v53, %v1053_v37  ;;  %v1062_v48 = vld [vmem:[%s1832_s2 + $0x3] ss:$0 sm:$0xff] }
 0x2a8   :  { %v621_v40 = vmul.f32 %v1170_v52, %v1054_v47 }
 0x2a9   :  { %v1623_v45 = vmul.f32 %v1168_v35, %v638_v51  ;;  %v654_v19 = vadd.f32 %v638_v51, %v1597_v3 }
 0x2aa   :  { %v623_v43 = vadd.f32 %v621_v40, %v1594_v2 }
 0x2ab   :  { %v642_v16 = vadd.f32 %v1623_v45, %v1588_v50  ;;  %v656_v32 = vadd.f32 %v654_v19, %v630_v58 }
 0x2ac   :  { %vm633_vm11 = vcmp.le.f32.partialorder %v623_v43, 0.9  ;;  %vm625_vm13 = vcmp.gt.f32.partialorder %v623_v43, 0.9 }
 0x2ad   :  { %v1058_v4 = vsel %vm633_vm11, 1.0, %v1272_v0  ;;  %v644_v55 = vsub.f32 1.0, %v642_v16  ;;  %v1056_v56 = vsel %vm625_vm13, 1.0, %v1272_v0 }
 0x2ae   :  { %v639_v5 = vmul.f32 %v1058_v4, %v1054_v47  ;;  %v631_v59 = vmul.f32 %v1056_v56, %v1054_v47 }
 0x2af   :  { %v646_v61 = vmul.f32 %v644_v55, %v630_v58 }
 0x2b0   :  { %v1628_v18 = vmul.f32 %v1170_v52, %v639_v5  ;;  %v655_v20 = vadd.f32 %v639_v5, %v1599_v44 }
 0x2b1   :  { %v648_v7 = vadd.f32 %v646_v61, %v575_v1 }
 0x2b2   :  { %v643_v54 = vadd.f32 %v1628_v18, %v1594_v2  ;;  %v657_v35 = vadd.f32 %v655_v20, %v631_v59 }
 0x2b3   :  { %v1634_v13 = vmul.f32 %v648_v7, %v630_v58 }
 0x2b4   :  { %v645_v57 = vsub.f32 1.0, %v643_v54  ;;  %v714_v60 = vpop.f32.mrf.mxu0 }
 0x2b5   :  { %v652_v22 = vadd.f32 %v1634_v13, %v642_v16  ;;  %v1643_v27 = vadd.f32 %v1436_v26, %v714_v60 }
 0x2b6   :  { %v647_v62 = vmul.f32 %v645_v57, %v631_v59  ;;  %v1108_v63 = vpop.f32.mrf.mxu0 }
 0x2b8   :  { %v717_v6 = vpop.f32.mrf.mxu0  ;;  %v649_v10 = vadd.f32 %v647_v62, %v576_v9 }
 0x2b9   :  { %v1646_v28 = vadd.f32 %v1436_v26, %v717_v6 }
 0x2ba   :  { %v1109_v11 = vpop.f32.mrf.mxu0  ;;  %v1636_v17 = vmul.f32 %v649_v10, %v631_v59 }
 0x2bb   :  { %v128_v11 = vld [vmem:[#allocation3] sm:$0xff] }
 0x2bc   :  { %v653_v23 = vadd.f32 %v1636_v17, %v643_v54  ;;  %v659_v63 = vadd.f32 %v1636_v17, %v1628_v18  ;;  %v285_v18 = vsub.f32 %v1441_v33, %v128_v11 }
 0x2bf   :  { %s1123_s19 = spop %1122 }
 0x2c0   :  { %p574_p3 = scmp.gt.f32.partialorder %s1123_s19, 0.0 }
 0x2c2   :  { %s737_s20 = scalar_select %p574_p3, 1, 0 }
 0x2c4   :  { %v738_v29 = vstv %s737_s20 }
 0x2c5   :  { %vm1648_vm3 = vcmp.eq.s32.totalorder %v738_v29, 1 }
 0x2c6   :  { %v740_v39 = vsel %vm1648_vm3, %v1643_v27, %v1584_v41  ;;  %v741_v49 = vsel %vm1648_vm3, %v1646_v28, %v1586_v42  ;;  %v752_v52 = vsel %vm1648_vm3, %v652_v22, %v1588_v50  ;;  %v753_v47 = vsel %vm1648_vm3, %v653_v23, %v1594_v2 }
 0x2c7   :  { %742 = vst.msk [vmem:[#allocation2] sm:$0xff] %vm91_vm1, %v740_v39  ;;  %743 = vst.msk [vmem:[#allocation2 + $0x8] sm:$0xff] %vm91_vm1, %v741_v49  ;;  %v758_v41 = vsel %vm1648_vm3, %v648_v7, %v575_v1  ;;  %v759_v42 = vsel %vm1648_vm3, %v649_v10, %v576_v9  ;;  %v764_v50 = vsel %vm1648_vm3, %v656_v32, %v1597_v3 }
 0x2c8   :  { %754 = vst.msk [vmem:[#allocation4] sm:$0xff] %vm84_vm0, %v752_v52  ;;  %755 = vst.msk [vmem:[#allocation4 + $0x8] sm:$0xff] %vm84_vm0, %v753_v47  ;;  %v765_v2 = vsel %vm1648_vm3, %v657_v35, %v1599_v44 }
 0x2c9   :  { %760 = vst.msk [vmem:[#allocation5] sm:$0xff] %vm84_vm0, %v758_v41  ;;  %761 = vst.msk [vmem:[#allocation5 + $0x8] sm:$0xff] %vm84_vm0, %v759_v42 }
 0x2ca   :  { %766 = vst.msk [vmem:[#allocation6] sm:$0xff] %vm84_vm0, %v764_v50  ;;  %767 = vst.msk [vmem:[#allocation6 + $0x8] sm:$0xff] %vm84_vm0, %v765_v2 }
 0x2ce   :  { %v1687_v40 = vld [vmem:[#allocation2] sm:$0xff]  ;;  %v1689_v51 = vld [vmem:[#allocation2 + $0x8] sm:$0xff] }
 0x2cf   :  { %v1691_v3 = vld [vmem:[#allocation4] sm:$0xff]  ;;  %v801_v44 = vadd.f32 %v1687_v40, %v1383_v14  ;;  %v802_v43 = vadd.f32 %v1689_v51, %v1385_v15  ;;  %v1697_v4 = vld [vmem:[#allocation4 + $0x8] sm:$0xff] }
 0x2d0   :  { %vm770_vm4 = vcmp.lt.f32.partialorder %v1691_v3, 0.9  ;;  %vm771_vm5 = vcmp.lt.f32.partialorder %v1697_v4, 0.9  ;;  %vm833_vm9 = vcmp.lt.f32.partialorder %v1697_v4, 1.0 }
 0x2d1   :  { %v1700_v5 = vld [vmem:[#allocation6] sm:$0xff]  ;;  %v1702_v16 = vld [vmem:[#allocation6 + $0x8] sm:$0xff]  ;;  %v808_v53 = vadd.f32 %v1062_v48, %v801_v44  ;;  %v809_v54 = vadd.f32 %v1062_v48, %v802_v43 }
 0x2d2   :  { %vm774_vm6 = vcmp.lt.f32.partialorder %v1700_v5, 4.0  ;;  %vm775_vm7 = vcmp.lt.f32.partialorder %v1702_v16, 4.0 }
 0x2d3   :  { %vm776_vm8 = vmand %vm770_vm4, %vm774_vm6  ;;  %v878_v15 = vpack.c.bf16 %v809_v54, %v808_v53  ;;  %v811_v55 = vmul.f32 %v1401_v21, %v809_v54  ;;  %v810_v56 = vmul.f32 %v1401_v21, %v808_v53  ;;  %v658_v21 = vadd.f32 %v1634_v13, %v1623_v45 }
 0x2d4   :  { %vm777_vm2 = vmand %vm771_vm5, %vm775_vm7  ;;  %v778_v14 = vsel %vm776_vm8, 1.0, %v1272_v0 }
 0x2d5   :  { %v779_v57 = vsel %vm777_vm2, 1.0, %v1272_v0  ;;  %1115 = vmatmul.mubr.msk.bf16.vlgmr.msra.gmra.mxu1 %vm91_vm1, %v878_v15  ;;  %v815_v58 = vsel %vm91_vm1, %v811_v55, 0.0  ;;  %v812_v59 = vsel %vm91_vm1, %v810_v56, 0.0  ;;  %v780_v60 = vsel %vm84_vm0, %v778_v14, -inf }
 0x2d6   :  { %v781_v61 = vsel %vm84_vm0, %v779_v57, -inf  ;;  %816 = vadd.xlane.f32.xlu0 %v815_v58  ;;  %813 = vadd.xlane.f32.xlu1 %v812_v59  ;;  %v1066_v59 = vsel %vm833_vm9, 1.0, %v1272_v0 }
 0x2d7   :  { %v782_v62 = vmax.f32 %v780_v60, %v781_v61 }
 0x2da   :  { %783 = vmax.xlane.f32.xlu1 %v782_v62 }
 0x2eb   :  { %294 = vperm.xlu1 %1138, %v1443_v34  }
 0x2ec   :  { %289 = vperm.xlu0 %1137, %v1438_v30  }
 0x2ef   :  { %507 = vperm.xlu1 %1138, %v1533_v8   ;;  %v129_v8 = vld [vmem:[#allocation3 + $0x8] sm:$0xff] }
 0x2f0   :  { %v286_v13 = vsub.f32 %v1477_v46, %v129_v8 }
 0x2f3   :  { %512 = vperm.xlu1 %1138, %v1535_v12  }
 0x2f7   :  { %725 = vperm.xlu1 %1138, %v658_v21  }
 0x2fb   :  { %730 = vperm.xlu1 %1138, %v659_v63  }
 0x35f   :  { %v814_v1 = vpop.xlane.xlu1 %813  ;;  %v817_v6 = vpop.xlane.xlu0 %816 }
 0x360   :  { %v818_v7 = vadd.f32 %v814_v1, %v1415_v36  ;;  %v819_v34 = vadd.f32 %v817_v6, %v1415_v36 }
 0x362   :  { %v1063_v9 = vmul.f32 -1.442695, %v818_v7  ;;  %v1064_v30 = vmul.f32 -1.442695, %v819_v34 }
 0x363   :  { %v784_v10 = vpop.xlane.xlu1 %783 }
 0x364   :  { %1171 = vpow2.f32 %v1063_v9  ;;  %v785_v12 = vrot.slane %v784_v10, 4 }
 0x365   :  { %1173 = vpow2.f32 %v1064_v30 }
 0x366   :  { %v786_v45 = vmax.f32 %v784_v10, %v785_v12 }
 0x367   :  { %v295_v17 = vpop.permute.xlu1 %294  ;;  %v290_v19 = vpop.permute.xlu0 %289 }
 0x368   :  { %v787_v20 = vrot.slane %v786_v45, 2  ;;  %v298_v22 = vmul.f32 %v295_v17, %v286_v13  ;;  %v297_v23 = vmul.f32 %v290_v19, %v285_v18 }
 0x36a   :  { %v300_v29 = vadd.f32 %v298_v22, %v129_v8  ;;  %v299_v36 = vadd.f32 %v297_v23, %v128_v11  ;;  %v788_v32 = vmax.f32 %v786_v45, %v787_v20 }
 0x36b   :  { %v508_v46 = vpop.permute.xlu1 %507 }
 0x36c   :  { %v311_v35 = vsel %vm1445_vm15, %v300_v29, %v129_v8  ;;  %v310_v39 = vsel %vm1445_vm15, %v299_v36, %v128_v11  ;;  %v789_v49 = vrot.slane %v788_v32, 1  ;;  %vm832_vm15 = vcmp.lt.f32.partialorder %v1691_v3, 1.0  ;;  %v793_v29 = vld [vmem:[#allocation5] sm:$0xff] }
 0x36d   :  { %313 = vst.msk [vmem:[#allocation3 + $0x8] sm:$0xff] %vm91_vm1, %v311_v35  ;;  %312 = vst.msk [vmem:[#allocation3] sm:$0xff] %vm91_vm1, %v310_v39  ;;  %v1065_v56 = vsel %vm832_vm15, 1.0, %v1272_v0 }
 0x36e   :  { %v790_v33 = vmax.f32 %v788_v32, %v789_v49 }
 0x36f   :  { %v513_v44 = vpop.permute.xlu1 %512 }
 0x370   :  { %1124 = vpush %v790_v33  ;;  %v794_v33 = vld [vmem:[#allocation5 + $0x8] sm:$0xff] }
 0x371   :  { %v1172_v52 = vpop.eup %1171 }
 0x372   :  { %v1174_v47 = vpop.eup %1173  ;;  %v826_v41 = vadd.f32 1.0, %v1172_v52 }
 0x373   :  { %v827_v42 = vadd.f32 1.0, %v1174_v47 }
 0x374   :  { %1175 = vrcp.f32 %v826_v41  ;;  %v359_v50 = vld [vmem:[#allocation3] sm:$0xff]  ;;  %v360_v2 = vld [vmem:[#allocation3 + $0x8] sm:$0xff] }
 0x375   :  { %1177 = vrcp.f32 %v827_v42  ;;  %v503_v48 = vsub.f32 %v1540_v24, %v359_v50  ;;  %v504_v38 = vsub.f32 %v1543_v25, %v360_v2  ;;  %v726_v24 = vpop.permute.xlu1 %725 }
 0x377   :  { %v515_v43 = vmul.f32 %v508_v46, %v503_v48  ;;  %v516_v53 = vmul.f32 %v513_v44, %v504_v38 }
 0x379   :  { %v517_v54 = vadd.f32 %v515_v43, %v359_v50  ;;  %v518_v14 = vadd.f32 %v516_v53, %v360_v2  ;;  %v731_v1 = vpop.permute.xlu1 %730 }
 0x37b   :  { %v528_v15 = vsel %vm1545_vm14, %v517_v54, %v359_v50  ;;  %v529_v55 = vsel %vm1545_vm14, %v518_v14, %v360_v2 }
 0x37c   :  { %530 = vst.msk [vmem:[#allocation3] sm:$0xff] %vm91_vm1, %v528_v15  ;;  %531 = vst.msk [vmem:[#allocation3 + $0x8] sm:$0xff] %vm91_vm1, %v529_v55 }
 0x381   :  { %v1176_v25 = vpop.eup %1175 }
 0x382   :  { %v1178_v57 = vpop.eup %1177  ;;  %v838_v58 = vmul.f32 %v1176_v25, %v1065_v56 }
 0x383   :  { %v577_v60 = vld [vmem:[#allocation3] sm:$0xff]  ;;  %v578_v61 = vld [vmem:[#allocation3 + $0x8] sm:$0xff]  ;;  %v839_v31 = vmul.f32 %v1178_v57, %v1066_v59 }
 0x384   :  { %v721_v62 = vsub.f32 %v1643_v27, %v577_v60  ;;  %v722_v21 = vsub.f32 %v1646_v28, %v578_v61  ;;  %v840_v63 = vadd.f32 %v838_v58, %v1691_v3 }
 0x385   :  { %v841_v6 = vadd.f32 %v839_v31, %v1697_v4 }
 0x386   :  { %v733_v7 = vmul.f32 %v726_v24, %v721_v62  ;;  %v734_v34 = vmul.f32 %v731_v1, %v722_v21  ;;  %vm850_vm14 = vcmp.le.f32.partialorder %v840_v63, 0.9  ;;  %vm842_vm11 = vcmp.gt.f32.partialorder %v840_v63, 0.9 }
 0x387   :  { %v1069_v9 = vsel %vm850_vm14, 1.0, %v1272_v0  ;;  %vm851_vm10 = vcmp.le.f32.partialorder %v841_v6, 0.9  ;;  %v1067_v45 = vsel %vm842_vm11, 1.0, %v1272_v0  ;;  %vm843_vm12 = vcmp.gt.f32.partialorder %v841_v6, 0.9 }
 0x388   :  { %v735_v30 = vadd.f32 %v733_v7, %v577_v60  ;;  %v736_v10 = vadd.f32 %v734_v34, %v578_v61  ;;  %v856_v8 = vmul.f32 %v1069_v9, %v1065_v56  ;;  %v1070_v11 = vsel %vm851_vm10, 1.0, %v1272_v0 }
 0x389   :  { %v857_v13 = vmul.f32 %v1070_v11, %v1066_v59  ;;  %v848_v19 = vmul.f32 %v1067_v45, %v1065_v56  ;;  %v1068_v22 = vsel %vm843_vm12, 1.0, %v1272_v0 }
 0x38a   :  { %v746_v27 = vsel %vm1648_vm3, %v735_v30, %v577_v60  ;;  %v747_v28 = vsel %vm1648_vm3, %v736_v10, %v578_v61  ;;  %v858_v12 = vmul.f32 %v1176_v25, %v856_v8  ;;  %v849_v36 = vmul.f32 %v1068_v22, %v1066_v59 }
 0x38b   :  { %748 = vst.msk [vmem:[#allocation3] sm:$0xff] %vm91_vm1, %v746_v27  ;;  %749 = vst.msk [vmem:[#allocation3 + $0x8] sm:$0xff] %vm91_vm1, %v747_v28  ;;  %v859_v17 = vmul.f32 %v1178_v57, %v857_v13  ;;  %v872_v0 = vadd.f32 %v856_v8, %v1700_v5  ;;  %v873_v38 = vadd.f32 %v857_v13, %v1702_v16 }
 0x38c   :  { %v860_v18 = vadd.f32 %v858_v12, %v1691_v3 }
 0x38d   :  { %v861_v23 = vadd.f32 %v859_v17, %v1697_v4  ;;  %v874_v15 = vadd.f32 %v872_v0, %v848_v19  ;;  %v875_v55 = vadd.f32 %v873_v38, %v849_v36 }
 0x38e   :  { %v862_v20 = vsub.f32 1.0, %v860_v18 }
 0x38f   :  { %v863_v32 = vsub.f32 1.0, %v861_v23 }
 0x390   :  { %v864_v37 = vmul.f32 %v862_v20, %v848_v19 }
 0x391   :  { %v865_v39 = vmul.f32 %v863_v32, %v849_v36 }
 0x392   :  { %v866_v35 = vadd.f32 %v864_v37, %v793_v29  ;;  %v796_v21 = vld [vmem:[#allocation3 + $0x8] sm:$0xff] }
 0x393   :  { %v867_v52 = vadd.f32 %v865_v39, %v794_v33 }
 0x394   :  { %v868_v49 = vmul.f32 %v866_v35, %v848_v19 }
 0x395   :  { %v932_v46 = vpop.f32.mrf.mxu1  ;;  %v869_v42 = vmul.f32 %v867_v52, %v849_v36 }
 0x396   :  { %v876_v47 = vadd.f32 %v868_v49, %v858_v12  ;;  %v933_v44 = vadd.f32 %v1436_v26, %v932_v46  ;;  %v870_v43 = vadd.f32 %v868_v49, %v860_v18 }
 0x397   :  { %v1116_v41 = vpop.f32.mrf.mxu1  ;;  %v877_v2 = vadd.f32 %v869_v42, %v859_v17  ;;  %v871_v54 = vadd.f32 %v869_v42, %v861_v23 }
 0x398   :  { %943 = vperm.xlu1 %1138, %v876_v47  }
 0x399   :  { %v935_v50 = vpop.f32.mrf.mxu1 }
 0x39a   :  { %v936_v53 = vadd.f32 %v1436_v26, %v935_v50 }
 0x39b   :  { %v1117_v48 = vpop.f32.mrf.mxu1 }
 0x39c   :  { %948 = vperm.xlu1 %1138, %v877_v2   ;;  %v940_v1 = vsub.f32 %v936_v53, %v796_v21 }
 0x3a1   :  { %s1125_s2 = spop %1124 }
 0x3a2   :  { %p792_p4 = scmp.gt.f32.partialorder %s1125_s2, 0.0 }
 0x3a4   :  { %s955_s23 = scalar_select %p792_p4, 1, 0 }
 0x3a6   :  { %v956_v14 = vstv %s955_s23 }
 0x3a7   :  { %vm1766_vm13 = vcmp.eq.s32.totalorder %v956_v14, 1 }
 0x3a8   :  { %v958_v25 = vsel %vm1766_vm13, %v933_v44, %v1687_v40  ;;  %v959_v56 = vsel %vm1766_vm13, %v936_v53, %v1689_v51  ;;  %v970_v26 = vsel %vm1766_vm13, %v870_v43, %v1691_v3  ;;  %v971_v57 = vsel %vm1766_vm13, %v871_v54, %v1697_v4 }
 0x3a9   :  { %960 = vst.msk [vmem:[#allocation2] sm:$0xff] %vm91_vm1, %v958_v25  ;;  %961 = vst.msk [vmem:[#allocation2 + $0x8] sm:$0xff] %vm91_vm1, %v959_v56  ;;  %v976_v40 = vsel %vm1766_vm13, %v866_v35, %v793_v29  ;;  %v977_v51 = vsel %vm1766_vm13, %v867_v52, %v794_v33  ;;  %v982_v3 = vsel %vm1766_vm13, %v874_v15, %v1700_v5 }
 0x3aa   :  { %972 = vst.msk [vmem:[#allocation4] sm:$0xff] %vm84_vm0, %v970_v26  ;;  %973 = vst.msk [vmem:[#allocation4 + $0x8] sm:$0xff] %vm84_vm0, %v971_v57  ;;  %v983_v4 = vsel %vm1766_vm13, %v875_v55, %v1702_v16  ;;  %v795_v16 = vld [vmem:[#allocation3] sm:$0xff] }
 0x3ab   :  { %978 = vst.msk [vmem:[#allocation5] sm:$0xff] %vm84_vm0, %v976_v40  ;;  %979 = vst.msk [vmem:[#allocation5 + $0x8] sm:$0xff] %vm84_vm0, %v977_v51  ;;  %v939_v61 = vsub.f32 %v933_v44, %v795_v16 }
 0x3ac   :  { %984 = vst.msk [vmem:[#allocation6] sm:$0xff] %vm84_vm0, %v982_v3  ;;  %985 = vst.msk [vmem:[#allocation6 + $0x8] sm:$0xff] %vm84_vm0, %v983_v4 }
 0x3b2   :  { %v990_v58 = vld [vmem:[#allocation5] sm:$0xff]  ;;  %v991_v59 = vld [vmem:[#allocation5 + $0x8] sm:$0xff] }
 0x3b3   :  { %v994_v60 = vld [vmem:[#allocation6] sm:$0xff]  ;;  %992 = vst.msk [vmem:[%s1838_s8] sm:$0xff] %vm84_vm0, %v990_v58  ;;  %993 = vst.msk [vmem:[%s1838_s8 + $0x8] sm:$0xff] %vm84_vm0, %v991_v59  ;;  %v995_v5 = vld [vmem:[#allocation6 + $0x8] sm:$0xff]  ;;  %s1275_s8 = smov [#allocation14]  }
 0x3b4   :  { %996 = vst.msk [vmem:[%s1839_s9] sm:$0xff] %vm84_vm0, %v994_v60  ;;  %997 = vst.msk [vmem:[%s1839_s9 + $0x8] sm:$0xff] %vm84_vm0, %v995_v5  ;;  %s1003_s9 = sshll.u32 %s1275_s8, 4  ;;  %s1004_s9 = int_to_ptr.vmem [resolvable:$true] %s1003_s9 }
 0x3b5   :  { %s1239_s3 = scalar_lea.vmem %s1004_s9, 256  ;;  %p1244_p6 = scmp.lt.s32.totalorder %s1004_s9, %s1004_s9 }
 0x3b6   :  { %p1240_p5 = scmp.ne.s32.totalorder %s1004_s9, %s1239_s3  ;;  %p1245_p7 = scmp.lt.s32.totalorder %s1239_s3, %s1239_s3 }
 0x3b8   :  { %p1246_p8 = por %p1245_p7, %p1244_p6 }
 0x3ba   :  { %p1247_p9 = pnand %p1246_p8, %p1240_p5 }
 0x413   :  { %v944_v31 = vpop.permute.xlu1 %943 }
 0x414   :  { %v951_v62 = vmul.f32 %v944_v31, %v939_v61 }
 0x416   :  { %v953_v63 = vadd.f32 %v951_v62, %v795_v16 }
 0x417   :  { %v949_v6 = vpop.permute.xlu1 %948 }
 0x418   :  { %v964_v7 = vsel %vm1766_vm13, %v953_v63, %v795_v16  ;;  %v952_v34 = vmul.f32 %v949_v6, %v940_v1 }
 0x419   :  { %966 = vst.msk [vmem:[#allocation3] sm:$0xff] %vm91_vm1, %v964_v7 }
 0x41a   :  { %v954_v9 = vadd.f32 %v952_v34, %v796_v21 }
 0x41c   :  { %v965_v30 = vsel %vm1766_vm13, %v954_v9, %v796_v21 }
 0x41d   :  { %967 = vst.msk [vmem:[#allocation3 + $0x8] sm:$0xff] %vm91_vm1, %v965_v30 }
 0x420   :  { %v986_v10 = vld [vmem:[#allocation3] sm:$0xff] }
 0x421   :  { %988 = vst.msk [vmem:[#allocation14] sm:$0xff] %vm91_vm1, %v986_v10 }
 0x424   :  { %v987_v8 = vld [vmem:[#allocation3 + $0x8] sm:$0xff] }
 0x425   :  { %989 = vst.msk [vmem:[#allocation14 + $0x8] sm:$0xff] %vm91_vm1, %v987_v8 }
 0x426   :  { %1250 = shalt.err (!%p1247_p9)
}
 0x427   :  { %1009 = dma.vmem_to_hbm [thread:$0]  %s1004_s9, 256, %s1837_s7, [#allocation10], %s1267_s14, %s1267_s14, %s1268_s15  }
 0x428   :  { %1263 = dma.done.wait [#allocation10], 256  }
 0x429   :  { %1264 = vsyncadd [#allocation10], 4294967040 }
 0x42a   :  { %1021 = vsyncpa [#allocation9], 1 }
 0x42b   :  { %1022 = vsyncpa [#allocation12], 1 }
 0x42c   :  { %1023 = vsyncpa [#allocation10], 1 }

</bundles_post_ra>
